<compile_context>
chip_gen: v6e
topology: v6e:2x2x1
jax: 0.10.0
libtpu: 0.0.40
codegen_flags: <defaults>
</compile_context>

<pallas_src>
import math

import jax
import jax.numpy as jnp
from jax.experimental import pallas as pl
from jax.experimental.pallas import tpu as pltpu

CLASS_SIZE = 100
IN_DIM = 300 + CLASS_SIZE  # 400
H1 = 800
H2 = 400
OUT_DIM = 300


def cvae_kernel(
    x_ref, eps_ref,
    w_enc1_ref, b_enc1_ref,
    w_enc2_ref, b_enc2_ref,
    w_mv_ref, b_mv_ref,
    w_dec1_ref, b_dec1_ref,
    w_dec2_ref, b_dec2_ref,
    w_dec3_ref, b_dec3_ref,
    xrec_ref, mvz_ref,
):
    z_dim = eps_ref.shape[-1]

    def linear(h, w_ref, b_ref):
        # bf16 x bf16 MXU matmul with f32 accumulation; bias add in f32.
        return jnp.dot(h.astype(jnp.bfloat16), w_ref[...],
                       preferred_element_type=jnp.float32) + b_ref[...]

    x = x_ref[...]

    # ---- encoder ----
    h = jnp.maximum(linear(x, w_enc1_ref, b_enc1_ref), 0.0)
    h = jnp.maximum(linear(h, w_enc2_ref, b_enc2_ref), 0.0)

    # fused mean|var projection: one (H2, 2*z) matmul instead of two (H2, z)
    mv = linear(h, w_mv_ref, b_mv_ref)          # (tm, 2*z) = [mean | logvar]
    mean = mv[:, :z_dim]
    var = mv[:, z_dim:]                         # log-variance (PyTorch naming)

    # ---- reparameterization: z = mean + eps * exp(0.5 * var) ----
    z = mean + eps_ref[...] * jnp.exp(0.5 * var)

    # ---- decoder ----
    d = jnp.maximum(linear(z, w_dec1_ref, b_dec1_ref), 0.0)
    d = jnp.maximum(linear(d, w_dec2_ref, b_dec2_ref), 0.0)
    xrec_ref[...] = linear(d, w_dec3_ref, b_dec3_ref)

    # Lane-dense small-output slab [mean | var | z | 0-pad] written with one
    # full-width (unmasked) store; wrapper slices the padding off.
    pad = mvz_ref.shape[-1] - 3 * z_dim
    parts = [mv, z]
    if pad:
        parts.append(jnp.zeros((mv.shape[0], pad), jnp.float32))
    mvz_ref[...] = jnp.concatenate(parts, axis=-1)


def init_linear(key, in_f, out_f):
    """Deterministic PyTorch-style nn.Linear init; weight returned as (in, out)."""
    k_w, k_b = jax.random.split(key)
    bound = 1.0 / math.sqrt(in_f)
    w = jax.random.uniform(k_w, (in_f, out_f), jnp.float32, -bound, bound)
    b = jax.random.uniform(k_b, (1, out_f), jnp.float32, -bound, bound)
    return w, b


def init_cvae_params(key, z_dim):
    keys = jax.random.split(key, 7)
    return {
        "enc1": init_linear(keys[0], IN_DIM, H1),
        "enc2": init_linear(keys[1], H1, H2),
        "encmean": init_linear(keys[2], H2, z_dim),
        "encvar": init_linear(keys[3], H2, z_dim),
        "dec1": init_linear(keys[4], z_dim, H2),
        "dec2": init_linear(keys[5], H2, H1),
        "dec3": init_linear(keys[6], H1, OUT_DIM),
    }


def pack_params(params):
    """bf16 weights, f32 biases; fuse encmean/encvar into a single projection.

    Do this once per model; the packed params can be reused across calls.
    """
    def wc(w):
        return w.astype(jnp.bfloat16)

    w_mean, b_mean = params["encmean"]
    w_var, b_var = params["encvar"]
    return {
        "enc1": (wc(params["enc1"][0]), params["enc1"][1]),
        "enc2": (wc(params["enc2"][0]), params["enc2"][1]),
        "mv": (wc(jnp.concatenate([w_mean, w_var], axis=1)),
               jnp.concatenate([b_mean, b_var], axis=1)),
        "dec1": (wc(params["dec1"][0]), params["dec1"][1]),
        "dec2": (wc(params["dec2"][0]), params["dec2"][1]),
        "dec3": (wc(params["dec3"][0]), params["dec3"][1]),
    }


_PACKED_NAMES = ("enc1", "enc2", "mv", "dec1", "dec2", "dec3")


def cvae_forward(x, eps, packed):
    B = x.shape[0]
    z_dim = eps.shape[1]
    mvz_w = ((3 * z_dim + 127) // 128) * 128  # lane-dense slab width (mult of 128)

    # Batch tiling: biggest tile that keeps VMEM comfortable (~16 MiB at 1024);
    # weights (constant index_map) stay VMEM-resident across grid steps while
    # activation/output DMAs pipeline.
    if B >= 1024:
        tm = 1024
    elif B >= 512:
        tm = 512
    elif B >= 256:
        tm = 256
    elif B >= 128:
        tm = 128
    else:
        tm = B
    num_steps = pl.cdiv(B, tm)
    grid = (num_steps,)

    def resident_spec(shape):
        # Constant index -> fetched once, VMEM-resident across the grid.
        # Single-buffered: never re-fetched, so double-buffering wastes VMEM.
        try:
            return pl.BlockSpec(shape, lambda i: (0, 0),
                                pipeline_mode=pl.Buffered(1))
        except (TypeError, ValueError):  # older JAX without pipeline_mode
            return pl.BlockSpec(shape, lambda i: (0, 0))

    weight_args = []
    weight_specs = []
    for name in _PACKED_NAMES:
        w, b = packed[name]
        weight_args += [w, b]
        weight_specs += [resident_spec(w.shape), resident_spec(b.shape)]

    in_specs = [
        pl.BlockSpec((tm, IN_DIM), lambda i: (i, 0)),
        pl.BlockSpec((tm, z_dim), lambda i: (i, 0)),
    ] + weight_specs

    out_specs = (
        pl.BlockSpec((tm, OUT_DIM), lambda i: (i, 0)),
        pl.BlockSpec((tm, mvz_w), lambda i: (i, 0)),
    )
    out_shape = (
        jax.ShapeDtypeStruct((B, OUT_DIM), jnp.float32),   # x_recon
        jax.ShapeDtypeStruct((B, mvz_w), jnp.float32),     # [mean|var|z|pad]
    )

    # Megacore (v7x) batch sharding only pays off with >=2 grid steps and a
    # large batch; otherwise it just doubles the constant-index weight stream.
    semantics = ("parallel",) if (num_steps >= 2 and B >= 1024) else ("arbitrary",)

    flops = 2 * B * (IN_DIM * H1 + H1 * H2 + H2 * (2 * z_dim)
                     + z_dim * H2 + H2 * H1 + H1 * OUT_DIM)
    param_bytes = sum(
        int(w.size) * w.dtype.itemsize + int(b.size) * b.dtype.itemsize
        for w, b in (packed[n] for n in _PACKED_NAMES))
    bytes_accessed = (param_bytes + int(x.size) * 4 + int(eps.size) * 4
                      + B * OUT_DIM * 4 + B * mvz_w * 4)
    cost = pl.CostEstimate(flops=flops, transcendentals=B * z_dim,
                           bytes_accessed=bytes_accessed)

    xrec, mvz = pl.pallas_call(
        cvae_kernel,
        out_shape=out_shape,
        grid=grid,
        in_specs=in_specs,
        out_specs=out_specs,
        compiler_params=pltpu.CompilerParams(
            dimension_semantics=semantics,
            vmem_limit_bytes=40 << 20,   # safe under v7x 64 MiB physical cap
        ),
        cost_estimate=cost,
    )(x, eps, *weight_args)

    mean = mvz[:, :z_dim]
    var = mvz[:, z_dim:2 * z_dim]
    z = mvz[:, 2 * z_dim:3 * z_dim]
    return xrec, mean, var, z


def cvae_reference(x, eps, packed):
    """Pure-JAX reference with the same bf16 operand rounding as the kernel."""
    def lin(h, name):
        w, b = packed[name]
        return jnp.dot(h.astype(jnp.bfloat16), w,
                       preferred_element_type=jnp.float32) + b

    z_dim = eps.shape[1]
    h = jax.nn.relu(lin(x, "enc1"))
    h = jax.nn.relu(lin(h, "enc2"))
    mv = lin(h, "mv")
    mean, var = mv[:, :z_dim], mv[:, z_dim:]
    z = mean + eps * jnp.exp(0.5 * var)
    d = jax.nn.relu(lin(z, "dec1"))
    d = jax.nn.relu(lin(d, "dec2"))
    xrec = lin(d, "dec3")
    return xrec, mean, var, z


if __name__ == "__main__":
    key = jax.random.PRNGKey(0)
    k_params, k_glove, k_label, k_eps = jax.random.split(key, 4)

    B = 8
    Z_DIM = 32

    params = init_cvae_params(k_params, Z_DIM)
    packed = pack_params(params)

    # Input = [glove embedding (300) | one-hot class label (100)]
    glove = jax.random.normal(k_glove, (B, 300), jnp.float32)
    labels = jax.random.randint(k_label, (B,), 0, CLASS_SIZE)
    onehot = jnp.eye(CLASS_SIZE, dtype=jnp.float32)[labels]
    x = jnp.concatenate([glove, onehot], axis=-1)  # (B, 400)

    # eps ~ N(0,1), matching torch.randn(mean.shape) in _sample_z
    eps = jax.random.normal(k_eps, (B, Z_DIM), jnp.float32)

    outs = cvae_forward(x, eps, packed)
    outs = jax.block_until_ready(outs)

    ref = cvae_reference(x, eps, packed)
    for o, r in zip(outs, ref):
        assert o.shape == r.shape and o.dtype == r.dtype
        assert bool(jnp.isfinite(o).all()), "non-finite output"
        assert jnp.allclose(o, r, atol=2e-3, rtol=2e-3), "mismatch vs reference"

    print("KERNEL_OK")
</pallas_src>

<mosaic_0001>
module attributes {stable_mosaic.version = 11 : i64} {
  func.func @cvae_kernel(%arg0: i32, %arg1: memref<8x400xf32, #tpu.memory_space<vmem>>, %arg2: memref<8x32xf32, #tpu.memory_space<vmem>>, %arg3: memref<400x800xbf16, #tpu.memory_space<vmem>>, %arg4: memref<1x800xf32, #tpu.memory_space<vmem>>, %arg5: memref<800x400xbf16, #tpu.memory_space<vmem>>, %arg6: memref<1x400xf32, #tpu.memory_space<vmem>>, %arg7: memref<400x64xbf16, #tpu.memory_space<vmem>>, %arg8: memref<1x64xf32, #tpu.memory_space<vmem>>, %arg9: memref<32x400xbf16, #tpu.memory_space<vmem>>, %arg10: memref<1x400xf32, #tpu.memory_space<vmem>>, %arg11: memref<400x800xbf16, #tpu.memory_space<vmem>>, %arg12: memref<1x800xf32, #tpu.memory_space<vmem>>, %arg13: memref<800x300xbf16, #tpu.memory_space<vmem>>, %arg14: memref<1x300xf32, #tpu.memory_space<vmem>>, %arg15: memref<8x300xf32, #tpu.memory_space<vmem>>, %arg16: memref<8x128xf32, #tpu.memory_space<vmem>>) attributes {dimension_semantics = [#tpu.dimension_semantics<arbitrary>], iteration_bounds = array<i64: 1>, scalar_prefetch = 0 : i64, scratch_operands = 0 : i64, tpu.core_type = #tpu.core_type<tc>, window_params = [{transform_indices = @transform_0, window_bounds = array<i64: 8, 400>}, {transform_indices = @transform_1, window_bounds = array<i64: 8, 32>}, {pipeline_mode = #tpu.pipeline_mode<synchronous>, transform_indices = @transform_2, window_bounds = array<i64: 400, 800>}, {pipeline_mode = #tpu.pipeline_mode<synchronous>, transform_indices = @transform_3, window_bounds = array<i64: 1, 800>}, {pipeline_mode = #tpu.pipeline_mode<synchronous>, transform_indices = @transform_4, window_bounds = array<i64: 800, 400>}, {pipeline_mode = #tpu.pipeline_mode<synchronous>, transform_indices = @transform_5, window_bounds = array<i64: 1, 400>}, {pipeline_mode = #tpu.pipeline_mode<synchronous>, transform_indices = @transform_6, window_bounds = array<i64: 400, 64>}, {pipeline_mode = #tpu.pipeline_mode<synchronous>, transform_indices = @transform_7, window_bounds = array<i64: 1, 64>}, {pipeline_mode = #tpu.pipeline_mode<synchronous>, transform_indices = @transform_8, window_bounds = array<i64: 32, 400>}, {pipeline_mode = #tpu.pipeline_mode<synchronous>, transform_indices = @transform_9, window_bounds = array<i64: 1, 400>}, {pipeline_mode = #tpu.pipeline_mode<synchronous>, transform_indices = @transform_10, window_bounds = array<i64: 400, 800>}, {pipeline_mode = #tpu.pipeline_mode<synchronous>, transform_indices = @transform_11, window_bounds = array<i64: 1, 800>}, {pipeline_mode = #tpu.pipeline_mode<synchronous>, transform_indices = @transform_12, window_bounds = array<i64: 800, 300>}, {pipeline_mode = #tpu.pipeline_mode<synchronous>, transform_indices = @transform_13, window_bounds = array<i64: 1, 300>}, {transform_indices = @transform_14, window_bounds = array<i64: 8, 300>}, {transform_indices = @transform_15, window_bounds = array<i64: 8, 128>}]} {
    %c0 = arith.constant 0 : index
    %c0_0 = arith.constant 0 : index
    %0 = vector.load %arg1[%c0, %c0_0] : memref<8x400xf32, #tpu.memory_space<vmem>>, vector<8x400xf32>
    %1 = arith.truncf %0 : vector<8x400xf32> to vector<8x400xbf16>
    %c0_1 = arith.constant 0 : index
    %c0_2 = arith.constant 0 : index
    %2 = vector.load %arg3[%c0_1, %c0_2] : memref<400x800xbf16, #tpu.memory_space<vmem>>, vector<400x800xbf16>
    %cst = arith.constant dense<0.000000e+00> : vector<8x800xf32>
    %3 = tpu.matmul %1, %2, %cst {dimension_numbers = #tpu.dot_dimension_numbers<[1], [0], [0], [1], [0, 0, 1, 1], [], []>} : vector<8x400xbf16>, vector<400x800xbf16>, vector<8x800xf32> -> vector<8x800xf32>
    %c0_3 = arith.constant 0 : index
    %c0_4 = arith.constant 0 : index
    %4 = vector.load %arg4[%c0_3, %c0_4] : memref<1x800xf32, #tpu.memory_space<vmem>>, vector<1x800xf32>
    %5 = vector.broadcast %4 : vector<1x800xf32> to vector<8x800xf32>
    %6 = arith.addf %3, %5 : vector<8x800xf32>
    %cst_5 = arith.constant 0.000000e+00 : f32
    %7 = vector.broadcast %cst_5 : f32 to vector<8x800xf32>
    %8 = arith.maximumf %6, %7 : vector<8x800xf32>
    %9 = arith.truncf %8 : vector<8x800xf32> to vector<8x800xbf16>
    %c0_6 = arith.constant 0 : index
    %c0_7 = arith.constant 0 : index
    %10 = vector.load %arg5[%c0_6, %c0_7] : memref<800x400xbf16, #tpu.memory_space<vmem>>, vector<800x400xbf16>
    %cst_8 = arith.constant dense<0.000000e+00> : vector<8x400xf32>
    %11 = tpu.matmul %9, %10, %cst_8 {dimension_numbers = #tpu.dot_dimension_numbers<[1], [0], [0], [1], [0, 0, 1, 1], [], []>} : vector<8x800xbf16>, vector<800x400xbf16>, vector<8x400xf32> -> vector<8x400xf32>
    %c0_9 = arith.constant 0 : index
    %c0_10 = arith.constant 0 : index
    %12 = vector.load %arg6[%c0_9, %c0_10] : memref<1x400xf32, #tpu.memory_space<vmem>>, vector<1x400xf32>
    %13 = vector.broadcast %12 : vector<1x400xf32> to vector<8x400xf32>
    %14 = arith.addf %11, %13 : vector<8x400xf32>
    %cst_11 = arith.constant 0.000000e+00 : f32
    %15 = vector.broadcast %cst_11 : f32 to vector<8x400xf32>
    %16 = arith.maximumf %14, %15 : vector<8x400xf32>
    %17 = arith.truncf %16 : vector<8x400xf32> to vector<8x400xbf16>
    %c0_12 = arith.constant 0 : index
    %c0_13 = arith.constant 0 : index
    %18 = vector.load %arg7[%c0_12, %c0_13] : memref<400x64xbf16, #tpu.memory_space<vmem>>, vector<400x64xbf16>
    %cst_14 = arith.constant dense<0.000000e+00> : vector<8x64xf32>
    %19 = tpu.matmul %17, %18, %cst_14 {dimension_numbers = #tpu.dot_dimension_numbers<[1], [0], [0], [1], [0, 0, 1, 1], [], []>} : vector<8x400xbf16>, vector<400x64xbf16>, vector<8x64xf32> -> vector<8x64xf32>
    %c0_15 = arith.constant 0 : index
    %c0_16 = arith.constant 0 : index
    %20 = vector.load %arg8[%c0_15, %c0_16] : memref<1x64xf32, #tpu.memory_space<vmem>>, vector<1x64xf32>
    %21 = vector.broadcast %20 : vector<1x64xf32> to vector<8x64xf32>
    %22 = arith.addf %19, %21 : vector<8x64xf32>
    %23 = vector.extract_strided_slice %22 {offsets = [0, 0], sizes = [8, 32], strides = [1, 1]} : vector<8x64xf32> to vector<8x32xf32>
    %24 = vector.extract_strided_slice %22 {offsets = [0, 32], sizes = [8, 32], strides = [1, 1]} : vector<8x64xf32> to vector<8x32xf32>
    %c0_17 = arith.constant 0 : index
    %c0_18 = arith.constant 0 : index
    %25 = vector.load %arg2[%c0_17, %c0_18] : memref<8x32xf32, #tpu.memory_space<vmem>>, vector<8x32xf32>
    %cst_19 = arith.constant 5.000000e-01 : f32
    %26 = vector.broadcast %cst_19 : f32 to vector<8x32xf32>
    %27 = arith.mulf %26, %24 : vector<8x32xf32>
    %28 = math.exp %27 : vector<8x32xf32>
    %29 = arith.mulf %25, %28 : vector<8x32xf32>
    %30 = arith.addf %23, %29 : vector<8x32xf32>
    %31 = arith.truncf %30 : vector<8x32xf32> to vector<8x32xbf16>
    %c0_20 = arith.constant 0 : index
    %c0_21 = arith.constant 0 : index
    %32 = vector.load %arg9[%c0_20, %c0_21] : memref<32x400xbf16, #tpu.memory_space<vmem>>, vector<32x400xbf16>
    %cst_22 = arith.constant dense<0.000000e+00> : vector<8x400xf32>
    %33 = tpu.matmul %31, %32, %cst_22 {dimension_numbers = #tpu.dot_dimension_numbers<[1], [0], [0], [1], [0, 0, 1, 1], [], []>} : vector<8x32xbf16>, vector<32x400xbf16>, vector<8x400xf32> -> vector<8x400xf32>
    %c0_23 = arith.constant 0 : index
    %c0_24 = arith.constant 0 : index
    %34 = vector.load %arg10[%c0_23, %c0_24] : memref<1x400xf32, #tpu.memory_space<vmem>>, vector<1x400xf32>
    %35 = vector.broadcast %34 : vector<1x400xf32> to vector<8x400xf32>
    %36 = arith.addf %33, %35 : vector<8x400xf32>
    %cst_25 = arith.constant 0.000000e+00 : f32
    %37 = vector.broadcast %cst_25 : f32 to vector<8x400xf32>
    %38 = arith.maximumf %36, %37 : vector<8x400xf32>
    %39 = arith.truncf %38 : vector<8x400xf32> to vector<8x400xbf16>
    %c0_26 = arith.constant 0 : index
    %c0_27 = arith.constant 0 : index
    %40 = vector.load %arg11[%c0_26, %c0_27] : memref<400x800xbf16, #tpu.memory_space<vmem>>, vector<400x800xbf16>
    %cst_28 = arith.constant dense<0.000000e+00> : vector<8x800xf32>
    %41 = tpu.matmul %39, %40, %cst_28 {dimension_numbers = #tpu.dot_dimension_numbers<[1], [0], [0], [1], [0, 0, 1, 1], [], []>} : vector<8x400xbf16>, vector<400x800xbf16>, vector<8x800xf32> -> vector<8x800xf32>
    %c0_29 = arith.constant 0 : index
    %c0_30 = arith.constant 0 : index
    %42 = vector.load %arg12[%c0_29, %c0_30] : memref<1x800xf32, #tpu.memory_space<vmem>>, vector<1x800xf32>
    %43 = vector.broadcast %42 : vector<1x800xf32> to vector<8x800xf32>
    %44 = arith.addf %41, %43 : vector<8x800xf32>
    %cst_31 = arith.constant 0.000000e+00 : f32
    %45 = vector.broadcast %cst_31 : f32 to vector<8x800xf32>
    %46 = arith.maximumf %44, %45 : vector<8x800xf32>
    %47 = arith.truncf %46 : vector<8x800xf32> to vector<8x800xbf16>
    %c0_32 = arith.constant 0 : index
    %c0_33 = arith.constant 0 : index
    %48 = vector.load %arg13[%c0_32, %c0_33] : memref<800x300xbf16, #tpu.memory_space<vmem>>, vector<800x300xbf16>
    %cst_34 = arith.constant dense<0.000000e+00> : vector<8x300xf32>
    %49 = tpu.matmul %47, %48, %cst_34 {dimension_numbers = #tpu.dot_dimension_numbers<[1], [0], [0], [1], [0, 0, 1, 1], [], []>} : vector<8x800xbf16>, vector<800x300xbf16>, vector<8x300xf32> -> vector<8x300xf32>
    %c0_35 = arith.constant 0 : index
    %c0_36 = arith.constant 0 : index
    %50 = vector.load %arg14[%c0_35, %c0_36] : memref<1x300xf32, #tpu.memory_space<vmem>>, vector<1x300xf32>
    %51 = vector.broadcast %50 : vector<1x300xf32> to vector<8x300xf32>
    %52 = arith.addf %49, %51 : vector<8x300xf32>
    %c0_37 = arith.constant 0 : index
    %c0_38 = arith.constant 0 : index
    %53 = vector.load %arg15[%c0_37, %c0_38] : memref<8x300xf32, #tpu.memory_space<vmem>>, vector<8x300xf32>
    tpu.vector_store %arg15[%c0_37, %c0_38], %52 {strides = array<i32>} : memref<8x300xf32, #tpu.memory_space<vmem>>, vector<8x300xf32>,
    %cst_39 = arith.constant 0.000000e+00 : f32
    %54 = vector.broadcast %cst_39 : f32 to vector<8x32xf32>
    %55 = tpu.concatenate %22, %30, %54 in 1 : vector<8x64xf32>, vector<8x32xf32>, vector<8x32xf32> -> vector<8x128xf32>
    %c0_40 = arith.constant 0 : index
    %c0_41 = arith.constant 0 : index
    %56 = vector.load %arg16[%c0_40, %c0_41] : memref<8x128xf32, #tpu.memory_space<vmem>>, vector<8x128xf32>
    tpu.vector_store %arg16[%c0_40, %c0_41], %55 {strides = array<i32>} : memref<8x128xf32, #tpu.memory_space<vmem>>, vector<8x128xf32>,
    return
  }
  func.func @transform_0(%arg0: i32) -> (i32, i32) {
    %c0_i32 = arith.constant 0 : i32
    %c0_i32_0 = arith.constant 0 : i32
    return %arg0, %c0_i32 : i32, i32
  }
  func.func @transform_1(%arg0: i32) -> (i32, i32) {
    %c0_i32 = arith.constant 0 : i32
    %c0_i32_0 = arith.constant 0 : i32
    return %arg0, %c0_i32 : i32, i32
  }
  func.func @transform_2(%arg0: i32) -> (i32, i32) {
    %c0_i32 = arith.constant 0 : i32
    %c0_i32_0 = arith.constant 0 : i32
    %c0_i32_1 = arith.constant 0 : i32
    return %c0_i32, %c0_i32_0 : i32, i32
  }
  func.func @transform_3(%arg0: i32) -> (i32, i32) {
    %c0_i32 = arith.constant 0 : i32
    %c0_i32_0 = arith.constant 0 : i32
    %c0_i32_1 = arith.constant 0 : i32
    return %c0_i32, %c0_i32_0 : i32, i32
  }
  func.func @transform_4(%arg0: i32) -> (i32, i32) {
    %c0_i32 = arith.constant 0 : i32
    %c0_i32_0 = arith.constant 0 : i32
    %c0_i32_1 = arith.constant 0 : i32
    return %c0_i32, %c0_i32_0 : i32, i32
  }
  func.func @transform_5(%arg0: i32) -> (i32, i32) {
    %c0_i32 = arith.constant 0 : i32
    %c0_i32_0 = arith.constant 0 : i32
    %c0_i32_1 = arith.constant 0 : i32
    return %c0_i32, %c0_i32_0 : i32, i32
  }
  func.func @transform_6(%arg0: i32) -> (i32, i32) {
    %c0_i32 = arith.constant 0 : i32
    %c0_i32_0 = arith.constant 0 : i32
    %c0_i32_1 = arith.constant 0 : i32
    return %c0_i32, %c0_i32_0 : i32, i32
  }
  func.func @transform_7(%arg0: i32) -> (i32, i32) {
    %c0_i32 = arith.constant 0 : i32
    %c0_i32_0 = arith.constant 0 : i32
    %c0_i32_1 = arith.constant 0 : i32
    return %c0_i32, %c0_i32_0 : i32, i32
  }
  func.func @transform_8(%arg0: i32) -> (i32, i32) {
    %c0_i32 = arith.constant 0 : i32
    %c0_i32_0 = arith.constant 0 : i32
    %c0_i32_1 = arith.constant 0 : i32
    return %c0_i32, %c0_i32_0 : i32, i32
  }
  func.func @transform_9(%arg0: i32) -> (i32, i32) {
    %c0_i32 = arith.constant 0 : i32
    %c0_i32_0 = arith.constant 0 : i32
    %c0_i32_1 = arith.constant 0 : i32
    return %c0_i32, %c0_i32_0 : i32, i32
  }
  func.func @transform_10(%arg0: i32) -> (i32, i32) {
    %c0_i32 = arith.constant 0 : i32
    %c0_i32_0 = arith.constant 0 : i32
    %c0_i32_1 = arith.constant 0 : i32
    return %c0_i32, %c0_i32_0 : i32, i32
  }
  func.func @transform_11(%arg0: i32) -> (i32, i32) {
    %c0_i32 = arith.constant 0 : i32
    %c0_i32_0 = arith.constant 0 : i32
    %c0_i32_1 = arith.constant 0 : i32
    return %c0_i32, %c0_i32_0 : i32, i32
  }
  func.func @transform_12(%arg0: i32) -> (i32, i32) {
    %c0_i32 = arith.constant 0 : i32
    %c0_i32_0 = arith.constant 0 : i32
    %c0_i32_1 = arith.constant 0 : i32
    return %c0_i32, %c0_i32_0 : i32, i32
  }
  func.func @transform_13(%arg0: i32) -> (i32, i32) {
    %c0_i32 = arith.constant 0 : i32
    %c0_i32_0 = arith.constant 0 : i32
    %c0_i32_1 = arith.constant 0 : i32
    return %c0_i32, %c0_i32_0 : i32, i32
  }
  func.func @transform_14(%arg0: i32) -> (i32, i32) {
    %c0_i32 = arith.constant 0 : i32
    %c0_i32_0 = arith.constant 0 : i32
    return %arg0, %c0_i32 : i32, i32
  }
  func.func @transform_15(%arg0: i32) -> (i32, i32) {
    %c0_i32 = arith.constant 0 : i32
    %c0_i32_0 = arith.constant 0 : i32
    return %arg0, %c0_i32 : i32, i32
  }
}

</mosaic_0001>

<bundles_post_ra>
// kernel: tpu_custom_call.1
= control target key start
LH: loop header
LB: loop body
LE: loop exit
PB: predicated region body
PF: predicated region fallthrough
CT: control target
= control target key end

     0   :  { %21 = vsyncpa [#allocation3], 0  ;;  %vm1197_vm0 = vcmask 130048   ;;  %vm2763_vm1 = vcmask 261120   ;;  %s10959_s0 = inlined_call_operand.vmem [shape: f32[8,400], index: 0, kind: input, shape index: {}]   ;;  %s10960_s1 = inlined_call_operand.vmem [shape: f32[8,32], index: 1, kind: input, shape index: {}]   ;;  %s10961_s2 = inlined_call_operand.vmem [shape: bf16[400,800], index: 2, kind: input, shape index: {}]   ;;  %s10962_s3 = inlined_call_operand.vmem [shape: f32[1,800], index: 3, kind: input, shape index: {}]   ;;  %s10963_s4 = inlined_call_operand.vmem [shape: bf16[800,400], index: 4, kind: input, shape index: {}]   ;;  %s10964_s5 = inlined_call_operand.vmem [shape: f32[1,400], index: 5, kind: input, shape index: {}]   ;;  %s10965_s6 = inlined_call_operand.vmem [shape: bf16[400,64], index: 6, kind: input, shape index: {}]   ;;  %s10966_s7 = inlined_call_operand.vmem [shape: f32[1,64], index: 7, kind: input, shape index: {}]   ;;  %s10967_s8 = inlined_call_operand.vmem [shape: bf16[32,400], index: 8, kind: input, shape index: {}]   ;;  %s10968_s9 = inlined_call_operand.vmem [shape: f32[1,400], index: 9, kind: input, shape index: {}]   ;;  %s10969_s10 = inlined_call_operand.vmem [shape: bf16[400,800], index: 10, kind: input, shape index: {}]   ;;  %s10970_s11 = inlined_call_operand.vmem [shape: f32[1,800], index: 11, kind: input, shape index: {}]   ;;  %s10971_s12 = inlined_call_operand.vmem [shape: bf16[800,300], index: 12, kind: input, shape index: {}]   ;;  %s10972_s13 = inlined_call_operand.vmem [shape: f32[1,300], index: 13, kind: input, shape index: {}]   ;;  %s10973_s14 = inlined_call_operand.hbm [shape: f32[8,300], index: 14, kind: output, shape index: {0}]   ;;  %s10974_s15 = inlined_call_operand.hbm [shape: f32[8,128], index: 15, kind: output, shape index: {1}]  }
   0x1   :  { %v7331_v0 = vld [vmem:[%s10961_s2 + $0x18c] ss:$28 sps:$4 sm:$0xff]   ;;  %v7337_v4 = vld [vmem:[%s10961_s2 + $0x154] ss:$28 sps:$4 sm:$0xff]   ;;  %v7343_v8 = vld [vmem:[%s10961_s2 + $0x11c] ss:$28 sps:$4 sm:$0xff]  }
   0x2   :  { %v7333_v1 = vld [vmem:[%s10961_s2 + $0x50c] ss:$28 sps:$4 sm:$0xff]   ;;  %1201 = vmatprep.subr.bf16.mxu0 %v7331_v0  ;;  %v7339_v5 = vld [vmem:[%s10961_s2 + $0x4d4] ss:$28 sps:$4 sm:$0xff]   ;;  %v7345_v9 = vld [vmem:[%s10961_s2 + $0x49c] ss:$28 sps:$4 sm:$0xff]  }
   0x3   :  { %v7335_v2 = vld [vmem:[%s10961_s2 + $0x188] ss:$28 sps:$4 sm:$0xff]   ;;  %1242 = vmatprep.subr.bf16.mxu1 %v7333_v1  ;;  %v7341_v6 = vld [vmem:[%s10961_s2 + $0x150] ss:$28 sps:$4 sm:$0xff]   ;;  %v7347_v10 = vld [vmem:[%s10961_s2 + $0x118] ss:$28 sps:$4 sm:$0xff]  }
   0x4   :  { %v7336_v3 = vld [vmem:[%s10961_s2 + $0x508] ss:$28 sps:$4 sm:$0xff]   ;;  %1202 = vmatpush1.bf16.msra.mxu0 %v7335_v2  ;;  %v7342_v7 = vld [vmem:[%s10961_s2 + $0x4d0] ss:$28 sps:$4 sm:$0xff]   ;;  %v7348_v11 = vld [vmem:[%s10961_s2 + $0x498] ss:$28 sps:$4 sm:$0xff]  }
   0x5   :  { %1243 = vmatpush1.bf16.msra.mxu1 %v7336_v3  ;;  %1203 = vmatprep.subr.bf16.mxu0 %v7337_v4  ;;  %v7349_v12 = vld [vmem:[%s10961_s2 + $0xe4] ss:$28 sps:$4 sm:$0xff]   ;;  %v7355_v16 = vld [vmem:[%s10961_s2 + $0xac] ss:$28 sps:$4 sm:$0xff]   ;;  %v7361_v20 = vld [vmem:[%s10961_s2 + $0x74] ss:$28 sps:$4 sm:$0xff]  }
   0x6   :  { %1244 = vmatprep.subr.bf16.mxu1 %v7339_v5  ;;  %v7351_v13 = vld [vmem:[%s10961_s2 + $0x464] ss:$28 sps:$4 sm:$0xff]   ;;  %v7357_v17 = vld [vmem:[%s10961_s2 + $0x42c] ss:$28 sps:$4 sm:$0xff]   ;;  %v7363_v21 = vld [vmem:[%s10961_s2 + $0x3f4] ss:$28 sps:$4 sm:$0xff]  }
   0x7   :  { %v7353_v14 = vld [vmem:[%s10961_s2 + $0xe0] ss:$28 sps:$4 sm:$0xff]   ;;  %v7359_v18 = vld [vmem:[%s10961_s2 + $0xa8] ss:$28 sps:$4 sm:$0xff]   ;;  %v7365_v22 = vld [vmem:[%s10961_s2 + $0x70] ss:$28 sps:$4 sm:$0xff]  }
   0x8   :  { %1204 = vmatpush1.bf16.msra.mxu0 %v7341_v6  ;;  %v7354_v15 = vld [vmem:[%s10961_s2 + $0x460] ss:$28 sps:$4 sm:$0xff]   ;;  %v7360_v19 = vld [vmem:[%s10961_s2 + $0x428] ss:$28 sps:$4 sm:$0xff]   ;;  %v7366_v23 = vld [vmem:[%s10961_s2 + $0x3f0] ss:$28 sps:$4 sm:$0xff]  }
   0x9   :  { %1245 = vmatpush1.bf16.msra.mxu1 %v7342_v7  ;;  %1205 = vmatprep.subr.bf16.mxu0 %v7343_v8  ;;  %v7367_v24 = vld [vmem:[%s10961_s2 + $0x3c] ss:$28 sps:$4 sm:$0xff]   ;;  %v7373_v28 = vld [vmem:[%s10961_s2 + $0x4] ss:$28 sps:$4 sm:$0xff]   ;;  %v7379_v34 = vld [vmem:[%s10961_s2 + $0x34c] ss:$28 sps:$4 sm:$0xff]  }
   0xa   :  { %1246 = vmatprep.subr.bf16.mxu1 %v7345_v9  ;;  %v7369_v25 = vld [vmem:[%s10961_s2 + $0x3bc] ss:$28 sps:$4 sm:$0xff]   ;;  %v7375_v29 = vld [vmem:[%s10961_s2 + $0x384] ss:$28 sps:$4 sm:$0xff]   ;;  %v7385_v38 = vld [vmem:[%s10961_s2 + $0x314] ss:$28 sps:$4 sm:$0xff]  }
   0xb   :  { %v7371_v26 = vld [vmem:[%s10961_s2 + $0x38] ss:$28 sps:$4 sm:$0xff]   ;;  %v7377_v32 = vld [vmem:[%s10961_s2] ss:$28 sps:$4 sm:$0xff]   ;;  %v7383_v36 = vld [vmem:[%s10961_s2 + $0x348] ss:$28 sps:$4 sm:$0xff]  }
   0xc   :  { %1206 = vmatpush1.bf16.msra.mxu0 %v7347_v10  ;;  %v7372_v27 = vld [vmem:[%s10961_s2 + $0x3b8] ss:$28 sps:$4 sm:$0xff]   ;;  %v7378_v33 = vld [vmem:[%s10961_s2 + $0x380] ss:$28 sps:$4 sm:$0xff]   ;;  %v7387_v41 = vld [vmem:[%s10961_s2 + $0x190] ss:$28 sps:$4 sm:$0xff]  }
   0xd   :  { %1247 = vmatpush1.bf16.msra.mxu1 %v7348_v11  ;;  %1207 = vmatprep.subr.bf16.mxu0 %v7349_v12  ;;  %v55_v30 = vld [vmem:[%s10959_s0 + $0x18] sm:$0xff]  ;;  %v7381_v35 = vld [vmem:[%s10961_s2 + $0x544] ss:$28 sps:$4 sm:$0xff]   ;;  %v54_v39 = vld [vmem:[%s10959_s0 + $0x10] sm:$0xff] }
   0xe   :  { %1248 = vmatprep.subr.bf16.mxu1 %v7351_v13  ;;  %v8594_v31 = vpack.c.bf16 %v55_v30, %v55_v30  ;;  %v7384_v37 = vld [vmem:[%s10961_s2 + $0x540] ss:$28 sps:$4 sm:$0xff]   ;;  %v7389_v40 = vld [vmem:[%s10961_s2 + $0x194] ss:$28 sps:$4 sm:$0xff]   ;;  %v8628_v42 = vpack.c.bf16 %v54_v39, %v54_v39  ;;  %v53_v52 = vld [vmem:[%s10959_s0 + $0x8] sm:$0xff] }
   0xf   :  { %v7390_v43 = vld [vmem:[%s10961_s2 + $0x310] ss:$28 sps:$4 sm:$0xff]   ;;  %v7391_v44 = vld [vmem:[%s10961_s2 + $0x2dc] ss:$28 sps:$4 sm:$0xff]   ;;  %v7397_v48 = vld [vmem:[%s10961_s2 + $0x2a4] ss:$28 sps:$4 sm:$0xff]   ;;  %v8664_v54 = vpack.c.bf16 %v53_v52, %v53_v52 }
  0x10   :  { %1208 = vmatpush1.bf16.msra.mxu0 %v7353_v14  ;;  %6607 = vmatprep.mubr.msk.bf16.mxu1 %vm1197_vm0, %v8594_v31  ;;  %v7395_v45 = vld [vmem:[%s10961_s2 + $0x15c] ss:$28 sps:$4 sm:$0xff]   ;;  %v7401_v49 = vld [vmem:[%s10961_s2 + $0x124] ss:$28 sps:$4 sm:$0xff]   ;;  %v7403_v53 = vld [vmem:[%s10961_s2 + $0x26c] ss:$28 sps:$4 sm:$0xff]  }
  0x11   :  { %1249 = vmatpush1.bf16.msra.mxu1 %v7354_v15  ;;  %1209 = vmatprep.subr.bf16.mxu0 %v7355_v16  ;;  %v7393_v46 = vld [vmem:[%s10961_s2 + $0x158] ss:$28 sps:$4 sm:$0xff]   ;;  %v7399_v50 = vld [vmem:[%s10961_s2 + $0x120] ss:$28 sps:$4 sm:$0xff]   ;;  %v7407_v55 = vld [vmem:[%s10961_s2 + $0xec] ss:$28 sps:$4 sm:$0xff]  }
  0x12   :  { %1250 = vmatprep.subr.bf16.mxu1 %v7357_v17  ;;  %v7396_v47 = vld [vmem:[%s10961_s2 + $0x2d8] ss:$28 sps:$4 sm:$0xff]   ;;  %v7402_v51 = vld [vmem:[%s10961_s2 + $0x2a0] ss:$28 sps:$4 sm:$0xff]   ;;  %1233 = vmatprep.mubr.bf16.mxu0 %v8664_v54  ;;  %v7405_v56 = vld [vmem:[%s10961_s2 + $0xe8] ss:$28 sps:$4 sm:$0xff]  }
  0x13   :  { %v7408_v57 = vld [vmem:[%s10961_s2 + $0x268] ss:$28 sps:$4 sm:$0xff]   ;;  %v7409_v58 = vld [vmem:[%s10961_s2 + $0x234] ss:$28 sps:$4 sm:$0xff]   ;;  %v7415_v62 = vld [vmem:[%s10961_s2 + $0x1fc] ss:$28 sps:$4 sm:$0xff]  }
  0x14   :  { %1210 = vmatpush1.bf16.msra.mxu0 %v7359_v18  ;;  %v7413_v59 = vld [vmem:[%s10961_s2 + $0xb4] ss:$28 sps:$4 sm:$0xff]   ;;  %v7419_v63 = vld [vmem:[%s10961_s2 + $0x7c] ss:$28 sps:$4 sm:$0xff]   ;;  %v7421_v2 = vld [vmem:[%s10961_s2 + $0x1c4] ss:$28 sps:$4 sm:$0xff]  }
  0x15   :  { %1251 = vmatpush1.bf16.msra.mxu1 %v7360_v19  ;;  %1211 = vmatprep.subr.bf16.mxu0 %v7361_v20  ;;  %v7411_v60 = vld [vmem:[%s10961_s2 + $0xb0] ss:$28 sps:$4 sm:$0xff]   ;;  %v7417_v0 = vld [vmem:[%s10961_s2 + $0x78] ss:$28 sps:$4 sm:$0xff]   ;;  %v7425_v3 = vld [vmem:[%s10961_s2 + $0x44] ss:$28 sps:$4 sm:$0xff]  }
  0x16   :  { %1252 = vmatprep.subr.bf16.mxu1 %v7363_v21  ;;  %v7414_v61 = vld [vmem:[%s10961_s2 + $0x230] ss:$28 sps:$4 sm:$0xff]   ;;  %v7420_v1 = vld [vmem:[%s10961_s2 + $0x1f8] ss:$28 sps:$4 sm:$0xff]   ;;  %v7423_v4 = vld [vmem:[%s10961_s2 + $0x40] ss:$28 sps:$4 sm:$0xff]  }
  0x17   :  { %v7426_v5 = vld [vmem:[%s10961_s2 + $0x1c0] ss:$28 sps:$4 sm:$0xff]   ;;  %v7429_v7 = vld [vmem:[%s10961_s2 + $0xc] ss:$28 sps:$4 sm:$0xff]   ;;  %v7432_v8 = vld [vmem:[%s10961_s2 + $0x514] ss:$28 sps:$4 sm:$0xff]  }
  0x18   :  { %1212 = vmatpush1.bf16.msra.mxu0 %v7365_v22  ;;  %v52_v6 = vld [vmem:[%s10959_s0] sm:$0xff]  ;;  %v7430_v11 = vld [vmem:[%s10961_s2 + $0x510] ss:$28 sps:$4 sm:$0xff]   ;;  %v7438_v13 = vld [vmem:[%s10961_s2 + $0x4dc] ss:$28 sps:$4 sm:$0xff]  }
  0x19   :  { %1253 = vmatpush1.bf16.msra.mxu1 %v7366_v23  ;;  %1213 = vmatprep.subr.bf16.mxu0 %v7367_v24  ;;  %v8722_v9 = vpack.c.bf16 %v52_v6, %v52_v6  ;;  %v7427_v10 = vld [vmem:[%s10961_s2 + $0x8] ss:$28 sps:$4 sm:$0xff]   ;;  %v7435_v12 = vld [vmem:[%s10961_s2 + $0x354] ss:$28 sps:$4 sm:$0xff]   ;;  %v7441_v16 = vld [vmem:[%s10961_s2 + $0x31c] ss:$28 sps:$4 sm:$0xff]  }
  0x1a   :  { %1254 = vmatprep.subr.bf16.mxu1 %v7369_v25  ;;  %v7433_v14 = vld [vmem:[%s10961_s2 + $0x350] ss:$28 sps:$4 sm:$0xff]   ;;  %v7436_v15 = vld [vmem:[%s10961_s2 + $0x4d8] ss:$28 sps:$4 sm:$0xff]   ;;  %v7444_v17 = vld [vmem:[%s10961_s2 + $0x4a4] ss:$28 sps:$4 sm:$0xff]  }
  0x1b   :  { %v7439_v18 = vld [vmem:[%s10961_s2 + $0x318] ss:$28 sps:$4 sm:$0xff]   ;;  %v7442_v19 = vld [vmem:[%s10961_s2 + $0x4a0] ss:$28 sps:$4 sm:$0xff]   ;;  %v7450_v21 = vld [vmem:[%s10961_s2 + $0x46c] ss:$28 sps:$4 sm:$0xff]  }
  0x1c   :  { %1214 = vmatpush1.bf16.msra.mxu0 %v7371_v26  ;;  %v7447_v20 = vld [vmem:[%s10961_s2 + $0x2e4] ss:$28 sps:$4 sm:$0xff]   ;;  %v7453_v24 = vld [vmem:[%s10961_s2 + $0x2ac] ss:$28 sps:$4 sm:$0xff]   ;;  %v7456_v25 = vld [vmem:[%s10961_s2 + $0x434] ss:$28 sps:$4 sm:$0xff]  }
  0x1d   :  { %1255 = vmatpush1.bf16.msra.mxu1 %v7372_v27  ;;  %1215 = vmatprep.subr.bf16.mxu0 %v7373_v28  ;;  %v7445_v22 = vld [vmem:[%s10961_s2 + $0x2e0] ss:$28 sps:$4 sm:$0xff]   ;;  %v7448_v23 = vld [vmem:[%s10961_s2 + $0x468] ss:$28 sps:$4 sm:$0xff]   ;;  %v7454_v27 = vld [vmem:[%s10961_s2 + $0x430] ss:$28 sps:$4 sm:$0xff]  }
  0x1e   :  { %1256 = vmatprep.subr.bf16.mxu1 %v7375_v29  ;;  %v7451_v26 = vld [vmem:[%s10961_s2 + $0x2a8] ss:$28 sps:$4 sm:$0xff]   ;;  %v7459_v28 = vld [vmem:[%s10961_s2 + $0x274] ss:$28 sps:$4 sm:$0xff]   ;;  %v7462_v29 = vld [vmem:[%s10961_s2 + $0x3fc] ss:$28 sps:$4 sm:$0xff]  }
  0x1f   :  { %v7457_v30 = vld [vmem:[%s10961_s2 + $0x270] ss:$28 sps:$4 sm:$0xff]   ;;  %v7469_v39 = vld [vmem:[%s10961_s2 + $0x200] ss:$28 sps:$4 sm:$0xff]  }
  0x20   :  { %1216 = vmatpush1.bf16.msra.mxu0 %v7377_v32  ;;  %v7460_v32 = vld [vmem:[%s10961_s2 + $0x3f8] ss:$28 sps:$4 sm:$0xff]   ;;  %v7484_v52 = vld [vmem:[%s10961_s2 + $0x160] ss:$28 sps:$4 sm:$0xff]   ;;  %v7504_v6 = vld [vmem:[%s10961_s2 + $0x4c] ss:$28 sps:$4 sm:$0xff]  }
  0x21   :  { %1257 = vmatpush1.bf16.msra.mxu1 %v7378_v33  ;;  %1217 = vmatprep.subr.bf16.mxu0 %v7379_v34  ;;  %v7465_v33 = vld [vmem:[%s10961_s2 + $0x23c] ss:$28 sps:$4 sm:$0xff]   ;;  %v7468_v34 = vld [vmem:[%s10961_s2 + $0x3c4] ss:$28 sps:$4 sm:$0xff]  }
  0x22   :  { %1272 = vmatprep.subr.bf16.mxu1 %v7381_v35  ;;  %v7463_v35 = vld [vmem:[%s10961_s2 + $0x238] ss:$28 sps:$4 sm:$0xff]  }
  0x24   :  { %1218 = vmatpush2.bf16.msra.mxu0 %v7383_v36  ;;  %v7466_v36 = vld [vmem:[%s10961_s2 + $0x3c0] ss:$28 sps:$4 sm:$0xff]  }
  0x25   :  { %1273 = vmatpush2.bf16.msra.mxu1 %v7384_v37  ;;  %1219 = vmatprep.subr.bf16.mxu0 %v7385_v38  ;;  %v7471_v37 = vld [vmem:[%s10961_s2 + $0x204] ss:$28 sps:$4 sm:$0xff]   ;;  %v7474_v38 = vld [vmem:[%s10961_s2 + $0x38c] ss:$28 sps:$4 sm:$0xff]  }
  0x26   :  { %1283 = vmatprep.subr.bf16.mxu1 %v7389_v40  ;;  %v7472_v40 = vld [vmem:[%s10961_s2 + $0x388] ss:$28 sps:$4 sm:$0xff]  }
  0x28   :  { %1275 = vmatmul.mubr.bf16.vlgmr.msra.gmra.mxu1 %v8628_v42  ;;  %1220 = vmatpush2.bf16.msra.mxu0 %v7390_v43  ;;  %v7480_v43 = vld [vmem:[%s10961_s2 + $0x54c] ss:$28 sps:$4 sm:$0xff]  }
  0x29   :  { %1284 = vmatpush1.bf16.msra.mxu1 %v7387_v41  ;;  %1221 = vmatprep.subr.bf16.mxu0 %v7391_v44  ;;  %v7477_v41 = vld [vmem:[%s10961_s2 + $0x1cc] ss:$28 sps:$4 sm:$0xff]  }
  0x2a   :  { %1285 = vmatprep.subr.bf16.mxu1 %v7395_v45  ;;  %1315 = vmatprep.mubr.bf16.mxu1 %v8664_v54  ;;  %v7475_v44 = vld [vmem:[%s10961_s2 + $0x1c8] ss:$28 sps:$4 sm:$0xff]  }
  0x2b   :  { %v7478_v45 = vld [vmem:[%s10961_s2 + $0x548] ss:$28 sps:$4 sm:$0xff]  }
  0x2c   :  { %1222 = vmatpush2.bf16.msra.mxu0 %v7396_v47  ;;  %v7501_v47 = vld [vmem:[%s10961_s2 + $0x51c] ss:$28 sps:$4 sm:$0xff]  }
  0x2d   :  { %1286 = vmatpush1.bf16.msra.mxu1 %v7393_v46  ;;  %1223 = vmatprep.subr.bf16.mxu0 %v7397_v48  ;;  %v7483_v46 = vld [vmem:[%s10961_s2 + $0x19c] ss:$28 sps:$4 sm:$0xff]  }
  0x2e   :  { %1287 = vmatprep.subr.bf16.mxu1 %v7401_v49  ;;  %v7481_v48 = vld [vmem:[%s10961_s2 + $0x198] ss:$28 sps:$4 sm:$0xff]   ;;  %v7486_v49 = vld [vmem:[%s10961_s2 + $0x164] ss:$28 sps:$4 sm:$0xff]  }
  0x30   :  { %1224 = vmatpush2.bf16.msra.mxu0 %v7402_v51  ;;  %v7507_v51 = vld [vmem:[%s10961_s2 + $0x4e4] ss:$28 sps:$4 sm:$0xff]  }
  0x31   :  { %1288 = vmatpush1.bf16.msra.mxu1 %v7399_v50  ;;  %1225 = vmatprep.subr.bf16.mxu0 %v7403_v53  ;;  %v7499_v50 = vld [vmem:[%s10961_s2 + $0x518] ss:$28 sps:$4 sm:$0xff]   ;;  %v7489_v53 = vld [vmem:[%s10961_s2 + $0x12c] ss:$28 sps:$4 sm:$0xff]  }
  0x32   :  { %1289 = vmatprep.subr.bf16.mxu1 %v7407_v55  ;;  %v7505_v55 = vld [vmem:[%s10961_s2 + $0x4e0] ss:$28 sps:$4 sm:$0xff]  }
  0x34   :  { %1226 = vmatpush2.bf16.msra.mxu0 %v7408_v57  ;;  %v7487_v57 = vld [vmem:[%s10961_s2 + $0x128] ss:$28 sps:$4 sm:$0xff]  }
  0x35   :  { %1290 = vmatpush1.bf16.msra.mxu1 %v7405_v56  ;;  %1227 = vmatprep.subr.bf16.mxu0 %v7409_v58  ;;  %v7513_v56 = vld [vmem:[%s10961_s2 + $0x4ac] ss:$28 sps:$4 sm:$0xff]   ;;  %v7492_v58 = vld [vmem:[%s10961_s2 + $0xf4] ss:$28 sps:$4 sm:$0xff]  }
  0x36   :  { %1291 = vmatprep.subr.bf16.mxu1 %v7413_v59  ;;  %v7511_v59 = vld [vmem:[%s10961_s2 + $0x4a8] ss:$28 sps:$4 sm:$0xff]  }
  0x38   :  { %1228 = vmatpush2.bf16.msra.mxu0 %v7414_v61  ;;  %v7490_v61 = vld [vmem:[%s10961_s2 + $0xf0] ss:$28 sps:$4 sm:$0xff]  }
  0x39   :  { %1292 = vmatpush1.bf16.msra.mxu1 %v7411_v60  ;;  %1229 = vmatprep.subr.bf16.mxu0 %v7415_v62  ;;  %v7519_v60 = vld [vmem:[%s10961_s2 + $0x474] ss:$28 sps:$4 sm:$0xff]   ;;  %v7495_v62 = vld [vmem:[%s10961_s2 + $0xbc] ss:$28 sps:$4 sm:$0xff]  }
  0x3a   :  { %1293 = vmatprep.subr.bf16.mxu1 %v7419_v63  ;;  %v7517_v63 = vld [vmem:[%s10961_s2 + $0x470] ss:$28 sps:$4 sm:$0xff]  }
  0x3c   :  { %1230 = vmatpush2.bf16.msra.mxu0 %v7420_v1  ;;  %v7493_v1 = vld [vmem:[%s10961_s2 + $0xb8] ss:$28 sps:$4 sm:$0xff]  }
  0x3d   :  { %1294 = vmatpush1.bf16.msra.mxu1 %v7417_v0  ;;  %1231 = vmatprep.subr.bf16.mxu0 %v7421_v2  ;;  %v7525_v0 = vld [vmem:[%s10961_s2 + $0x43c] ss:$28 sps:$4 sm:$0xff]   ;;  %v7498_v2 = vld [vmem:[%s10961_s2 + $0x84] ss:$28 sps:$4 sm:$0xff]  }
  0x3e   :  { %1295 = vmatprep.subr.bf16.mxu1 %v7425_v3  ;;  %v7523_v3 = vld [vmem:[%s10961_s2 + $0x438] ss:$28 sps:$4 sm:$0xff]  }
  0x40   :  { %1232 = vmatpush2.bf16.msra.mxu0 %v7426_v5  ;;  %v7496_v5 = vld [vmem:[%s10961_s2 + $0x80] ss:$28 sps:$4 sm:$0xff]  }
  0x41   :  { %1296 = vmatpush1.bf16.msra.mxu1 %v7423_v4  ;;  %1324 = vmatprep.subr.bf16.mxu0 %v7432_v8  ;;  %v7531_v4 = vld [vmem:[%s10961_s2 + $0x404] ss:$28 sps:$4 sm:$0xff]   ;;  %v7537_v8 = vld [vmem:[%s10961_s2 + $0x3cc] ss:$28 sps:$4 sm:$0xff]  }
  0x42   :  { %1297 = vmatprep.subr.bf16.mxu1 %v7429_v7  ;;  %v7529_v7 = vld [vmem:[%s10961_s2 + $0x400] ss:$28 sps:$4 sm:$0xff]  }
  0x43   :  { %1234 = vmatmul.mubr.bf16.vlgmr.msra.gmra.mxu0 %v8722_v9 }
  0x44   :  { %1325 = vmatpush1.bf16.msra.mxu0 %v7430_v11  ;;  %6608 = vmatprep.mubr.msk.bf16.mxu0 %vm1197_vm0, %v8594_v31  ;;  %v7510_v11 = vld [vmem:[%s10961_s2 + $0x14] ss:$28 sps:$4 sm:$0xff]  }
  0x45   :  { %1298 = vmatpush1.bf16.msra.mxu1 %v7427_v10  ;;  %1326 = vmatprep.subr.bf16.mxu0 %v7438_v13  ;;  %v7502_v10 = vld [vmem:[%s10961_s2 + $0x48] ss:$28 sps:$4 sm:$0xff]   ;;  %v7543_v13 = vld [vmem:[%s10961_s2 + $0x394] ss:$28 sps:$4 sm:$0xff]  }
  0x46   :  { %1299 = vmatprep.subr.bf16.mxu1 %v7435_v12  ;;  %v7535_v12 = vld [vmem:[%s10961_s2 + $0x3c8] ss:$28 sps:$4 sm:$0xff]  }
  0x48   :  { %1327 = vmatpush1.bf16.msra.mxu0 %v7436_v15  ;;  %v7516_v15 = vld [vmem:[%s10961_s2 + $0x35c] ss:$28 sps:$4 sm:$0xff]  }
  0x49   :  { %1300 = vmatpush2.bf16.msra.mxu1 %v7433_v14  ;;  %1328 = vmatprep.subr.bf16.mxu0 %v7444_v17  ;;  %v7508_v14 = vld [vmem:[%s10961_s2 + $0x10] ss:$28 sps:$4 sm:$0xff]  }
  0x4a   :  { %1301 = vmatprep.subr.bf16.mxu1 %v7441_v16  ;;  %v7541_v16 = vld [vmem:[%s10961_s2 + $0x390] ss:$28 sps:$4 sm:$0xff]  }
  0x4b   :  { %v7549_v17 = vld [vmem:[%s10961_s2 + $0x554] ss:$28 sps:$4 sm:$0xff]  }
  0x4c   :  { %1329 = vmatpush1.bf16.msra.mxu0 %v7442_v19  ;;  %v7522_v19 = vld [vmem:[%s10961_s2 + $0x324] ss:$28 sps:$4 sm:$0xff]  }
  0x4d   :  { %1302 = vmatpush2.bf16.msra.mxu1 %v7439_v18  ;;  %1330 = vmatprep.subr.bf16.mxu0 %v7450_v21  ;;  %v7514_v18 = vld [vmem:[%s10961_s2 + $0x358] ss:$28 sps:$4 sm:$0xff]   ;;  %v7553_v21 = vld [vmem:[%s10961_s2 + $0x360] ss:$28 sps:$4 sm:$0xff]  }
  0x4e   :  { %1303 = vmatprep.subr.bf16.mxu1 %v7447_v20  ;;  %v7547_v20 = vld [vmem:[%s10961_s2 + $0x550] ss:$28 sps:$4 sm:$0xff]  }
  0x50   :  { %1331 = vmatpush1.bf16.msra.mxu0 %v7448_v23  ;;  %v7528_v23 = vld [vmem:[%s10961_s2 + $0x2ec] ss:$28 sps:$4 sm:$0xff]  }
  0x51   :  { %1304 = vmatpush2.bf16.msra.mxu1 %v7445_v22  ;;  %1332 = vmatprep.subr.bf16.mxu0 %v7456_v25  ;;  %v7520_v22 = vld [vmem:[%s10961_s2 + $0x320] ss:$28 sps:$4 sm:$0xff]   ;;  %v7558_v25 = vld [vmem:[%s10961_s2 + $0x328] ss:$28 sps:$4 sm:$0xff]  }
  0x52   :  { %1305 = vmatprep.subr.bf16.mxu1 %v7453_v24  ;;  %v7554_v24 = vld [vmem:[%s10961_s2 + $0x1a0] ss:$28 sps:$4 sm:$0xff]  }
  0x54   :  { %1333 = vmatpush1.bf16.msra.mxu0 %v7454_v27  ;;  %v7534_v27 = vld [vmem:[%s10961_s2 + $0x2b4] ss:$28 sps:$4 sm:$0xff]  }
  0x55   :  { %1306 = vmatpush2.bf16.msra.mxu1 %v7451_v26  ;;  %1334 = vmatprep.subr.bf16.mxu0 %v7462_v29  ;;  %v7526_v26 = vld [vmem:[%s10961_s2 + $0x2e8] ss:$28 sps:$4 sm:$0xff]   ;;  %v7560_v29 = vld [vmem:[%s10961_s2 + $0x2f0] ss:$28 sps:$4 sm:$0xff]  }
  0x56   :  { %1307 = vmatprep.subr.bf16.mxu1 %v7459_v28  ;;  %v7559_v28 = vld [vmem:[%s10961_s2 + $0x168] ss:$28 sps:$4 sm:$0xff]  }
  0x58   :  { %1335 = vmatpush1.bf16.msra.mxu0 %v7460_v32  ;;  %v7540_v32 = vld [vmem:[%s10961_s2 + $0x27c] ss:$28 sps:$4 sm:$0xff]  }
  0x59   :  { %1308 = vmatpush2.bf16.msra.mxu1 %v7457_v30  ;;  %1336 = vmatprep.subr.bf16.mxu0 %v7468_v34  ;;  %v7532_v30 = vld [vmem:[%s10961_s2 + $0x2b0] ss:$28 sps:$4 sm:$0xff]   ;;  %v7538_v34 = vld [vmem:[%s10961_s2 + $0x278] ss:$28 sps:$4 sm:$0xff]  }
  0x5a   :  { %1309 = vmatprep.subr.bf16.mxu1 %v7465_v33  ;;  %v7561_v33 = vld [vmem:[%s10961_s2 + $0x130] ss:$28 sps:$4 sm:$0xff]  }
  0x5c   :  { %1337 = vmatpush1.bf16.msra.mxu0 %v7466_v36  ;;  %v7564_v36 = vld [vmem:[%s10961_s2 + $0xf8] ss:$28 sps:$4 sm:$0xff]  }
  0x5d   :  { %1310 = vmatpush2.bf16.msra.mxu1 %v7463_v35  ;;  %1338 = vmatprep.subr.bf16.mxu0 %v7474_v38  ;;  %v7546_v35 = vld [vmem:[%s10961_s2 + $0x244] ss:$28 sps:$4 sm:$0xff]  }
  0x5e   :  { %1311 = vmatprep.subr.bf16.mxu1 %v7471_v37  ;;  %v7566_v37 = vld [vmem:[%s10961_s2 + $0x280] ss:$28 sps:$4 sm:$0xff]  }
  0x5f   :  { %v7544_v38 = vld [vmem:[%s10961_s2 + $0x240] ss:$28 sps:$4 sm:$0xff]  }
  0x60   :  { %1339 = vmatpush1.bf16.msra.mxu0 %v7472_v40  ;;  %v7567_v40 = vld [vmem:[%s10961_s2 + $0xc0] ss:$28 sps:$4 sm:$0xff]  }
  0x61   :  { %1312 = vmatpush2.bf16.msra.mxu1 %v7469_v39  ;;  %1354 = vmatprep.subr.bf16.mxu0 %v7480_v43  ;;  %v7552_v39 = vld [vmem:[%s10961_s2 + $0x20c] ss:$28 sps:$4 sm:$0xff]  }
  0x62   :  { %1313 = vmatprep.subr.bf16.mxu1 %v7477_v41  ;;  %v7569_v41 = vld [vmem:[%s10961_s2 + $0x248] ss:$28 sps:$4 sm:$0xff]  }
  0x63   :  { %v7550_v43 = vld [vmem:[%s10961_s2 + $0x208] ss:$28 sps:$4 sm:$0xff]  }
  0x64   :  { %1355 = vmatpush2.bf16.msra.mxu0 %v7478_v45  ;;  %v7570_v45 = vld [vmem:[%s10961_s2 + $0x88] ss:$28 sps:$4 sm:$0xff]  }
  0x65   :  { %1314 = vmatpush2.bf16.msra.mxu1 %v7475_v44  ;;  %1365 = vmatprep.subr.bf16.mxu0 %v7483_v46  ;;  %v7557_v44 = vld [vmem:[%s10961_s2 + $0x1d4] ss:$28 sps:$4 sm:$0xff]  }
  0x66   :  { %1406 = vmatprep.subr.bf16.mxu1 %v7501_v47  ;;  %v7572_v46 = vld [vmem:[%s10961_s2 + $0x210] ss:$28 sps:$4 sm:$0xff]  }
  0x67   :  { %1357 = vmatmul.mubr.bf16.vlgmr.msra.gmra.mxu0 %v8628_v42  ;;  %v7555_v47 = vld [vmem:[%s10961_s2 + $0x1d0] ss:$28 sps:$4 sm:$0xff]  }
  0x68   :  { %1316 = vmatmul.mubr.bf16.vlgmr.msra.gmra.mxu1 %v8722_v9  ;;  %1366 = vmatpush1.bf16.msra.mxu0 %v7481_v48  ;;  %v7573_v48 = vld [vmem:[%s10961_s2 + $0x50] ss:$28 sps:$4 sm:$0xff]  }
  0x69   :  { %1407 = vmatpush1.bf16.msra.mxu1 %v7499_v50  ;;  %1367 = vmatprep.subr.bf16.mxu0 %v7486_v49  ;;  %v7575_v49 = vld [vmem:[%s10961_s2 + $0x1d8] ss:$28 sps:$4 sm:$0xff]   ;;  %v7562_v50 = vld [vmem:[%s10961_s2 + $0x520] ss:$28 sps:$4 sm:$0xff]  }
  0x6a   :  { %1408 = vmatprep.subr.bf16.mxu1 %v7507_v51  ;;  %6609 = vmatprep.mubr.msk.bf16.mxu1 %vm1197_vm0, %v8594_v31  ;;  %v7576_v51 = vld [vmem:[%s10961_s2 + $0x18] ss:$28 sps:$4 sm:$0xff]  }
  0x6b   :  { %1397 = vmatprep.mubr.bf16.mxu0 %v8664_v54 }
  0x6c   :  { %1368 = vmatpush1.bf16.msra.mxu0 %v7484_v52  ;;  %v8414_v52 = vmov 0  }
  0x6d   :  { %1409 = vmatpush1.bf16.msra.mxu1 %v7505_v55  ;;  %1369 = vmatprep.subr.bf16.mxu0 %v7489_v53  ;;  %v7565_v53 = vld [vmem:[%s10961_s2 + $0x4e8] ss:$28 sps:$4 sm:$0xff]   ;;  %v7581_v55 = vld [vmem:[%s10963_s4 + $0xe0] ss:$16 sps:$4 sm:$0xff]  }
  0x6e   :  { %1410 = vmatprep.subr.bf16.mxu1 %v7513_v56  ;;  %v7583_v56 = vld [vmem:[%s10963_s4 + $0xe4] ss:$16 sps:$4 sm:$0xff]  }
  0x70   :  { %1370 = vmatpush1.bf16.msra.mxu0 %v7487_v57  ;;  %v7586_v57 = vld [vmem:[%s10963_s4 + $0xc4] ss:$16 sps:$4 sm:$0xff]  }
  0x71   :  { %1411 = vmatpush1.bf16.msra.mxu1 %v7511_v59  ;;  %1371 = vmatprep.subr.bf16.mxu0 %v7492_v58  ;;  %v7568_v58 = vld [vmem:[%s10961_s2 + $0x4b0] ss:$28 sps:$4 sm:$0xff]  }
  0x72   :  { %1412 = vmatprep.subr.bf16.mxu1 %v7519_v60  ;;  %v7584_v59 = vld [vmem:[%s10963_s4 + $0xc0] ss:$16 sps:$4 sm:$0xff]   ;;  %v7571_v60 = vld [vmem:[%s10961_s2 + $0x478] ss:$28 sps:$4 sm:$0xff]  }
  0x74   :  { %1372 = vmatpush1.bf16.msra.mxu0 %v7490_v61  ;;  %v7587_v61 = vld [vmem:[%s10963_s4 + $0xa0] ss:$16 sps:$4 sm:$0xff]  }
  0x75   :  { %1413 = vmatpush1.bf16.msra.mxu1 %v7517_v63  ;;  %1373 = vmatprep.subr.bf16.mxu0 %v7495_v62  ;;  %v7574_v62 = vld [vmem:[%s10961_s2 + $0x440] ss:$28 sps:$4 sm:$0xff]  }
  0x76   :  { %1414 = vmatprep.subr.bf16.mxu1 %v7525_v0  ;;  %v7590_v63 = vld [vmem:[%s10963_s4 + $0x80] ss:$16 sps:$4 sm:$0xff]   ;;  %v7595_v0 = vld [vmem:[%s10963_s4 + $0x64] ss:$16 sps:$4 sm:$0xff]  }
  0x78   :  { %1374 = vmatpush1.bf16.msra.mxu0 %v7493_v1  ;;  %v7577_v1 = vld [vmem:[%s10961_s2 + $0x408] ss:$28 sps:$4 sm:$0xff]  }
  0x79   :  { %1415 = vmatpush1.bf16.msra.mxu1 %v7523_v3  ;;  %1375 = vmatprep.subr.bf16.mxu0 %v7498_v2  ;;  %v7593_v2 = vld [vmem:[%s10963_s4 + $0x60] ss:$16 sps:$4 sm:$0xff]   ;;  %v7598_v3 = vld [vmem:[%s10963_s4 + $0x44] ss:$16 sps:$4 sm:$0xff]  }
  0x7a   :  { %1416 = vmatprep.subr.bf16.mxu1 %v7531_v4  ;;  %v7578_v4 = vld [vmem:[%s10961_s2 + $0x3d0] ss:$28 sps:$4 sm:$0xff]  }
  0x7c   :  { %1376 = vmatpush1.bf16.msra.mxu0 %v7496_v5  ;;  %v7596_v5 = vld [vmem:[%s10963_s4 + $0x40] ss:$16 sps:$4 sm:$0xff]  }
  0x7d   :  { %1417 = vmatpush1.bf16.msra.mxu1 %v7529_v7  ;;  %1377 = vmatprep.subr.bf16.mxu0 %v7504_v6  ;;  %v7601_v6 = vld [vmem:[%s10963_s4 + $0x24] ss:$16 sps:$4 sm:$0xff]  }
  0x7e   :  { %1418 = vmatprep.subr.bf16.mxu1 %v7537_v8  ;;  %v7579_v7 = vld [vmem:[%s10961_s2 + $0x398] ss:$28 sps:$4 sm:$0xff]   ;;  %v7599_v8 = vld [vmem:[%s10963_s4 + $0x20] ss:$16 sps:$4 sm:$0xff]  }
  0x80   :  { %1378 = vmatpush1.bf16.msra.mxu0 %v7502_v10  ;;  %v7604_v10 = vld [vmem:[%s10963_s4 + $0x4] ss:$16 sps:$4 sm:$0xff]  }
  0x81   :  { %1419 = vmatpush1.bf16.msra.mxu1 %v7535_v12  ;;  %1379 = vmatprep.subr.bf16.mxu0 %v7510_v11  ;;  %v7580_v11 = vld [vmem:[%s10961_s2 + $0x558] ss:$28 sps:$4 sm:$0xff]   ;;  %v7602_v12 = vld [vmem:[%s10963_s4] ss:$16 sps:$4 sm:$0xff]  }
  0x82   :  { %1420 = vmatprep.subr.bf16.mxu1 %v7543_v13  ;;  %v7607_v13 = vld [vmem:[%s10963_s4 + $0x1e4] ss:$16 sps:$4 sm:$0xff]  }
  0x84   :  { %1380 = vmatpush1.bf16.msra.mxu0 %v7508_v14  ;;  %v7613_v14 = vld [vmem:[%s10963_s4 + $0x2e4] ss:$16 sps:$4 sm:$0xff]  }
  0x85   :  { %1421 = vmatpush1.bf16.msra.mxu1 %v7541_v16  ;;  %1381 = vmatprep.subr.bf16.mxu0 %v7516_v15  ;;  %v7605_v15 = vld [vmem:[%s10963_s4 + $0x1e0] ss:$16 sps:$4 sm:$0xff]  }
  0x86   :  { %1436 = vmatprep.subr.bf16.mxu1 %v7549_v17  ;;  %v7611_v16 = vld [vmem:[%s10963_s4 + $0x2e0] ss:$16 sps:$4 sm:$0xff]   ;;  %v7610_v17 = vld [vmem:[%s10963_s4 + $0x1c4] ss:$16 sps:$4 sm:$0xff]  }
  0x88   :  { %1382 = vmatpush2.bf16.msra.mxu0 %v7514_v18  ;;  %v7619_v18 = vld [vmem:[%s10963_s4 + $0x2c4] ss:$16 sps:$4 sm:$0xff]  }
  0x89   :  { %1437 = vmatpush2.bf16.msra.mxu1 %v7547_v20  ;;  %1383 = vmatprep.subr.bf16.mxu0 %v7522_v19  ;;  %v7608_v19 = vld [vmem:[%s10963_s4 + $0x1c0] ss:$16 sps:$4 sm:$0xff]  }
  0x8a   :  { %7181 = vmatprep.subr.bf16.mxu1 %v7553_v21  ;;  %v7617_v20 = vld [vmem:[%s10963_s4 + $0x2c0] ss:$16 sps:$4 sm:$0xff]   ;;  %v7616_v21 = vld [vmem:[%s10963_s4 + $0x1a4] ss:$16 sps:$4 sm:$0xff]  }
  0x8c   :  { %1439 = vmatmul.mubr.bf16.vlgmr.msra.gmra.mxu1 %v8628_v42  ;;  %1384 = vmatpush2.bf16.msra.mxu0 %v7520_v22  ;;  %v7625_v22 = vld [vmem:[%s10963_s4 + $0x2a4] ss:$16 sps:$4 sm:$0xff]  }
  0x8d   :  { %7182 = vmatpush3.bf16.msra.mxu1 %v7554_v24  ;;  %1385 = vmatprep.subr.bf16.mxu0 %v7528_v23  ;;  %v7614_v23 = vld [vmem:[%s10963_s4 + $0x1a0] ss:$16 sps:$4 sm:$0xff]   ;;  %v7622_v24 = vld [vmem:[%s10963_s4 + $0x184] ss:$16 sps:$4 sm:$0xff]  }
  0x8e   :  { %7183 = vmatprep.subr.bf16.mxu1 %v7558_v25  ;;  %1479 = vmatprep.mubr.bf16.mxu1 %v8664_v54  ;;  %v7563_v54 = vld [vmem:[%s10961_s2 + $0x2b8] ss:$28 sps:$4 sm:$0xff]  }
  0x8f   :  { %v7631_v25 = vld [vmem:[%s10963_s4 + $0x284] ss:$16 sps:$4 sm:$0xff]  }
  0x90   :  { %1386 = vmatpush2.bf16.msra.mxu0 %v7526_v26  ;;  %v7620_v26 = vld [vmem:[%s10963_s4 + $0x180] ss:$16 sps:$4 sm:$0xff]  }
  0x91   :  { %7184 = vmatpush3.bf16.msra.mxu1 %v7559_v28  ;;  %1387 = vmatprep.subr.bf16.mxu0 %v7534_v27  ;;  %v7629_v27 = vld [vmem:[%s10963_s4 + $0x280] ss:$16 sps:$4 sm:$0xff]   ;;  %v7628_v28 = vld [vmem:[%s10963_s4 + $0x164] ss:$16 sps:$4 sm:$0xff]  }
  0x92   :  { %7185 = vmatprep.subr.bf16.mxu1 %v7560_v29  ;;  %v7637_v29 = vld [vmem:[%s10963_s4 + $0x264] ss:$16 sps:$4 sm:$0xff]  }
  0x94   :  { %1388 = vmatpush2.bf16.msra.mxu0 %v7532_v30  ;;  %v7626_v30 = vld [vmem:[%s10963_s4 + $0x160] ss:$16 sps:$4 sm:$0xff]  }
  0x95   :  { %7186 = vmatpush3.bf16.msra.mxu1 %v7561_v33  ;;  %1389 = vmatprep.subr.bf16.mxu0 %v7540_v32  ;;  %v7635_v32 = vld [vmem:[%s10963_s4 + $0x260] ss:$16 sps:$4 sm:$0xff]   ;;  %v7634_v33 = vld [vmem:[%s10963_s4 + $0x144] ss:$16 sps:$4 sm:$0xff]  }
  0x96   :  { %7187 = vmatprep.subr.bf16.mxu1 %v7563_v54  ;;  %v7643_v54 = vld [vmem:[%s10963_s4 + $0x244] ss:$16 sps:$4 sm:$0xff]  }
  0x98   :  { %1390 = vmatpush2.bf16.msra.mxu0 %v7538_v34  ;;  %v7632_v34 = vld [vmem:[%s10963_s4 + $0x140] ss:$16 sps:$4 sm:$0xff]  }
  0x99   :  { %7188 = vmatpush3.bf16.msra.mxu1 %v7564_v36  ;;  %1391 = vmatprep.subr.bf16.mxu0 %v7546_v35  ;;  %v7641_v35 = vld [vmem:[%s10963_s4 + $0x240] ss:$16 sps:$4 sm:$0xff]   ;;  %v7640_v36 = vld [vmem:[%s10963_s4 + $0x124] ss:$16 sps:$4 sm:$0xff]  }
  0x9a   :  { %7189 = vmatprep.subr.bf16.mxu1 %v7566_v37  ;;  %v7649_v37 = vld [vmem:[%s10963_s4 + $0x224] ss:$16 sps:$4 sm:$0xff]  }
  0x9c   :  { %1392 = vmatpush2.bf16.msra.mxu0 %v7544_v38  ;;  %v7638_v38 = vld [vmem:[%s10963_s4 + $0x120] ss:$16 sps:$4 sm:$0xff]  }
  0x9d   :  { %7190 = vmatpush3.bf16.msra.mxu1 %v7567_v40  ;;  %1393 = vmatprep.subr.bf16.mxu0 %v7552_v39  ;;  %v7647_v39 = vld [vmem:[%s10963_s4 + $0x220] ss:$16 sps:$4 sm:$0xff]   ;;  %v7646_v40 = vld [vmem:[%s10963_s4 + $0x104] ss:$16 sps:$4 sm:$0xff]  }
  0x9e   :  { %7191 = vmatprep.subr.bf16.mxu1 %v7569_v41  ;;  %v7652_v41 = vld [vmem:[%s10963_s4 + $0x204] ss:$16 sps:$4 sm:$0xff]  }
  0xa0   :  { %1394 = vmatpush2.bf16.msra.mxu0 %v7550_v43  ;;  %v7644_v43 = vld [vmem:[%s10963_s4 + $0x100] ss:$16 sps:$4 sm:$0xff]  }
  0xa1   :  { %7192 = vmatpush3.bf16.msra.mxu1 %v7570_v45  ;;  %1395 = vmatprep.subr.bf16.mxu0 %v7557_v44  ;;  %v7650_v44 = vld [vmem:[%s10963_s4 + $0x200] ss:$16 sps:$4 sm:$0xff]   ;;  %v7655_v45 = vld [vmem:[%s10963_s4 + $0x3e4] ss:$16 sps:$4 sm:$0xff]  }
  0xa2   :  { %7193 = vmatprep.subr.bf16.mxu1 %v7572_v46  ;;  %v7679_v46 = vld [vmem:[%s10963_s4 + $0x4e4] ss:$16 sps:$4 sm:$0xff]  }
  0xa4   :  { %1396 = vmatpush2.bf16.msra.mxu0 %v7555_v47 }
  0xa5   :  { %7194 = vmatpush3.bf16.msra.mxu1 %v7573_v48  ;;  %1487 = vmatprep.subr.bf16.mxu0 %v8414_v52  ;;  %v7653_v48 = vld [vmem:[%s10963_s4 + $0x3e0] ss:$16 sps:$4 sm:$0xff]  }
  0xa6   :  { %7195 = vmatprep.subr.bf16.mxu1 %v7575_v49 }
  0xa7   :  { %1398 = vmatmul.mubr.bf16.vlgmr.msra.gmra.mxu0 %v8722_v9 }
  0xa8   :  { %1488 = vmatpush1.bf16.msra.mxu0 %v7562_v50  ;;  %6610 = vmatprep.mubr.msk.bf16.mxu0 %vm1197_vm0, %v8594_v31  ;;  %v7589_v31 = vld [vmem:[%s10963_s4 + $0xa4] ss:$16 sps:$4 sm:$0xff]  }
  0xa9   :  { %7196 = vmatpush3.bf16.msra.mxu1 %v7576_v51  ;;  %1489 = vmatprep.subr.bf16.mxu0 %v8414_v52  ;;  %v7658_v50 = vld [vmem:[%s10963_s4 + $0x3c4] ss:$16 sps:$4 sm:$0xff]  }
  0xaa   :  { %2767 = vmatprep.subr.bf16.mxu1 %v7583_v56  ;;  %v7661_v56 = vld [vmem:[%s10963_s4 + $0x3a4] ss:$16 sps:$4 sm:$0xff]  }
  0xac   :  { %1480 = vmatmul.mubr.bf16.vlgmr.msra.gmra.mxu1 %v8722_v9  ;;  %1490 = vmatpush1.bf16.msra.mxu0 %v7565_v53  ;;  %v7592_v9 = vld [vmem:[%s10963_s4 + $0x84] ss:$16 sps:$4 sm:$0xff]   ;;  %v7656_v53 = vld [vmem:[%s10963_s4 + $0x3c0] ss:$16 sps:$4 sm:$0xff]  }
  0xad   :  { %2768 = vmatpush1.bf16.msra.mxu1 %v7581_v55  ;;  %1491 = vmatprep.subr.bf16.mxu0 %v8414_v52 }
  0xae   :  { %2769 = vmatprep.subr.bf16.mxu1 %v7586_v57  ;;  %v7659_v57 = vld [vmem:[%s10963_s4 + $0x3a0] ss:$16 sps:$4 sm:$0xff]  }
  0xb0   :  { %1492 = vmatpush1.bf16.msra.mxu0 %v7568_v58  ;;  %v7664_v58 = vld [vmem:[%s10963_s4 + $0x384] ss:$16 sps:$4 sm:$0xff]  }
  0xb1   :  { %2770 = vmatpush1.bf16.msra.mxu1 %v7584_v59  ;;  %1493 = vmatprep.subr.bf16.mxu0 %v8414_v52  ;;  %v262_v59 = vlaneseq }
  0xb2   :  { %2771 = vmatprep.subr.bf16.mxu1 %v7589_v31  ;;  %v7662_v31 = vld [vmem:[%s10963_s4 + $0x380] ss:$16 sps:$4 sm:$0xff]  }
  0xb4   :  { %1494 = vmatpush1.bf16.msra.mxu0 %v7571_v60  ;;  %v7667_v60 = vld [vmem:[%s10963_s4 + $0x364] ss:$16 sps:$4 sm:$0xff]  }
  0xb5   :  { %2772 = vmatpush1.bf16.msra.mxu1 %v7587_v61  ;;  %1495 = vmatprep.subr.bf16.mxu0 %v8414_v52  ;;  %v9249_v61 = vshrl.u32 %v262_v59, 7  ;;  %v7706_v59 = vld [vmem:[%s10963_s4 + $0x5c4] ss:$16 sps:$4 sm:$0xff]  }
  0xb6   :  { %2773 = vmatprep.subr.bf16.mxu1 %v7592_v9  ;;  %v7665_v9 = vld [vmem:[%s10963_s4 + $0x360] ss:$16 sps:$4 sm:$0xff]  }
  0xb8   :  { %1496 = vmatpush1.bf16.msra.mxu0 %v7574_v62  ;;  %v7670_v62 = vld [vmem:[%s10963_s4 + $0x344] ss:$16 sps:$4 sm:$0xff]  }
  0xb9   :  { %2774 = vmatpush1.bf16.msra.mxu1 %v7590_v63  ;;  %1497 = vmatprep.subr.bf16.mxu0 %v8414_v52  ;;  %v9260_v63 = vld [vmem:[%s10962_s3] sm:$0x7f] }
  0xba   :  { %2775 = vmatprep.subr.bf16.mxu1 %v7595_v0  ;;  %v9263_v0 = vsub.s32 0, %v9249_v61 }
  0xbc   :  { %1498 = vmatpush1.bf16.msra.mxu0 %v7577_v1  ;;  %v7668_v1 = vld [vmem:[%s10963_s4 + $0x340] ss:$16 sps:$4 sm:$0xff]  }
  0xbd   :  { %2776 = vmatpush1.bf16.msra.mxu1 %v7593_v2  ;;  %1499 = vmatprep.subr.bf16.mxu0 %v8414_v52  ;;  %v7673_v2 = vld [vmem:[%s10963_s4 + $0x324] ss:$16 sps:$4 sm:$0xff]  }
  0xbe   :  { %2777 = vmatprep.subr.bf16.mxu1 %v7598_v3  ;;  %v9272_v3 = vsub.s32 1, %v9249_v61 }
  0xc0   :  { %1500 = vmatpush1.bf16.msra.mxu0 %v7578_v4  ;;  %v265_v4 = vrot.slane %v9260_v63, %v9263_v0 }
  0xc1   :  { %2778 = vmatpush1.bf16.msra.mxu1 %v7596_v5  ;;  %1501 = vmatprep.subr.bf16.mxu0 %v8414_v52  ;;  %v7671_v5 = vld [vmem:[%s10963_s4 + $0x320] ss:$16 sps:$4 sm:$0xff]  }
  0xc2   :  { %2779 = vmatprep.subr.bf16.mxu1 %v7601_v6  ;;  %v7676_v6 = vld [vmem:[%s10963_s4 + $0x304] ss:$16 sps:$4 sm:$0xff]  }
  0xc4   :  { %1502 = vmatpush1.bf16.msra.mxu0 %v7579_v7  ;;  %v269_v7 = vrot.slane %v9260_v63, %v9272_v3 }
  0xc5   :  { %2780 = vmatpush1.bf16.msra.mxu1 %v7599_v8  ;;  %1517 = vmatprep.subr.bf16.mxu0 %v8414_v52 }
  0xc6   :  { %2781 = vmatprep.subr.bf16.mxu1 %v7604_v10 }
  0xc8   :  { %1518 = vmatpush2.bf16.msra.mxu0 %v7580_v11  ;;  %v7674_v11 = vld [vmem:[%s10963_s4 + $0x300] ss:$16 sps:$4 sm:$0xff]  }
  0xc9   :  { %2782 = vmatpush1.bf16.msra.mxu1 %v7602_v12  ;;  %2808 = vmatprep.subr.bf16.mxu0 %v7613_v14 }
  0xca   :  { %2783 = vmatprep.subr.bf16.mxu1 %v7607_v13 }
  0xcb   :  { %1520 = vmatmul.mubr.bf16.vlgmr.msra.gmra.mxu0 %v8628_v42  ;;  %v7623_v42 = vld [vmem:[%s10963_s4 + $0x2a0] ss:$16 sps:$4 sm:$0xff]  }
  0xcc   :  { %2809 = vmatpush1.bf16.msra.mxu0 %v7611_v16 }
  0xcd   :  { %2784 = vmatpush2.bf16.msra.mxu1 %v7605_v15  ;;  %2810 = vmatprep.subr.bf16.mxu0 %v7619_v18 }
  0xce   :  { %2785 = vmatprep.subr.bf16.mxu1 %v7610_v17  ;;  %v7745_v17 = vld [vmem:[%s10963_s4 + $0x624] ss:$16 sps:$4 sm:$0xff]  }
  0xd0   :  { %2811 = vmatpush1.bf16.msra.mxu0 %v7617_v20 }
  0xd1   :  { %2786 = vmatpush2.bf16.msra.mxu1 %v7608_v19  ;;  %2812 = vmatprep.subr.bf16.mxu0 %v7625_v22  ;;  %v7677_v22 = vld [vmem:[%s10963_s4 + $0x4e0] ss:$16 sps:$4 sm:$0xff]  }
  0xd2   :  { %2787 = vmatprep.subr.bf16.mxu1 %v7616_v21 }
  0xd4   :  { %2813 = vmatpush1.bf16.msra.mxu0 %v7623_v42  ;;  %v7682_v42 = vld [vmem:[%s10963_s4 + $0x4c4] ss:$16 sps:$4 sm:$0xff]  }
  0xd5   :  { %2788 = vmatpush2.bf16.msra.mxu1 %v7614_v23  ;;  %2814 = vmatprep.subr.bf16.mxu0 %v7631_v25  ;;  %v7685_v25 = vld [vmem:[%s10963_s4 + $0x4a4] ss:$16 sps:$4 sm:$0xff]  }
  0xd6   :  { %2789 = vmatprep.subr.bf16.mxu1 %v7622_v24  ;;  %v7680_v24 = vld [vmem:[%s10963_s4 + $0x4c0] ss:$16 sps:$4 sm:$0xff]  }
  0xd8   :  { %2815 = vmatpush1.bf16.msra.mxu0 %v7629_v27  ;;  %v7688_v27 = vld [vmem:[%s10963_s4 + $0x484] ss:$16 sps:$4 sm:$0xff]  }
  0xd9   :  { %2790 = vmatpush2.bf16.msra.mxu1 %v7620_v26  ;;  %2816 = vmatprep.subr.bf16.mxu0 %v7637_v29  ;;  %v7683_v26 = vld [vmem:[%s10963_s4 + $0x4a0] ss:$16 sps:$4 sm:$0xff]   ;;  %v7691_v29 = vld [vmem:[%s10963_s4 + $0x464] ss:$16 sps:$4 sm:$0xff]  }
  0xda   :  { %2791 = vmatprep.subr.bf16.mxu1 %v7628_v28  ;;  %v7686_v28 = vld [vmem:[%s10963_s4 + $0x480] ss:$16 sps:$4 sm:$0xff]  }
  0xdc   :  { %2817 = vmatpush1.bf16.msra.mxu0 %v7635_v32  ;;  %v7694_v32 = vld [vmem:[%s10963_s4 + $0x444] ss:$16 sps:$4 sm:$0xff]  }
  0xdd   :  { %2792 = vmatpush2.bf16.msra.mxu1 %v7626_v30  ;;  %2818 = vmatprep.subr.bf16.mxu0 %v7643_v54  ;;  %v7689_v30 = vld [vmem:[%s10963_s4 + $0x460] ss:$16 sps:$4 sm:$0xff]  }
  0xde   :  { %2793 = vmatprep.subr.bf16.mxu1 %v7634_v33  ;;  %v9327_v33 = vsub.s32 2, %v9249_v61  ;;  %v7692_v54 = vld [vmem:[%s10963_s4 + $0x440] ss:$16 sps:$4 sm:$0xff]  }
  0xe0   :  { %2819 = vmatpush1.bf16.msra.mxu0 %v7641_v35  ;;  %v9336_v35 = vsub.s32 3, %v9249_v61 }
  0xe1   :  { %2794 = vmatpush2.bf16.msra.mxu1 %v7632_v34  ;;  %2820 = vmatprep.subr.bf16.mxu0 %v7649_v37  ;;  %v7697_v34 = vld [vmem:[%s10963_s4 + $0x424] ss:$16 sps:$4 sm:$0xff]   ;;  %v7695_v37 = vld [vmem:[%s10963_s4 + $0x420] ss:$16 sps:$4 sm:$0xff]  }
  0xe2   :  { %2795 = vmatprep.subr.bf16.mxu1 %v7640_v36  ;;  %v273_v36 = vrot.slane %v9260_v63, %v9327_v33 }
  0xe4   :  { %2821 = vmatpush1.bf16.msra.mxu0 %v7647_v39  ;;  %v277_v39 = vrot.slane %v9260_v63, %v9336_v35 }
  0xe5   :  { %2796 = vmatpush2.bf16.msra.mxu1 %v7638_v38  ;;  %2822 = vmatprep.subr.bf16.mxu0 %v7652_v41  ;;  %v7700_v38 = vld [vmem:[%s10963_s4 + $0x404] ss:$16 sps:$4 sm:$0xff]  }
  0xe6   :  { %2797 = vmatprep.subr.bf16.mxu1 %v7646_v40 }
  0xe8   :  { %v1276_v47 = vpop.f32.mrf.mxu1  ;;  %2823 = vmatpush1.bf16.msra.mxu0 %v7650_v44  ;;  %v7698_v44 = vld [vmem:[%s10963_s4 + $0x400] ss:$16 sps:$4 sm:$0xff]  }
  0xe9   :  { %2798 = vmatpush2.bf16.msra.mxu1 %v7644_v43  ;;  %2824 = vmatprep.subr.bf16.mxu0 %v7655_v45 }
  0xea   :  { %v1278_v49 = vpop.f32.mrf.mxu1  ;;  %2849 = vmatprep.subr.bf16.mxu1 %v7679_v46 }
  0xec   :  { %v1280_v51 = vpop.f32.mrf.mxu1  ;;  %2825 = vmatpush2.bf16.msra.mxu0 %v7653_v48 }
  0xed   :  { %2826 = vmatprep.subr.bf16.mxu0 %v7658_v50 }
  0xee   :  { %v1281_v55 = vpop.f32.mrf.mxu1 }
  0xef   :  { %v7701_v55 = vld [vmem:[%s10963_s4 + $0x5e0] ss:$16 sps:$4 sm:$0xff]  }
  0xf0   :  { %2827 = vmatpush2.bf16.msra.mxu0 %v7656_v53 }
  0xf1   :  { %2828 = vmatprep.subr.bf16.mxu0 %v7661_v56 }
  0xf4   :  { %2829 = vmatpush2.bf16.msra.mxu0 %v7659_v57 }
  0xf5   :  { %2830 = vmatprep.subr.bf16.mxu0 %v7664_v58 }
  0xf8   :  { %2831 = vmatpush2.bf16.msra.mxu0 %v7662_v31 }
  0xf9   :  { %2832 = vmatprep.subr.bf16.mxu0 %v7667_v60  ;;  %v7704_v60 = vld [vmem:[%s10963_s4 + $0x5c0] ss:$16 sps:$4 sm:$0xff]  }
  0xfc   :  { %2833 = vmatpush2.bf16.msra.mxu0 %v7665_v9 }
  0xfd   :  { %2834 = vmatprep.subr.bf16.mxu0 %v7670_v62  ;;  %v7709_v62 = vld [vmem:[%s10963_s4 + $0x5a4] ss:$16 sps:$4 sm:$0xff]  }
 0x100   :  { %2835 = vmatpush2.bf16.msra.mxu0 %v7668_v1  ;;  %v7743_v1 = vld [vmem:[%s10963_s4 + $0x620] ss:$16 sps:$4 sm:$0xff]  }
 0x101   :  { %2836 = vmatprep.subr.bf16.mxu0 %v7673_v2 }
 0x103   :  { %v1235_v8 = vpop.f32.mrf.mxu0 }
 0x104   :  { %v1236_v10 = vadd.f32 %v1235_v8, %v265_v4  ;;  %2837 = vmatpush2.bf16.msra.mxu0 %v7671_v5  ;;  %v7751_v4 = vld [vmem:[%s10963_s4 + $0x604] ss:$16 sps:$4 sm:$0xff]   ;;  %v7707_v5 = vld [vmem:[%s10963_s4 + $0x5a0] ss:$16 sps:$4 sm:$0xff]   ;;  %v7757_v8 = vld [vmem:[%s10963_s4 + $0xec] ss:$16 sps:$4 sm:$0xff]  }
 0x105   :  { %v1237_v12 = vpop.f32.mrf.mxu0  ;;  %2838 = vmatprep.subr.bf16.mxu0 %v7676_v6  ;;  %v7712_v6 = vld [vmem:[%s10963_s4 + $0x584] ss:$16 sps:$4 sm:$0xff]  }
 0x106   :  { %v1277_v13 = vadd.f32 %v1276_v47, %v1236_v10  ;;  %v1238_v14 = vadd.f32 %v1237_v12, %v269_v7  ;;  %v7703_v47 = vld [vmem:[%s10963_s4 + $0x5e4] ss:$16 sps:$4 sm:$0xff]   ;;  %v7749_v7 = vld [vmem:[%s10963_s4 + $0x600] ss:$16 sps:$4 sm:$0xff]  }
 0x107   :  { %v1239_v15 = vpop.f32.mrf.mxu0  ;;  %v7710_v10 = vld [vmem:[%s10963_s4 + $0x580] ss:$16 sps:$4 sm:$0xff]  }
 0x108   :  { %v1279_v16 = vadd.f32 %v1278_v49, %v1238_v14  ;;  %2839 = vmatpush2.bf16.msra.mxu0 %v7674_v11  ;;  %v1527_v18 = vmax.f32 %v1277_v13, 0.0  ;;  %v7715_v11 = vld [vmem:[%s10963_s4 + $0x564] ss:$16 sps:$4 sm:$0xff]   ;;  %v7713_v12 = vld [vmem:[%s10963_s4 + $0x560] ss:$16 sps:$4 sm:$0xff]  }
 0x109   :  { %v1240_v19 = vpop.f32.mrf.mxu0  ;;  %2902 = vmatprep.subr.bf16.mxu0 %v7745_v17  ;;  %v7718_v13 = vld [vmem:[%s10963_s4 + $0x544] ss:$16 sps:$4 sm:$0xff]   ;;  %v7716_v14 = vld [vmem:[%s10963_s4 + $0x540] ss:$16 sps:$4 sm:$0xff]  }
 0x10a   :  { %v1528_v20 = vmax.f32 %v1279_v16, 0.0  ;;  %v9295_v23 = vpack.c.bf16 %v1527_v18, %v1527_v18  ;;  %v7721_v15 = vld [vmem:[%s10963_s4 + $0x524] ss:$16 sps:$4 sm:$0xff]   ;;  %v7719_v16 = vld [vmem:[%s10963_s4 + $0x520] ss:$16 sps:$4 sm:$0xff]  }
 0x10b   :  { %v7724_v17 = vld [vmem:[%s10963_s4 + $0x504] ss:$16 sps:$4 sm:$0xff]   ;;  %v7722_v18 = vld [vmem:[%s10963_s4 + $0x500] ss:$16 sps:$4 sm:$0xff]   ;;  %v7727_v19 = vld [vmem:[%s10963_s4 + $0x2ec] ss:$16 sps:$4 sm:$0xff]  }
 0x10c   :  { %v9290_v21 = vpack.c.bf16 %v1528_v20, %v1528_v20 }
 0x10e   :  { %2799 = vmatprep.mubr.bf16.mxu1 %v9290_v21 }
 0x10f   :  { %2800 = vmatmul.mubr.bf16.vlgmr.msra.gmra.mxu1 %v9295_v23 }
 0x110   :  { %2850 = vmatpush1.bf16.msra.mxu1 %v7677_v22 }
 0x111   :  { %2851 = vmatprep.subr.bf16.mxu1 %v7682_v42 }
 0x114   :  { %2852 = vmatpush1.bf16.msra.mxu1 %v7680_v24 }
 0x115   :  { %2853 = vmatprep.subr.bf16.mxu1 %v7685_v25  ;;  %v280_v25 = vsub.s32 4, %v9249_v61 }
 0x118   :  { %2854 = vmatpush1.bf16.msra.mxu1 %v7683_v26  ;;  %v284_v26 = vsub.s32 5, %v9249_v61 }
 0x119   :  { %2855 = vmatprep.subr.bf16.mxu1 %v7688_v27  ;;  %v281_v27 = vrot.slane %v9260_v63, %v280_v25 }
 0x11c   :  { %2856 = vmatpush1.bf16.msra.mxu1 %v7686_v28  ;;  %v285_v28 = vrot.slane %v9260_v63, %v284_v26 }
 0x11d   :  { %2857 = vmatprep.subr.bf16.mxu1 %v7691_v29 }
 0x120   :  { %2858 = vmatpush1.bf16.msra.mxu1 %v7689_v30 }
 0x121   :  { %2859 = vmatprep.subr.bf16.mxu1 %v7694_v32 }
 0x124   :  { %2860 = vmatpush1.bf16.msra.mxu1 %v7692_v54 }
 0x125   :  { %2861 = vmatprep.subr.bf16.mxu1 %v7697_v34 }
 0x127   :  { %v1358_v41 = vpop.f32.mrf.mxu0 }
 0x128   :  { %v1317_v40 = vpop.f32.mrf.mxu1  ;;  %2862 = vmatpush1.bf16.msra.mxu1 %v7695_v37 }
 0x129   :  { %v1318_v43 = vadd.f32 %v1317_v40, %v273_v36  ;;  %v1360_v46 = vpop.f32.mrf.mxu0  ;;  %2863 = vmatprep.subr.bf16.mxu1 %v7700_v38 }
 0x12a   :  { %v1319_v45 = vpop.f32.mrf.mxu1 }
 0x12b   :  { %v1359_v48 = vadd.f32 %v1358_v41, %v1318_v43  ;;  %v1320_v49 = vadd.f32 %v1319_v45, %v277_v39  ;;  %v1362_v50 = vpop.f32.mrf.mxu0  ;;  %v7730_v45 = vld [vmem:[%s10963_s4 + $0x2cc] ss:$16 sps:$4 sm:$0xff]  }
 0x12c   :  { %v1321_v51 = vpop.f32.mrf.mxu1  ;;  %2864 = vmatpush1.bf16.msra.mxu1 %v7698_v44  ;;  %v7725_v44 = vld [vmem:[%s10963_s4 + $0x2e8] ss:$16 sps:$4 sm:$0xff]  }
 0x12d   :  { %v1361_v53 = vadd.f32 %v1360_v46, %v1320_v49  ;;  %v1529_v56 = vmax.f32 %v1359_v48, 0.0  ;;  %v1363_v57 = vpop.f32.mrf.mxu0  ;;  %2865 = vmatprep.subr.bf16.mxu1 %v7703_v47  ;;  %v7728_v50 = vld [vmem:[%s10963_s4 + $0x2c8] ss:$16 sps:$4 sm:$0xff]   ;;  %v7733_v51 = vld [vmem:[%s10963_s4 + $0x2ac] ss:$16 sps:$4 sm:$0xff]  }
 0x12e   :  { %v1322_v58 = vpop.f32.mrf.mxu1  ;;  %v7739_v57 = vld [vmem:[%s10963_s4 + $0x26c] ss:$16 sps:$4 sm:$0xff]  }
 0x12f   :  { %v1530_v31 = vmax.f32 %v1361_v53, 0.0  ;;  %v9371_v2 = vpack.c.bf16 %v1529_v56, %v1529_v56  ;;  %v7731_v53 = vld [vmem:[%s10963_s4 + $0x2a8] ss:$16 sps:$4 sm:$0xff]  }
 0x130   :  { %2866 = vmatpush2.bf16.msra.mxu1 %v7701_v55  ;;  %v7736_v55 = vld [vmem:[%s10963_s4 + $0x28c] ss:$16 sps:$4 sm:$0xff]   ;;  %v7734_v56 = vld [vmem:[%s10963_s4 + $0x288] ss:$16 sps:$4 sm:$0xff]  }
 0x131   :  { %v9363_v9 = vpack.c.bf16 %v1530_v31, %v1530_v31  ;;  %2867 = vmatprep.subr.bf16.mxu1 %v7706_v59  ;;  %v7737_v58 = vld [vmem:[%s10963_s4 + $0x268] ss:$16 sps:$4 sm:$0xff]   ;;  %v7742_v59 = vld [vmem:[%s10963_s4 + $0x24c] ss:$16 sps:$4 sm:$0xff]   ;;  %v288_v31 = vsub.s32 6, %v9249_v61 }
 0x133   :  { %2840 = vmatprep.mubr.bf16.mxu0 %v9363_v9 }
 0x134   :  { %2841 = vmatmul.mubr.bf16.vlgmr.msra.gmra.mxu0 %v9371_v2  ;;  %2868 = vmatpush2.bf16.msra.mxu1 %v7704_v60  ;;  %v7740_v60 = vld [vmem:[%s10963_s4 + $0x248] ss:$16 sps:$4 sm:$0xff]  }
 0x135   :  { %2903 = vmatpush1.bf16.msra.mxu0 %v7743_v1  ;;  %2869 = vmatprep.subr.bf16.mxu1 %v7709_v62  ;;  %v289_v1 = vrot.slane %v9260_v63, %v288_v31  ;;  %v7760_v63 = vld [vmem:[%s10963_s4 + $0x3ec] ss:$16 sps:$4 sm:$0xff]  }
 0x136   :  { %2904 = vmatprep.subr.bf16.mxu0 %v7751_v4  ;;  %2922 = vmatprep.mubr.bf16.mxu0 %v8414_v52  ;;  %v7746_v4 = vld [vmem:[%s10963_s4 + $0x228] ss:$16 sps:$4 sm:$0xff]  }
 0x138   :  { %2870 = vmatpush2.bf16.msra.mxu1 %v7707_v5  ;;  %v7754_v5 = vld [vmem:[%s10963_s4 + $0x20c] ss:$16 sps:$4 sm:$0xff]  }
 0x139   :  { %2905 = vmatpush1.bf16.msra.mxu0 %v7749_v7  ;;  %2871 = vmatprep.subr.bf16.mxu1 %v7712_v6 }
 0x13a   :  { %2931 = vmatprep.subr.bf16.mxu0 %v7757_v8  ;;  %v7752_v8 = vld [vmem:[%s10963_s4 + $0x208] ss:$16 sps:$4 sm:$0xff]  }
 0x13c   :  { %2872 = vmatpush2.bf16.msra.mxu1 %v7710_v10 }
 0x13d   :  { %2873 = vmatprep.subr.bf16.mxu1 %v7715_v11 }
 0x140   :  { %2874 = vmatpush2.bf16.msra.mxu1 %v7713_v12  ;;  %v7755_v12 = vld [vmem:[%s10963_s4 + $0xe8] ss:$16 sps:$4 sm:$0xff]  }
 0x141   :  { %2875 = vmatprep.subr.bf16.mxu1 %v7718_v13 }
 0x144   :  { %2876 = vmatpush2.bf16.msra.mxu1 %v7716_v14  ;;  %v7758_v14 = vld [vmem:[%s10963_s4 + $0x3e8] ss:$16 sps:$4 sm:$0xff]  }
 0x145   :  { %2877 = vmatprep.subr.bf16.mxu1 %v7721_v15  ;;  %v7763_v15 = vld [vmem:[%s10963_s4 + $0xcc] ss:$16 sps:$4 sm:$0xff]  }
 0x148   :  { %2878 = vmatpush2.bf16.msra.mxu1 %v7719_v16 }
 0x149   :  { %2879 = vmatprep.subr.bf16.mxu1 %v7724_v17  ;;  %v7766_v17 = vld [vmem:[%s10963_s4 + $0x3cc] ss:$16 sps:$4 sm:$0xff]  }
 0x14c   :  { %v1440_v20 = vpop.f32.mrf.mxu1  ;;  %2880 = vmatpush2.bf16.msra.mxu1 %v7722_v18 }
 0x14d   :  { %2972 = vmatprep.subr.bf16.mxu1 %v7727_v19 }
 0x14e   :  { %v1442_v22 = vpop.f32.mrf.mxu1 }
 0x150   :  { %v1444_v42 = vpop.f32.mrf.mxu1 }
 0x151   :  { %v7769_v42 = vld [vmem:[%s10963_s4 + $0xac] ss:$16 sps:$4 sm:$0xff]  }
 0x152   :  { %v1445_v24 = vpop.f32.mrf.mxu1 }
 0x153   :  { %v7772_v24 = vld [vmem:[%s10963_s4 + $0x3ac] ss:$16 sps:$4 sm:$0xff]  }
 0x167   :  { %v1399_v29 = vpop.f32.mrf.mxu0 }
 0x168   :  { %v1400_v30 = vadd.f32 %v1399_v29, %v281_v27  ;;  %v7767_v27 = vld [vmem:[%s10963_s4 + $0xa8] ss:$16 sps:$4 sm:$0xff]   ;;  %v7775_v29 = vld [vmem:[%s10963_s4 + $0x8c] ss:$16 sps:$4 sm:$0xff]  }
 0x169   :  { %v1401_v32 = vpop.f32.mrf.mxu0 }
 0x16a   :  { %v1441_v54 = vadd.f32 %v1440_v20, %v1400_v30  ;;  %v1402_v34 = vadd.f32 %v1401_v32, %v285_v28  ;;  %v7761_v20 = vld [vmem:[%s10963_s4 + $0xc8] ss:$16 sps:$4 sm:$0xff]  }
 0x16b   :  { %v1403_v36 = vpop.f32.mrf.mxu0  ;;  %v7770_v28 = vld [vmem:[%s10963_s4 + $0x3a8] ss:$16 sps:$4 sm:$0xff]  }
 0x16c   :  { %v7197_v37 = vpop.f32.mrf.mxu1  ;;  %v1443_v38 = vadd.f32 %v1442_v22, %v1402_v34  ;;  %v1531_v39 = vmax.f32 %v1441_v54, 0.0  ;;  %v7764_v22 = vld [vmem:[%s10963_s4 + $0x3c8] ss:$16 sps:$4 sm:$0xff]   ;;  %v7781_v54 = vld [vmem:[%s10963_s4 + $0x6c] ss:$16 sps:$4 sm:$0xff]  }
 0x16d   :  { %v1404_v40 = vpop.f32.mrf.mxu0  ;;  %v7773_v30 = vld [vmem:[%s10963_s4 + $0x88] ss:$16 sps:$4 sm:$0xff]   ;;  %v7784_v34 = vld [vmem:[%s10963_s4 + $0x36c] ss:$16 sps:$4 sm:$0xff]  }
 0x16e   :  { %v7198_v41 = vpop.f32.mrf.mxu1  ;;  %v1532_v43 = vmax.f32 %v1443_v38, 0.0  ;;  %v9437_v48 = vpack.c.bf16 %v1531_v39, %v1531_v39  ;;  %v7776_v32 = vld [vmem:[%s10963_s4 + $0x388] ss:$16 sps:$4 sm:$0xff]  }
 0x16f   :  { %v7199_v62 = vadd.f32 %v7198_v41, %v7197_v37 }
 0x170   :  { %v7200_v46 = vpop.f32.mrf.mxu1  ;;  %v9435_v47 = vpack.c.bf16 %v1532_v43, %v1532_v43 }
 0x171   :  { %v1482_v6 = vadd.f32 %v7199_v62, %v289_v1 }
 0x172   :  { %v7201_v49 = vpop.f32.mrf.mxu1  ;;  %2881 = vmatprep.mubr.bf16.mxu1 %v9435_v47 }
 0x173   :  { %2882 = vmatmul.mubr.bf16.vlgmr.msra.gmra.mxu1 %v9437_v48 }
 0x174   :  { %2973 = vmatpush1.bf16.msra.mxu1 %v7725_v44  ;;  %3004 = vmatprep.mubr.bf16.mxu1 %v9363_v9  ;;  %v7748_v9 = vld [vmem:[%s10963_s4 + $0x22c] ss:$16 sps:$4 sm:$0xff]  }
 0x175   :  { %2974 = vmatprep.subr.bf16.mxu1 %v7730_v45 }
 0x178   :  { %2975 = vmatpush1.bf16.msra.mxu1 %v7728_v50 }
 0x179   :  { %2976 = vmatprep.subr.bf16.mxu1 %v7733_v51 }
 0x17c   :  { %2977 = vmatpush1.bf16.msra.mxu1 %v7731_v53 }
 0x17d   :  { %2978 = vmatprep.subr.bf16.mxu1 %v7736_v55 }
 0x180   :  { %2979 = vmatpush1.bf16.msra.mxu1 %v7734_v56 }
 0x181   :  { %2980 = vmatprep.subr.bf16.mxu1 %v7739_v57 }
 0x184   :  { %2981 = vmatpush1.bf16.msra.mxu1 %v7737_v58 }
 0x185   :  { %2982 = vmatprep.subr.bf16.mxu1 %v7742_v59 }
 0x188   :  { %2983 = vmatpush1.bf16.msra.mxu1 %v7740_v60 }
 0x189   :  { %2984 = vmatprep.subr.bf16.mxu1 %v7748_v9 }
 0x18b   :  { %v1521_v7 = vpop.f32.mrf.mxu0 }
 0x18c   :  { %v1522_v10 = vadd.f32 %v1521_v7, %v1482_v6  ;;  %2985 = vmatpush1.bf16.msra.mxu1 %v7746_v4 }
 0x18d   :  { %v1523_v11 = vpop.f32.mrf.mxu0  ;;  %2986 = vmatprep.subr.bf16.mxu1 %v7754_v5 }
 0x18e   :  { %v1533_v13 = vmax.f32 %v1522_v10, 0.0 }
 0x18f   :  { %v1524_v16 = vpop.f32.mrf.mxu0 }
 0x190   :  { %v9500_v18 = vpack.c.bf16 %v1533_v13, %v1533_v13  ;;  %2987 = vmatpush1.bf16.msra.mxu1 %v7752_v8 }
 0x191   :  { %v1525_v19 = vpop.f32.mrf.mxu0  ;;  %2988 = vmatprep.subr.bf16.mxu1 %v7760_v63 }
 0x192   :  { %6811 = vmatmul.mubr.msk.bf16.vlgmr.msra.gmra.mxu0 %vm2763_vm1, %v9500_v18 }
 0x193   :  { %2932 = vmatpush1.bf16.msra.mxu0 %v7755_v12  ;;  %2963 = vmatprep.mubr.bf16.mxu0 %v9290_v21  ;;  %v7778_v21 = vld [vmem:[%s10963_s4 + $0x38c] ss:$16 sps:$4 sm:$0xff]  }
 0x194   :  { %2989 = vmatpush2.bf16.msra.mxu1 %v7758_v14  ;;  %2933 = vmatprep.subr.bf16.mxu0 %v7763_v15 }
 0x195   :  { %2990 = vmatprep.subr.bf16.mxu1 %v7766_v17 }
 0x197   :  { %2934 = vmatpush1.bf16.msra.mxu0 %v7761_v20 }
 0x198   :  { %2991 = vmatpush2.bf16.msra.mxu1 %v7764_v22  ;;  %2935 = vmatprep.subr.bf16.mxu0 %v7769_v42 }
 0x199   :  { %2992 = vmatprep.subr.bf16.mxu1 %v7772_v24 }
 0x19b   :  { %2936 = vmatpush1.bf16.msra.mxu0 %v7767_v27 }
 0x19c   :  { %2993 = vmatpush2.bf16.msra.mxu1 %v7770_v28  ;;  %2937 = vmatprep.subr.bf16.mxu0 %v7775_v29 }
 0x19d   :  { %2994 = vmatprep.subr.bf16.mxu1 %v7778_v21 }
 0x19e   :  { %22 = vsyncpa [#allocation5], 0  ;;  %v7779_v36 = vld [vmem:[%s10963_s4 + $0x68] ss:$16 sps:$4 sm:$0xff]   ;;  %v7787_v38 = vld [vmem:[%s10963_s4 + $0x4c] ss:$16 sps:$4 sm:$0xff]  }
 0x19f   :  { %2938 = vmatpush1.bf16.msra.mxu0 %v7773_v30  ;;  %v7782_v37 = vld [vmem:[%s10963_s4 + $0x368] ss:$16 sps:$4 sm:$0xff]   ;;  %v7790_v39 = vld [vmem:[%s10963_s4 + $0x34c] ss:$16 sps:$4 sm:$0xff]   ;;  %v7883_v7 = vld [vmem:[%s10965_s6 + $0x70] sm:$0xff]   ;;  %s8415_s17 = smov 96  }
 0x1a0   :  { %2995 = vmatpush2.bf16.msra.mxu1 %v7776_v32  ;;  %2939 = vmatprep.subr.bf16.mxu0 %v7781_v54  ;;  %v7785_v40 = vld [vmem:[%s10963_s4 + $0x48] ss:$16 sps:$4 sm:$0xff]   ;;  %v7793_v43 = vld [vmem:[%s10963_s4 + $0x2c] ss:$16 sps:$4 sm:$0xff]   ;;  %v7884_v10 = vld [vmem:[%s10965_s6 + $0x30] sm:$0xff]   ;;  %s8416_s26 = smov 64  }
 0x1a1   :  { %2996 = vmatprep.subr.bf16.mxu1 %v7784_v34  ;;  %v7788_v41 = vld [vmem:[%s10963_s4 + $0x348] ss:$16 sps:$4 sm:$0xff]   ;;  %v7796_v44 = vld [vmem:[%s10963_s4 + $0x32c] ss:$16 sps:$4 sm:$0xff]   ;;  %v7887_v15 = vld [vmem:[%s10965_s6 + $0x60] sm:$0xff]   ;;  %vm6399_vm2 = vcmask 523264  }
 0x1a2   :  { %v7791_v45 = vld [vmem:[%s10963_s4 + $0x28] ss:$16 sps:$4 sm:$0xff]   ;;  %v7799_v49 = vld [vmem:[%s10963_s4 + $0xc] ss:$16 sps:$4 sm:$0xff]   ;;  %v7891_v24 = vld [vmem:[%s10965_s6 + $0x50] sm:$0xff]   ;;  %vm6401_vm3 = vcmask 785408  }
 0x1a3   :  { %2940 = vmatpush1.bf16.msra.mxu0 %v7779_v36  ;;  %v7794_v46 = vld [vmem:[%s10963_s4 + $0x328] ss:$16 sps:$4 sm:$0xff]   ;;  %v7802_v50 = vld [vmem:[%s10963_s4 + $0x30c] ss:$16 sps:$4 sm:$0xff]   ;;  %v7892_v29 = vld [vmem:[%s10965_s6 + $0x10] sm:$0xff]   ;;  %vm8418_vm4 = vmmov 0  }
 0x1a4   :  { %2997 = vmatpush2.bf16.msra.mxu1 %v7782_v37  ;;  %2941 = vmatprep.subr.bf16.mxu0 %v7787_v38  ;;  %v7797_v51 = vld [vmem:[%s10963_s4 + $0x8] ss:$16 sps:$4 sm:$0xff]   ;;  %v7805_v55 = vld [vmem:[%s10963_s4 + $0x1ec] ss:$16 sps:$4 sm:$0xff]  }
 0x1a5   :  { %2998 = vmatprep.subr.bf16.mxu1 %v7790_v39  ;;  %v7800_v53 = vld [vmem:[%s10963_s4 + $0x308] ss:$16 sps:$4 sm:$0xff]   ;;  %v7808_v56 = vld [vmem:[%s10963_s4 + $0x62c] ss:$16 sps:$4 sm:$0xff]  }
 0x1a6   :  { %v7803_v57 = vld [vmem:[%s10963_s4 + $0x1e8] ss:$16 sps:$4 sm:$0xff]   ;;  %v7811_v59 = vld [vmem:[%s10963_s4 + $0x1cc] ss:$16 sps:$4 sm:$0xff]  }
 0x1a7   :  { %2942 = vmatpush1.bf16.msra.mxu0 %v7785_v40  ;;  %v7806_v58 = vld [vmem:[%s10963_s4 + $0x628] ss:$16 sps:$4 sm:$0xff]   ;;  %v7814_v60 = vld [vmem:[%s10963_s4 + $0x60c] ss:$16 sps:$4 sm:$0xff]   ;;  %v7895_v40 = vld [vmem:[%s10965_s6 + $0x40] sm:$0xff]  }
 0x1a8   :  { %2999 = vmatpush2.bf16.msra.mxu1 %v7788_v41  ;;  %2943 = vmatprep.subr.bf16.mxu0 %v7793_v43  ;;  %v7809_v9 = vld [vmem:[%s10963_s4 + $0x1c8] ss:$16 sps:$4 sm:$0xff]   ;;  %v7817_v1 = vld [vmem:[%s10963_s4 + $0x1ac] ss:$16 sps:$4 sm:$0xff]   ;;  %v7896_v43 = vld [vmem:[%s10965_s6] sm:$0xff]  }
 0x1a9   :  { %3000 = vmatprep.subr.bf16.mxu1 %v7796_v44  ;;  %v7812_v62 = vld [vmem:[%s10963_s4 + $0x608] ss:$16 sps:$4 sm:$0xff]   ;;  %v7820_v4 = vld [vmem:[%s10963_s4 + $0x18c] ss:$16 sps:$4 sm:$0xff]  }
 0x1aa   :  { %v7881_v5 = vld [vmem:[%s10965_s6 + $0x78] sm:$0xff]   ;;  %v7885_v11 = vld [vmem:[%s10965_s6 + $0x68] sm:$0xff]  }
 0x1ab   :  { %2944 = vmatpush1.bf16.msra.mxu0 %v7791_v45  ;;  %v7882_v6 = vld [vmem:[%s10965_s6 + $0x38] sm:$0xff]   ;;  %v7886_v14 = vld [vmem:[%s10965_s6 + $0x28] sm:$0xff]  }
 0x1ac   :  { %3001 = vmatpush2.bf16.msra.mxu1 %v7794_v46  ;;  %2945 = vmatprep.subr.bf16.mxu0 %v7799_v49  ;;  %v7818_v8 = vld [vmem:[%s10963_s4 + $0x188] ss:$16 sps:$4 sm:$0xff]   ;;  %v7823_v63 = vld [vmem:[%s10963_s4 + $0x16c] ss:$16 sps:$4 sm:$0xff]  }
 0x1ad   :  { %3002 = vmatprep.subr.bf16.mxu1 %v7802_v50  ;;  %v7821_v12 = vld [vmem:[%s10963_s4 + $0x168] ss:$16 sps:$4 sm:$0xff]   ;;  %v7826_v13 = vld [vmem:[%s10963_s4 + $0x14c] ss:$16 sps:$4 sm:$0xff]  }
 0x1ae   :  { %v7824_v16 = vld [vmem:[%s10963_s4 + $0x148] ss:$16 sps:$4 sm:$0xff]   ;;  %v7829_v17 = vld [vmem:[%s10963_s4 + $0x12c] ss:$16 sps:$4 sm:$0xff]  }
 0x1af   :  { %2946 = vmatpush1.bf16.msra.mxu0 %v7797_v51  ;;  %v7889_v19 = vld [vmem:[%s10965_s6 + $0x58] sm:$0xff]   ;;  %v7893_v37 = vld [vmem:[%s10965_s6 + $0x48] sm:$0xff]  }
 0x1b0   :  { %3003 = vmatpush2.bf16.msra.mxu1 %v7800_v53  ;;  %2947 = vmatprep.subr.bf16.mxu0 %v7805_v55  ;;  %v7827_v20 = vld [vmem:[%s10963_s4 + $0x128] ss:$16 sps:$4 sm:$0xff]   ;;  %v7832_v22 = vld [vmem:[%s10963_s4 + $0x10c] ss:$16 sps:$4 sm:$0xff]  }
 0x1b1   :  { %3066 = vmatprep.subr.bf16.mxu1 %v7808_v56  ;;  %v7890_v42 = vld [vmem:[%s10965_s6 + $0x18] sm:$0xff]   ;;  %v9745_v56 = vld [vmem:[%s10964_s5] sm:$0xf] }
 0x1b2   :  { %v7830_v27 = vld [vmem:[%s10963_s4 + $0x108] ss:$16 sps:$4 sm:$0xff]   ;;  %v7835_v28 = vld [vmem:[%s10963_s4 + $0x4ec] ss:$16 sps:$4 sm:$0xff]  }
 0x1b3   :  { %2948 = vmatpush2.bf16.msra.mxu0 %v7803_v57  ;;  %3005 = vmatmul.mubr.bf16.vlgmr.msra.gmra.mxu1 %v9371_v2  ;;  %v7815_v2 = vld [vmem:[%s10963_s4 + $0x1a8] ss:$16 sps:$4 sm:$0xff]   ;;  %v7838_v32 = vld [vmem:[%s10963_s4 + $0x4cc] ss:$16 sps:$4 sm:$0xff]  }
 0x1b4   :  { %3067 = vmatpush1.bf16.msra.mxu1 %v7806_v58  ;;  %2949 = vmatprep.subr.bf16.mxu0 %v7811_v59  ;;  %v7833_v30 = vld [vmem:[%s10963_s4 + $0x4e8] ss:$16 sps:$4 sm:$0xff]   ;;  %v7841_v38 = vld [vmem:[%s10963_s4 + $0x4ac] ss:$16 sps:$4 sm:$0xff]   ;;  %v1746_v59 = vrot.slane %v9745_v56, %v9263_v0 }
 0x1b5   :  { %3068 = vmatprep.subr.bf16.mxu1 %v7814_v60  ;;  %3086 = vmatprep.mubr.bf16.mxu1 %v8414_v52  ;;  %v7836_v36 = vld [vmem:[%s10963_s4 + $0x4c8] ss:$16 sps:$4 sm:$0xff]   ;;  %v7844_v41 = vld [vmem:[%s10963_s4 + $0x48c] ss:$16 sps:$4 sm:$0xff]  }
 0x1b6   :  { %v7842_v44 = vld [vmem:[%s10963_s4 + $0x488] ss:$16 sps:$4 sm:$0xff]   ;;  %v7847_v45 = vld [vmem:[%s10963_s4 + $0x46c] ss:$16 sps:$4 sm:$0xff]  }
 0x1b7   :  { %2950 = vmatpush2.bf16.msra.mxu0 %v7809_v9  ;;  %v7845_v46 = vld [vmem:[%s10963_s4 + $0x468] ss:$16 sps:$4 sm:$0xff]   ;;  %v7850_v49 = vld [vmem:[%s10963_s4 + $0x44c] ss:$16 sps:$4 sm:$0xff]   ;;  %v1750_v9 = vrot.slane %v9745_v56, %v9272_v3 }
 0x1b8   :  { %3069 = vmatpush1.bf16.msra.mxu1 %v7812_v62  ;;  %2951 = vmatprep.subr.bf16.mxu0 %v7817_v1  ;;  %v7848_v50 = vld [vmem:[%s10963_s4 + $0x448] ss:$16 sps:$4 sm:$0xff]   ;;  %v7853_v51 = vld [vmem:[%s10963_s4 + $0x42c] ss:$16 sps:$4 sm:$0xff]  }
 0x1b9   :  { %7203 = vmatprep.subr.bf16.mxu1 %v7881_v5  ;;  %v7851_v53 = vld [vmem:[%s10963_s4 + $0x428] ss:$16 sps:$4 sm:$0xff]   ;;  %v7856_v55 = vld [vmem:[%s10963_s4 + $0x40c] ss:$16 sps:$4 sm:$0xff]  }
 0x1ba   :  { %v7854_v57 = vld [vmem:[%s10963_s4 + $0x408] ss:$16 sps:$4 sm:$0xff]   ;;  %v7859_v58 = vld [vmem:[%s10963_s4 + $0x5ec] ss:$16 sps:$4 sm:$0xff]  }
 0x1bb   :  { %2952 = vmatpush2.bf16.msra.mxu0 %v7815_v2  ;;  %6812 = vmatmul.mubr.msk.bf16.vlgmr.msra.gmra.mxu1 %vm2763_vm1, %v9500_v18  ;;  %v7888_v18 = vld [vmem:[%s10965_s6 + $0x20] sm:$0xff]   ;;  %v7857_v60 = vld [vmem:[%s10963_s4 + $0x5e8] ss:$16 sps:$4 sm:$0xff]   ;;  %v7862_v62 = vld [vmem:[%s10963_s4 + $0x5cc] ss:$16 sps:$4 sm:$0xff]  }
 0x1bc   :  { %2953 = vmatprep.subr.bf16.mxu0 %v7820_v4  ;;  %7204 = vmatpush3.bf16.msra.mxu1 %v7882_v6  ;;  %v7860_v4 = vld [vmem:[%s10963_s4 + $0x5c8] ss:$16 sps:$4 sm:$0xff]   ;;  %v8335_v61 = vld [vmem:[%s10971_s12 + $0xb0] ss:$12 sps:$4 sm:$0xff]  }
 0x1bd   :  { %7205 = vmatprep.subr.bf16.mxu1 %v7883_v7  ;;  %v7865_v7 = vld [vmem:[%s10963_s4 + $0x5ac] ss:$16 sps:$4 sm:$0xff]  }
 0x1bf   :  { %2954 = vmatpush2.bf16.msra.mxu0 %v7818_v8 }
 0x1c0   :  { %2955 = vmatprep.subr.bf16.mxu0 %v7823_v63  ;;  %7206 = vmatpush3.bf16.msra.mxu1 %v7884_v10 }
 0x1c1   :  { %7207 = vmatprep.subr.bf16.mxu1 %v7885_v11  ;;  %v7863_v11 = vld [vmem:[%s10963_s4 + $0x5a8] ss:$16 sps:$4 sm:$0xff]  }
 0x1c3   :  { %2956 = vmatpush2.bf16.msra.mxu0 %v7821_v12  ;;  %v7868_v12 = vld [vmem:[%s10963_s4 + $0x58c] ss:$16 sps:$4 sm:$0xff]  }
 0x1c4   :  { %2957 = vmatprep.subr.bf16.mxu0 %v7826_v13  ;;  %7208 = vmatpush3.bf16.msra.mxu1 %v7886_v14  ;;  %v7866_v14 = vld [vmem:[%s10963_s4 + $0x588] ss:$16 sps:$4 sm:$0xff]  }
 0x1c5   :  { %7209 = vmatprep.subr.bf16.mxu1 %v7887_v15  ;;  %v7871_v15 = vld [vmem:[%s10963_s4 + $0x56c] ss:$16 sps:$4 sm:$0xff]  }
 0x1c7   :  { %2958 = vmatpush2.bf16.msra.mxu0 %v7824_v16  ;;  %v7869_v16 = vld [vmem:[%s10963_s4 + $0x568] ss:$16 sps:$4 sm:$0xff]  }
 0x1c8   :  { %2959 = vmatprep.subr.bf16.mxu0 %v7829_v17  ;;  %7210 = vmatpush3.bf16.msra.mxu1 %v7888_v18  ;;  %v7874_v17 = vld [vmem:[%s10963_s4 + $0x54c] ss:$16 sps:$4 sm:$0xff]   ;;  %v7872_v18 = vld [vmem:[%s10963_s4 + $0x548] ss:$16 sps:$4 sm:$0xff]  }
 0x1c9   :  { %7211 = vmatprep.subr.bf16.mxu1 %v7889_v19  ;;  %v7877_v19 = vld [vmem:[%s10963_s4 + $0x52c] ss:$16 sps:$4 sm:$0xff]  }
 0x1cb   :  { %2960 = vmatpush2.bf16.msra.mxu0 %v7827_v20  ;;  %v7875_v20 = vld [vmem:[%s10963_s4 + $0x528] ss:$16 sps:$4 sm:$0xff]  }
 0x1cc   :  { %2961 = vmatprep.subr.bf16.mxu0 %v7832_v22  ;;  %7212 = vmatpush3.bf16.msra.mxu1 %v7890_v42  ;;  %v7880_v22 = vld [vmem:[%s10963_s4 + $0x50c] ss:$16 sps:$4 sm:$0xff]   ;;  %v7878_v42 = vld [vmem:[%s10963_s4 + $0x508] ss:$16 sps:$4 sm:$0xff]  }
 0x1cd   :  { %7213 = vmatprep.subr.bf16.mxu1 %v7891_v24  ;;  %v7897_v24 = vld [vmem:[%s10965_s6 + $0xb8] sm:$0xff]  }
 0x1cf   :  { %2962 = vmatpush2.bf16.msra.mxu0 %v7830_v27  ;;  %v2801_v21 = vpop.f32.mrf.mxu1  ;;  %v7898_v27 = vld [vmem:[%s10965_s6 + $0xb0] sm:$0xff]  }
 0x1d0   :  { %3013 = vmatprep.subr.bf16.mxu0 %v7835_v28  ;;  %7214 = vmatpush3.bf16.msra.mxu1 %v7892_v29  ;;  %v2802_v1 = vadd.f32 %v2801_v21, %v1746_v59  ;;  %v7899_v28 = vld [vmem:[%s10965_s6 + $0xa8] sm:$0xff]   ;;  %v7901_v29 = vld [vmem:[%s10965_s6 + $0x98] sm:$0xff]   ;;  %v7902_v21 = vld [vmem:[%s10965_s6 + $0x90] sm:$0xff]  }
 0x1d1   :  { %v2803_v54 = vpop.f32.mrf.mxu1  ;;  %7215 = vmatprep.subr.bf16.mxu1 %v7893_v37  ;;  %v7903_v37 = vld [vmem:[%s10965_s6 + $0x88] sm:$0xff]  }
 0x1d2   :  { %2964 = vmatmul.mubr.bf16.vlgmr.msra.gmra.mxu0 %v9295_v23  ;;  %v7894_v23 = vld [vmem:[%s10965_s6 + $0x8] sm:$0xff]   ;;  %v2804_v5 = vadd.f32 %v2803_v54, %v1750_v9 }
 0x1d3   :  { %3014 = vmatpush1.bf16.msra.mxu0 %v7833_v30  ;;  %3045 = vmatprep.mubr.bf16.mxu0 %v9435_v47  ;;  %v2805_v34 = vpop.f32.mrf.mxu1  ;;  %v7839_v47 = vld [vmem:[%s10963_s4 + $0x4a8] ss:$16 sps:$4 sm:$0xff]  }
 0x1d4   :  { %3015 = vmatprep.subr.bf16.mxu0 %v7838_v32  ;;  %7216 = vmatpush3.bf16.msra.mxu1 %v7894_v23 }
 0x1d5   :  { %v2806_v39 = vpop.f32.mrf.mxu1  ;;  %7217 = vmatprep.subr.bf16.mxu1 %v7895_v40 }
 0x1d7   :  { %3016 = vmatpush1.bf16.msra.mxu0 %v7836_v36 }
 0x1d8   :  { %3017 = vmatprep.subr.bf16.mxu0 %v7841_v38  ;;  %7218 = vmatpush3.bf16.msra.mxu1 %v7896_v43 }
 0x1db   :  { %3018 = vmatpush1.bf16.msra.mxu0 %v7839_v47 }
 0x1dc   :  { %3019 = vmatprep.subr.bf16.mxu0 %v7844_v41  ;;  %v7904_v41 = vld [vmem:[%s10965_s6 + $0x80] sm:$0xff]  }
 0x1df   :  { %3020 = vmatpush1.bf16.msra.mxu0 %v7842_v44 }
 0x1e0   :  { %3021 = vmatprep.subr.bf16.mxu0 %v7847_v45 }
 0x1e3   :  { %3022 = vmatpush1.bf16.msra.mxu0 %v7845_v46 }
 0x1e4   :  { %3023 = vmatprep.subr.bf16.mxu0 %v7850_v49 }
 0x1e7   :  { %3024 = vmatpush1.bf16.msra.mxu0 %v7848_v50  ;;  %v7905_v50 = vld [vmem:[%s10965_s6 + $0xc0] sm:$0xff]  }
 0x1e8   :  { %3025 = vmatprep.subr.bf16.mxu0 %v7853_v51 }
 0x1eb   :  { %3026 = vmatpush1.bf16.msra.mxu0 %v7851_v53 }
 0x1ec   :  { %3027 = vmatprep.subr.bf16.mxu0 %v7856_v55 }
 0x1ef   :  { %3028 = vmatpush1.bf16.msra.mxu0 %v7854_v57 }
 0x1f0   :  { %3029 = vmatprep.subr.bf16.mxu0 %v7859_v58 }
 0x1f3   :  { %3030 = vmatpush2.bf16.msra.mxu0 %v7857_v60 }
 0x1f4   :  { %v2842_v2 = vpop.f32.mrf.mxu0  ;;  %3031 = vmatprep.subr.bf16.mxu0 %v7862_v62 }
 0x1f5   :  { %v2843_v6 = vadd.f32 %v2842_v2, %v2802_v1 }
 0x1f6   :  { %v2844_v8 = vpop.f32.mrf.mxu0 }
 0x1f7   :  { %v2845_v63 = vadd.f32 %v2844_v8, %v2804_v5  ;;  %3032 = vmatpush2.bf16.msra.mxu0 %v7860_v4 }
 0x1f8   :  { %v2846_v10 = vpop.f32.mrf.mxu0  ;;  %3033 = vmatprep.subr.bf16.mxu0 %v7865_v7  ;;  %v1758_v7 = vrot.slane %v9745_v56, %v9336_v35 }
 0x1fa   :  { %v2847_v13 = vpop.f32.mrf.mxu0 }
 0x1fb   :  { %3034 = vmatpush2.bf16.msra.mxu0 %v7863_v11 }
 0x1fc   :  { %3035 = vmatprep.subr.bf16.mxu0 %v7868_v12 }
 0x1ff   :  { %3036 = vmatpush2.bf16.msra.mxu0 %v7866_v14 }
 0x200   :  { %3037 = vmatprep.subr.bf16.mxu0 %v7871_v15 }
 0x203   :  { %3038 = vmatpush2.bf16.msra.mxu0 %v7869_v16 }
 0x204   :  { %3039 = vmatprep.subr.bf16.mxu0 %v7874_v17 }
 0x207   :  { %3040 = vmatpush2.bf16.msra.mxu0 %v7872_v18 }
 0x208   :  { %3041 = vmatprep.subr.bf16.mxu0 %v7877_v19 }
 0x20b   :  { %3042 = vmatpush2.bf16.msra.mxu0 %v7875_v20 }
 0x20c   :  { %3043 = vmatprep.subr.bf16.mxu0 %v7880_v22 }
 0x20f   :  { %3044 = vmatpush2.bf16.msra.mxu0 %v7878_v42 }
 0x210   :  { %3353 = vmatprep.subr.bf16.mxu0 %v8414_v52 }
 0x212   :  { %3046 = vmatmul.mubr.bf16.vlgmr.msra.gmra.mxu0 %v9437_v48  ;;  %v7900_v48 = vld [vmem:[%s10965_s6 + $0xa0] sm:$0xff]  }
 0x213   :  { %3354 = vmatpush1.bf16.msra.mxu0 %v7897_v24 }
 0x214   :  { %3355 = vmatprep.subr.bf16.mxu0 %v8414_v52 }
 0x217   :  { %3356 = vmatpush1.bf16.msra.mxu0 %v7898_v27 }
 0x218   :  { %3357 = vmatprep.subr.bf16.mxu0 %v8414_v52 }
 0x21b   :  { %3358 = vmatpush1.bf16.msra.mxu0 %v7899_v28 }
 0x21c   :  { %3359 = vmatprep.subr.bf16.mxu0 %v8414_v52 }
 0x21f   :  { %3360 = vmatpush1.bf16.msra.mxu0 %v7900_v48 }
 0x220   :  { %3361 = vmatprep.subr.bf16.mxu0 %v8414_v52 }
 0x223   :  { %3362 = vmatpush1.bf16.msra.mxu0 %v7901_v29 }
 0x224   :  { %3363 = vmatprep.subr.bf16.mxu0 %v8414_v52 }
 0x227   :  { %3364 = vmatpush1.bf16.msra.mxu0 %v7902_v21  ;;  %v7906_v21 = vld [vmem:[%s10967_s8 + $0x20] ss:$16 sps:$4 sm:$0xff]  }
 0x228   :  { %3365 = vmatprep.subr.bf16.mxu0 %v8414_v52 }
 0x22b   :  { %3366 = vmatpush1.bf16.msra.mxu0 %v7903_v37 }
 0x22c   :  { %3367 = vmatprep.subr.bf16.mxu0 %v8414_v52 }
 0x22f   :  { %3368 = vmatpush1.bf16.msra.mxu0 %v7904_v41  ;;  %v7909_v41 = vld [vmem:[%s10967_s8] ss:$16 sps:$4 sm:$0xff]  }
 0x230   :  { %3383 = vmatprep.subr.bf16.mxu0 %v8414_v52 }
 0x233   :  { %v2883_v30 = vpop.f32.mrf.mxu1  ;;  %3384 = vmatpush2.bf16.msra.mxu0 %v7905_v50 }
 0x234   :  { %v2884_v36 = vadd.f32 %v2883_v30, %v2843_v6  ;;  %v1754_v6 = vrot.slane %v9745_v56, %v9327_v33  ;;  %v7908_v30 = vld [vmem:[%s10967_s8 + $0x24] ss:$16 sps:$4 sm:$0xff]  }
 0x235   :  { %v2885_v32 = vpop.f32.mrf.mxu1  ;;  %3489 = vmatprep.subr.bf16.mxu1 %v7908_v30  ;;  %v7957_v30 = vld [vmem:[%s10969_s10 + $0x2a0] ss:$28 sps:$4 sm:$0xff]  }
 0x236   :  { %v2886_v23 = vadd.f32 %v2885_v32, %v2845_v63  ;;  %v6813_v32 = vld [vmem:[%s10966_s7] ss:$0 sm:$0xff] }
 0x237   :  { %v2887_v54 = vpop.f32.mrf.mxu1 }
 0x239   :  { %v2888_v34 = vpop.f32.mrf.mxu1 }
 0x252   :  { %v2924_v38 = vpop.f32.mrf.mxu0 }
 0x253   :  { %v2925_v39 = vadd.f32 %v2924_v38, %v2884_v36 }
 0x254   :  { %v2926_v47 = vpop.f32.mrf.mxu0 }
 0x255   :  { %v2927_v40 = vadd.f32 %v2926_v47, %v2886_v23  ;;  %v3095_v43 = vmax.f32 %v2925_v39, 0.0 }
 0x256   :  { %v2928_v44 = vpop.f32.mrf.mxu0 }
 0x257   :  { %v3096_v45 = vmax.f32 %v2927_v40, 0.0  ;;  %v3099_v51 = vpack.c.bf16 %v3095_v43, %v3095_v43  ;;  %v7911_v40 = vld [vmem:[%s10967_s8 + $0x4] ss:$16 sps:$4 sm:$0xff]   ;;  %v7914_v43 = vld [vmem:[%s10967_s8 + $0x2c] ss:$16 sps:$4 sm:$0xff]  }
 0x258   :  { %v2929_v46 = vpop.f32.mrf.mxu0 }
 0x259   :  { %v3100_v49 = vpack.c.bf16 %v3096_v45, %v3096_v45  ;;  %v3393_v45 = vld [vmem:[%s10960_s1] sm:$0xff] }
 0x25a   :  { %v7948_v46 = vld [vmem:[%s10969_s10 + $0x508] ss:$28 sps:$4 sm:$0xff]  }
 0x25b   :  { %3345 = vmatprep.mubr.bf16.mxu1 %v3100_v49  ;;  %v7950_v49 = vld [vmem:[%s10969_s10 + $0x50c] ss:$28 sps:$4 sm:$0xff]  }
 0x25c   :  { %3346 = vmatmul.mubr.bf16.vlgmr.msra.gmra.mxu1 %v3099_v51  ;;  %v7956_v51 = vld [vmem:[%s10969_s10 + $0x4d4] ss:$28 sps:$4 sm:$0xff]   ;;  %4748 = vmatprep.subr.bf16.mxu0 %v7950_v49  ;;  %v7987_v49 = vld [vmem:[%s10969_s10 + $0x380] ss:$28 sps:$4 sm:$0xff]  }
 0x25d   :  { %3509 = vmatprep.mubr.bf16.mxu1 %v8414_v52  ;;  %3490 = vmatpush1.bf16.msra.mxu1 %v7906_v21  ;;  %v7959_v21 = vld [vmem:[%s10969_s10 + $0x2a4] ss:$28 sps:$4 sm:$0xff]  }
 0x25e   :  { %3491 = vmatprep.subr.bf16.mxu1 %v7911_v40  ;;  %v7983_v40 = vld [vmem:[%s10969_s10 + $0x1c4] ss:$28 sps:$4 sm:$0xff]  }
 0x261   :  { %3492 = vmatpush1.bf16.msra.mxu1 %v7909_v41  ;;  %v7986_v41 = vld [vmem:[%s10969_s10 + $0x3bc] ss:$28 sps:$4 sm:$0xff]  }
 0x262   :  { %3530 = vmatprep.subr.bf16.mxu1 %v7914_v43  ;;  %v7981_v43 = vld [vmem:[%s10969_s10 + $0x1c0] ss:$28 sps:$4 sm:$0xff]  }
 0x273   :  { %v3006_v53 = vpop.f32.mrf.mxu1 }
 0x275   :  { %v3008_v55 = vpop.f32.mrf.mxu1 }
 0x277   :  { %v3010_v57 = vpop.f32.mrf.mxu1 }
 0x279   :  { %v3011_v58 = vpop.f32.mrf.mxu1 }
 0x27a   :  { %v7962_v58 = vld [vmem:[%s10969_s10 + $0x49c] ss:$28 sps:$4 sm:$0xff]  }
 0x27b   :  { %v3088_v59 = vpop.f32.mrf.mxu1 }
 0x27d   :  { %v3090_v60 = vpop.f32.mrf.mxu1 }
 0x27f   :  { %v3092_v9 = vpop.f32.mrf.mxu1 }
 0x280   :  { %v7917_v9 = vld [vmem:[%s10967_s8 + $0xc] ss:$16 sps:$4 sm:$0xff]  }
 0x281   :  { %v3093_v62 = vpop.f32.mrf.mxu1 }
 0x282   :  { %v7960_v62 = vld [vmem:[%s10969_s10 + $0x498] ss:$28 sps:$4 sm:$0xff]  }
 0x292   :  { %v2965_v1 = vpop.f32.mrf.mxu0 }
 0x293   :  { %v2966_v8 = vadd.f32 %v2965_v1, %v1754_v6  ;;  %v7968_v1 = vld [vmem:[%s10969_s10 + $0x464] ss:$28 sps:$4 sm:$0xff]   ;;  %v7974_v6 = vld [vmem:[%s10969_s10 + $0x42c] ss:$28 sps:$4 sm:$0xff]  }
 0x294   :  { %v2967_v2 = vpop.f32.mrf.mxu0 }
 0x295   :  { %v2968_v63 = vadd.f32 %v2967_v2, %v1758_v7  ;;  %v3007_v10 = vadd.f32 %v3006_v53, %v2966_v8  ;;  %v7915_v2 = vld [vmem:[%s10967_s8 + $0x8] ss:$16 sps:$4 sm:$0xff]   ;;  %v7923_v8 = vld [vmem:[%s10969_s10 + $0x154] ss:$28 sps:$4 sm:$0xff]  }
 0x296   :  { %v2969_v4 = vpop.f32.mrf.mxu0  ;;  %v7918_v7 = vld [vmem:[%s10969_s10 + $0x188] ss:$28 sps:$4 sm:$0xff]  }
 0x297   :  { %v3009_v13 = vadd.f32 %v3008_v55, %v2968_v63  ;;  %v7954_v55 = vld [vmem:[%s10969_s10 + $0x4d0] ss:$28 sps:$4 sm:$0xff]   ;;  %v7972_v63 = vld [vmem:[%s10969_s10 + $0x428] ss:$28 sps:$4 sm:$0xff]  }
 0x298   :  { %v2970_v5 = vpop.f32.mrf.mxu0  ;;  %v7920_v4 = vld [vmem:[%s10969_s10 + $0x18c] ss:$28 sps:$4 sm:$0xff]  }
 0x299   :  { %v7966_v5 = vld [vmem:[%s10969_s10 + $0x460] ss:$28 sps:$4 sm:$0xff]  }
 0x2d2   :  { %v3047_v11 = vpop.f32.mrf.mxu0 }
 0x2d3   :  { %v3048_v12 = vadd.f32 %v3047_v11, %v3007_v10  ;;  %v7921_v10 = vld [vmem:[%s10969_s10 + $0x150] ss:$28 sps:$4 sm:$0xff]   ;;  %v7926_v11 = vld [vmem:[%s10969_s10 + $0x11c] ss:$28 sps:$4 sm:$0xff]  }
 0x2d4   :  { %v3049_v14 = vpop.f32.mrf.mxu0 }
 0x2d5   :  { %v3089_v15 = vadd.f32 %v3088_v59, %v3048_v12  ;;  %v3050_v16 = vadd.f32 %v3049_v14, %v3009_v13  ;;  %v7912_v59 = vld [vmem:[%s10967_s8 + $0x28] ss:$16 sps:$4 sm:$0xff]   ;;  %v7929_v13 = vld [vmem:[%s10969_s10 + $0xe4] ss:$28 sps:$4 sm:$0xff]  }
 0x2d6   :  { %v3051_v17 = vpop.f32.mrf.mxu0  ;;  %v7924_v12 = vld [vmem:[%s10969_s10 + $0x118] ss:$28 sps:$4 sm:$0xff]   ;;  %v7927_v14 = vld [vmem:[%s10969_s10 + $0xe0] ss:$28 sps:$4 sm:$0xff]  }
 0x2d7   :  { %v3091_v18 = vadd.f32 %v3090_v60, %v3050_v16  ;;  %v3097_v19 = vmax.f32 %v3089_v15, 0.0  ;;  %v7932_v15 = vld [vmem:[%s10969_s10 + $0xac] ss:$28 sps:$4 sm:$0xff]   ;;  %v7935_v17 = vld [vmem:[%s10969_s10 + $0x74] ss:$28 sps:$4 sm:$0xff]  }
 0x2d8   :  { %v3052_v20 = vpop.f32.mrf.mxu0  ;;  %v7930_v16 = vld [vmem:[%s10969_s10 + $0xa8] ss:$28 sps:$4 sm:$0xff]  }
 0x2d9   :  { %v3098_v22 = vmax.f32 %v3091_v18, 0.0  ;;  %v3101_v24 = vpack.c.bf16 %v3097_v19, %v3097_v19  ;;  %v7933_v18 = vld [vmem:[%s10969_s10 + $0x70] ss:$28 sps:$4 sm:$0xff]   ;;  %v7938_v19 = vld [vmem:[%s10969_s10 + $0x3c] ss:$28 sps:$4 sm:$0xff]  }
 0x2da   :  { %v7936_v20 = vld [vmem:[%s10969_s10 + $0x38] ss:$28 sps:$4 sm:$0xff]  }
 0x2db   :  { %v3102_v42 = vpack.c.bf16 %v3098_v22, %v3098_v22  ;;  %v7941_v22 = vld [vmem:[%s10969_s10 + $0x4] ss:$28 sps:$4 sm:$0xff]  }
 0x2dd   :  { %6839 = vmatprep.mubr.msk.bf16.mxu0 %vm1197_vm0, %v3102_v42  ;;  %v7939_v42 = vld [vmem:[%s10969_s10] ss:$28 sps:$4 sm:$0xff]  }
 0x2de   :  { %3386 = vmatmul.mubr.bf16.vlgmr.msra.gmra.mxu0 %v3101_v24  ;;  %v7944_v24 = vld [vmem:[%s10969_s10 + $0x34c] ss:$28 sps:$4 sm:$0xff]  }
 0x2df   :  { %4749 = vmatpush1.bf16.msra.mxu0 %v7948_v46  ;;  %v7992_v46 = vld [vmem:[%s10969_s10 + $0x514] ss:$28 sps:$4 sm:$0xff]  }
 0x2e0   :  { %4750 = vmatprep.subr.bf16.mxu0 %v7956_v51  ;;  %v7993_v51 = vld [vmem:[%s10969_s10 + $0x540] ss:$28 sps:$4 sm:$0xff]  }
 0x2e3   :  { %4751 = vmatpush1.bf16.msra.mxu0 %v7954_v55 }
 0x2e4   :  { %4752 = vmatprep.subr.bf16.mxu0 %v7962_v58 }
 0x2e7   :  { %4753 = vmatpush1.bf16.msra.mxu0 %v7960_v62 }
 0x2e8   :  { %4754 = vmatprep.subr.bf16.mxu0 %v7968_v1 }
 0x2eb   :  { %4755 = vmatpush1.bf16.msra.mxu0 %v7966_v5 }
 0x2ec   :  { %4756 = vmatprep.subr.bf16.mxu0 %v7974_v6 }
 0x2ef   :  { %4757 = vmatpush1.bf16.msra.mxu0 %v7972_v63 }
 0x31c   :  { %v7219_v56 = vpop.f32.mrf.mxu1 }
 0x31e   :  { %v7220_v27 = vpop.f32.mrf.mxu1 }
 0x31f   :  { %v7221_v28 = vadd.f32 %v7220_v27, %v7219_v56  ;;  %v7942_v56 = vld [vmem:[%s10969_s10 + $0x348] ss:$28 sps:$4 sm:$0xff]   ;;  %v7947_v27 = vld [vmem:[%s10969_s10 + $0x314] ss:$28 sps:$4 sm:$0xff]  }
 0x320   :  { %v7222_v48 = vpop.f32.mrf.mxu1 }
 0x321   :  { %v3348_v54 = vadd.f32 %v7221_v28, %v6813_v32  ;;  %v7945_v28 = vld [vmem:[%s10969_s10 + $0x310] ss:$28 sps:$4 sm:$0xff]   ;;  %v7953_v48 = vld [vmem:[%s10969_s10 + $0x2dc] ss:$28 sps:$4 sm:$0xff]  }
 0x322   :  { %v7223_v29 = vpop.f32.mrf.mxu1  ;;  %v7965_v32 = vld [vmem:[%s10969_s10 + $0x26c] ss:$28 sps:$4 sm:$0xff]  }
 0x323   :  { %v7951_v29 = vld [vmem:[%s10969_s10 + $0x2d8] ss:$28 sps:$4 sm:$0xff]  }
 0x39e   :  { %v3387_v34 = vpop.f32.mrf.mxu0 }
 0x39f   :  { %v9854_v36 = vadd.f32 %v3387_v34, %v3348_v54  ;;  %v7963_v54 = vld [vmem:[%s10969_s10 + $0x268] ss:$28 sps:$4 sm:$0xff]   ;;  %v7971_v34 = vld [vmem:[%s10969_s10 + $0x234] ss:$28 sps:$4 sm:$0xff]  }
 0x3a0   :  { %v3389_v37 = vpop.f32.mrf.mxu0 }
 0x3a1   :  { %v3394_v38 = vmul.f32 0.5, %v9854_v36  ;;  %v7969_v37 = vld [vmem:[%s10969_s10 + $0x230] ss:$28 sps:$4 sm:$0xff]  }
 0x3a2   :  { %v3390_v23 = vpop.f32.mrf.mxu0 }
 0x3a3   :  { %v3395_v39 = vmul.f32 1.442695, %v3394_v38  ;;  %v7977_v38 = vld [vmem:[%s10969_s10 + $0x1fc] ss:$28 sps:$4 sm:$0xff]   ;;  %v7980_v23 = vld [vmem:[%s10969_s10 + $0x3f4] ss:$28 sps:$4 sm:$0xff]  }
 0x3a4   :  { %v3391_v47 = vpop.f32.mrf.mxu0  ;;  %4758 = vmatprep.subr.bf16.mxu0 %v7980_v23  ;;  %v8019_v23 = vld [vmem:[%s10969_s10 + $0xec] ss:$28 sps:$4 sm:$0xff]  }
 0x3a5   :  { %8368 = vpow2.f32 %v3395_v39  ;;  %v7975_v39 = vld [vmem:[%s10969_s10 + $0x1f8] ss:$28 sps:$4 sm:$0xff]   ;;  %v7978_v47 = vld [vmem:[%s10969_s10 + $0x3f0] ss:$28 sps:$4 sm:$0xff]  }
 0x3a6   :  { %4759 = vmatpush1.bf16.msra.mxu0 %v7978_v47  ;;  %v8017_v47 = vld [vmem:[%s10969_s10 + $0xe8] ss:$28 sps:$4 sm:$0xff]  }
 0x3a7   :  { %4760 = vmatprep.subr.bf16.mxu0 %v7986_v41  ;;  %v8025_v41 = vld [vmem:[%s10969_s10 + $0xb4] ss:$28 sps:$4 sm:$0xff]  }
 0x3b2   :  { %v8369_v44 = vpop.eup %8368 }
 0x3b3   :  { %3398 = vrot.lane.b32.xlu0 %v8369_v44, %s8415_s17  ;;  %v7984_v44 = vld [vmem:[%s10969_s10 + $0x3b8] ss:$28 sps:$4 sm:$0xff]  }
 0x3b4   :  { %4761 = vmatpush1.bf16.msra.mxu0 %v7984_v44  ;;  %v8023_v44 = vld [vmem:[%s10969_s10 + $0xb0] ss:$28 sps:$4 sm:$0xff]  }
 0x425   :  { %v3399_v50 = vpop.permute.xlu0 %3398 }
 0x426   :  { %v3401_v53 = vmul.f32 %v3399_v50, %v3393_v45  ;;  %v7989_v45 = vld [vmem:[%s10969_s10 + $0x384] ss:$28 sps:$4 sm:$0xff]  }
 0x427   :  { %4762 = vmatprep.subr.bf16.mxu0 %v7989_v45  ;;  %v7995_v50 = vld [vmem:[%s10969_s10 + $0x544] ss:$28 sps:$4 sm:$0xff]  }
 0x428   :  { %v3402_v57 = vadd.f32 %v3401_v53, %v9854_v36  ;;  %4763 = vmatpush1.bf16.msra.mxu0 %v7987_v49  ;;  %v8001_v53 = vld [vmem:[%s10969_s10 + $0x194] ss:$28 sps:$4 sm:$0xff]   ;;  %v8026_v45 = vld [vmem:[%s10969_s10 + $0x3c0] ss:$28 sps:$4 sm:$0xff]   ;;  %v8034_v49 = vld [vmem:[%s10969_s10 + $0x38c] ss:$28 sps:$4 sm:$0xff]  }
 0x429   :  { %4778 = vmatprep.subr.bf16.mxu0 %v7995_v50  ;;  %v8029_v50 = vld [vmem:[%s10969_s10 + $0x78] ss:$28 sps:$4 sm:$0xff]  }
 0x42a   :  { %v3403_v60 = vpack.c.bf16 %v3402_v57, %v3402_v57  ;;  %6396 = vrot.lane.b32.xlu0 %v3402_v57, %s8416_s26 }
 0x42c   :  { %6848 = vmatmul.mubr.msk.bf16.vlgmr.msra.gmra.mxu1 %vm2763_vm1, %v3403_v60  ;;  %4779 = vmatpush2.bf16.msra.mxu0 %v7993_v51  ;;  %v8032_v51 = vld [vmem:[%s10969_s10 + $0x388] ss:$28 sps:$4 sm:$0xff]  }
 0x42d   :  { %3531 = vmatpush1.bf16.msra.mxu1 %v7912_v59  ;;  %3550 = vmatprep.mubr.bf16.mxu1 %v8414_v52  ;;  %v3412_v59 = vld [vmem:[%s10968_s9] sm:$0xf] }
 0x42e   :  { %3532 = vmatprep.subr.bf16.mxu1 %v7917_v9  ;;  %4789 = vmatprep.subr.bf16.mxu0 %v8001_v53  ;;  %v3421_v9 = vrot.slane %v3412_v59, %v9272_v3  ;;  %v8037_v53 = vld [vmem:[%s10969_s10 + $0x44] ss:$28 sps:$4 sm:$0xff]  }
 0x431   :  { %3533 = vmatpush1.bf16.msra.mxu1 %v7915_v2 }
 0x432   :  { %4707 = vmatprep.subr.bf16.mxu1 %v7920_v4 }
 0x434   :  { %6849 = vmatmul.mubr.msk.bf16.vlgmr.msra.gmra.mxu1 %vm2763_vm1, %v3403_v60  ;;  %v3417_v60 = vrot.slane %v3412_v59, %v9263_v0 }
 0x435   :  { %4708 = vmatpush1.bf16.msra.mxu1 %v7918_v7 }
 0x436   :  { %4709 = vmatprep.subr.bf16.mxu1 %v7923_v8  ;;  %v3425_v8 = vrot.slane %v3412_v59, %v9327_v33 }
 0x439   :  { %4710 = vmatpush1.bf16.msra.mxu1 %v7921_v10  ;;  %v7990_v10 = vld [vmem:[%s10969_s10 + $0x510] ss:$28 sps:$4 sm:$0xff]  }
 0x43a   :  { %4711 = vmatprep.subr.bf16.mxu1 %v7926_v11  ;;  %v3429_v11 = vrot.slane %v3412_v59, %v9336_v35  ;;  %v8043_v59 = vld [vmem:[%s10969_s10 + $0xc] ss:$28 sps:$4 sm:$0xff]  }
 0x43d   :  { %4712 = vmatpush1.bf16.msra.mxu1 %v7924_v12 }
 0x43e   :  { %4713 = vmatprep.subr.bf16.mxu1 %v7929_v13 }
 0x441   :  { %4714 = vmatpush1.bf16.msra.mxu1 %v7927_v14  ;;  %v7998_v14 = vld [vmem:[%s10969_s10 + $0x4dc] ss:$28 sps:$4 sm:$0xff]  }
 0x442   :  { %4715 = vmatprep.subr.bf16.mxu1 %v7932_v15 }
 0x445   :  { %4716 = vmatpush1.bf16.msra.mxu1 %v7930_v16 }
 0x446   :  { %4717 = vmatprep.subr.bf16.mxu1 %v7935_v17 }
 0x449   :  { %4718 = vmatpush1.bf16.msra.mxu1 %v7933_v18  ;;  %v7996_v18 = vld [vmem:[%s10969_s10 + $0x4d8] ss:$28 sps:$4 sm:$0xff]  }
 0x44a   :  { %4719 = vmatprep.subr.bf16.mxu1 %v7938_v19 }
 0x44d   :  { %4720 = vmatpush1.bf16.msra.mxu1 %v7936_v20 }
 0x44e   :  { %4721 = vmatprep.subr.bf16.mxu1 %v7941_v22  ;;  %v8004_v22 = vld [vmem:[%s10969_s10 + $0x4a4] ss:$28 sps:$4 sm:$0xff]  }
 0x451   :  { %4722 = vmatpush1.bf16.msra.mxu1 %v7939_v42 }
 0x452   :  { %4723 = vmatprep.subr.bf16.mxu1 %v7944_v24 }
 0x455   :  { %4724 = vmatpush2.bf16.msra.mxu1 %v7942_v56 }
 0x456   :  { %4725 = vmatprep.subr.bf16.mxu1 %v7947_v27  ;;  %v7999_v27 = vld [vmem:[%s10969_s10 + $0x190] ss:$28 sps:$4 sm:$0xff]  }
 0x459   :  { %4726 = vmatpush2.bf16.msra.mxu1 %v7945_v28  ;;  %v8002_v28 = vld [vmem:[%s10969_s10 + $0x4a0] ss:$28 sps:$4 sm:$0xff]  }
 0x45a   :  { %4727 = vmatprep.subr.bf16.mxu1 %v7953_v48 }
 0x45d   :  { %4728 = vmatpush2.bf16.msra.mxu1 %v7951_v29  ;;  %v8007_v29 = vld [vmem:[%s10969_s10 + $0x15c] ss:$28 sps:$4 sm:$0xff]  }
 0x45e   :  { %4729 = vmatprep.subr.bf16.mxu1 %v7959_v21  ;;  %v8010_v21 = vld [vmem:[%s10969_s10 + $0x46c] ss:$28 sps:$4 sm:$0xff]  }
 0x461   :  { %4730 = vmatpush2.bf16.msra.mxu1 %v7957_v30  ;;  %v8005_v30 = vld [vmem:[%s10969_s10 + $0x158] ss:$28 sps:$4 sm:$0xff]  }
 0x462   :  { %4731 = vmatprep.subr.bf16.mxu1 %v7965_v32  ;;  %v8008_v32 = vld [vmem:[%s10969_s10 + $0x468] ss:$28 sps:$4 sm:$0xff]  }
 0x465   :  { %4732 = vmatpush2.bf16.msra.mxu1 %v7963_v54  ;;  %v8013_v54 = vld [vmem:[%s10969_s10 + $0x124] ss:$28 sps:$4 sm:$0xff]  }
 0x466   :  { %4733 = vmatprep.subr.bf16.mxu1 %v7971_v34  ;;  %v8016_v34 = vld [vmem:[%s10969_s10 + $0x434] ss:$28 sps:$4 sm:$0xff]  }
 0x469   :  { %4734 = vmatpush2.bf16.msra.mxu1 %v7969_v37  ;;  %v8011_v37 = vld [vmem:[%s10969_s10 + $0x120] ss:$28 sps:$4 sm:$0xff]  }
 0x46a   :  { %4735 = vmatprep.subr.bf16.mxu1 %v7977_v38  ;;  %v8014_v38 = vld [vmem:[%s10969_s10 + $0x430] ss:$28 sps:$4 sm:$0xff]  }
 0x46d   :  { %4736 = vmatpush2.bf16.msra.mxu1 %v7975_v39  ;;  %v8022_v39 = vld [vmem:[%s10969_s10 + $0x3fc] ss:$28 sps:$4 sm:$0xff]  }
 0x46e   :  { %4737 = vmatprep.subr.bf16.mxu1 %v7983_v40  ;;  %v8020_v40 = vld [vmem:[%s10969_s10 + $0x3f8] ss:$28 sps:$4 sm:$0xff]  }
 0x471   :  { %4738 = vmatpush2.bf16.msra.mxu1 %v7981_v43  ;;  %v8028_v43 = vld [vmem:[%s10969_s10 + $0x3c4] ss:$28 sps:$4 sm:$0xff]  }
 0x472   :  { %4830 = vmatprep.subr.bf16.mxu1 %v7992_v46  ;;  %v8031_v46 = vld [vmem:[%s10969_s10 + $0x7c] ss:$28 sps:$4 sm:$0xff]  }
 0x49c   :  { %v6397_v55 = vpop.permute.xlu0 %6396 }
 0x49d   :  { %v6400_v57 = vsel %vm6399_vm2, %v9854_v36, %v6397_v55  ;;  %v8040_v55 = vld [vmem:[%s10969_s10 + $0x54c] ss:$28 sps:$4 sm:$0xff]  }
 0x49e   :  { %v6402_v58 = vsel %vm6401_vm3, %v6400_v57, 0.0  ;;  %v8035_v57 = vld [vmem:[%s10969_s10 + $0x40] ss:$28 sps:$4 sm:$0xff]  }
 0x49f   :  { %6403 = vst [vmem:[#allocation4] sm:$0xff] %v6402_v58  ;;  %v8038_v58 = vld [vmem:[%s10969_s10 + $0x548] ss:$28 sps:$4 sm:$0xff]  }
 0x4ec   :  { %v3511_v62 = vpop.f32.mrf.mxu1 }
 0x4ed   :  { %v3512_v1 = vadd.f32 %v3511_v62, %v3417_v60  ;;  %v8046_v60 = vld [vmem:[%s10969_s10 + $0x19c] ss:$28 sps:$4 sm:$0xff]  }
 0x4ee   :  { %v3513_v2 = vpop.f32.mrf.mxu1  ;;  %v8044_v62 = vld [vmem:[%s10969_s10 + $0x198] ss:$28 sps:$4 sm:$0xff]  }
 0x4ef   :  { %v3514_v4 = vadd.f32 %v3513_v2, %v3421_v9  ;;  %v3559_v5 = vmax.f32 %v3512_v1, 0.0  ;;  %v8041_v9 = vld [vmem:[%s10969_s10 + $0x8] ss:$28 sps:$4 sm:$0xff]   ;;  %v8049_v1 = vld [vmem:[%s10969_s10 + $0x354] ss:$28 sps:$4 sm:$0xff]  }
 0x4f0   :  { %v3515_v6 = vpop.f32.mrf.mxu1  ;;  %v8052_v2 = vld [vmem:[%s10969_s10 + $0x164] ss:$28 sps:$4 sm:$0xff]  }
 0x4f1   :  { %v3560_v7 = vmax.f32 %v3514_v4, 0.0  ;;  %v10051_v12 = vpack.c.bf16 %v3559_v5, %v3559_v5  ;;  %v8047_v4 = vld [vmem:[%s10969_s10 + $0x350] ss:$28 sps:$4 sm:$0xff]   ;;  %v8050_v5 = vld [vmem:[%s10969_s10 + $0x160] ss:$28 sps:$4 sm:$0xff]  }
 0x4f2   :  { %v3516_v36 = vpop.f32.mrf.mxu1  ;;  %v8055_v6 = vld [vmem:[%s10969_s10 + $0x31c] ss:$28 sps:$4 sm:$0xff]  }
 0x4f3   :  { %v10045_v63 = vpack.c.bf16 %v3560_v7, %v3560_v7  ;;  %v8058_v7 = vld [vmem:[%s10969_s10 + $0x12c] ss:$28 sps:$4 sm:$0xff]  }
 0x4f4   :  { %v3552_v13 = vpop.f32.mrf.mxu1  ;;  %v8056_v36 = vld [vmem:[%s10969_s10 + $0x128] ss:$28 sps:$4 sm:$0xff]  }
 0x4f5   :  { %v3553_v15 = vadd.f32 %v3552_v13, %v3425_v8  ;;  %4739 = vmatprep.mubr.bf16.mxu1 %v10045_v63  ;;  %v8053_v8 = vld [vmem:[%s10969_s10 + $0x318] ss:$28 sps:$4 sm:$0xff]   ;;  %v8059_v13 = vld [vmem:[%s10969_s10 + $0x2e0] ss:$28 sps:$4 sm:$0xff]  }
 0x4f6   :  { %v3554_v16 = vpop.f32.mrf.mxu1  ;;  %4740 = vmatmul.mubr.bf16.vlgmr.msra.gmra.mxu1 %v10051_v12 }
 0x4f7   :  { %v3555_v17 = vadd.f32 %v3554_v16, %v3429_v11  ;;  %4831 = vmatpush1.bf16.msra.mxu1 %v7990_v10  ;;  %v3561_v19 = vmax.f32 %v3553_v15, 0.0  ;;  %v8061_v10 = vld [vmem:[%s10969_s10 + $0x2e4] ss:$28 sps:$4 sm:$0xff]   ;;  %v8064_v11 = vld [vmem:[%s10969_s10 + $0xf4] ss:$28 sps:$4 sm:$0xff]  }
 0x4f8   :  { %v3556_v20 = vpop.f32.mrf.mxu1  ;;  %4832 = vmatprep.subr.bf16.mxu1 %v7998_v14  ;;  %v8062_v14 = vld [vmem:[%s10969_s10 + $0xf0] ss:$28 sps:$4 sm:$0xff]   ;;  %v8070_v16 = vld [vmem:[%s10969_s10 + $0xbc] ss:$28 sps:$4 sm:$0xff]  }
 0x4f9   :  { %v3562_v42 = vmax.f32 %v3555_v17, 0.0  ;;  %v10072_v48 = vpack.c.bf16 %v3561_v19, %v3561_v19  ;;  %v8067_v15 = vld [vmem:[%s10969_s10 + $0x2ac] ss:$28 sps:$4 sm:$0xff]   ;;  %v8073_v19 = vld [vmem:[%s10969_s10 + $0x274] ss:$28 sps:$4 sm:$0xff]  }
 0x4fa   :  { %v3557_v24 = vpop.f32.mrf.mxu1  ;;  %v8065_v17 = vld [vmem:[%s10969_s10 + $0x2a8] ss:$28 sps:$4 sm:$0xff]  }
 0x4fb   :  { %v10064_v56 = vpack.c.bf16 %v3562_v42, %v3562_v42  ;;  %4833 = vmatpush1.bf16.msra.mxu1 %v7996_v18  ;;  %v8068_v18 = vld [vmem:[%s10969_s10 + $0xb8] ss:$28 sps:$4 sm:$0xff]   ;;  %v8076_v20 = vld [vmem:[%s10969_s10 + $0x84] ss:$28 sps:$4 sm:$0xff]  }
 0x4fc   :  { %4834 = vmatprep.subr.bf16.mxu1 %v8004_v22  ;;  %v8071_v22 = vld [vmem:[%s10969_s10 + $0x270] ss:$28 sps:$4 sm:$0xff]   ;;  %v8074_v42 = vld [vmem:[%s10969_s10 + $0x80] ss:$28 sps:$4 sm:$0xff]  }
 0x4fd   :  { %7025 = vmatprep.mubr.msk.bf16.mxu0 %vm1197_vm0, %v10064_v56  ;;  %7026 = vmatprep.mubr.msk.bf16.mxu1 %vm1197_vm0, %v10064_v56  ;;  %v8079_v24 = vld [vmem:[%s10969_s10 + $0x23c] ss:$28 sps:$4 sm:$0xff]  }
 0x4fe   :  { %4781 = vmatmul.mubr.bf16.vlgmr.msra.gmra.mxu0 %v10072_v48 }
 0x4ff   :  { %4790 = vmatpush1.bf16.msra.mxu0 %v7999_v27  ;;  %4835 = vmatpush1.bf16.msra.mxu1 %v8002_v28  ;;  %v8082_v27 = vld [vmem:[%s10969_s10 + $0x4c] ss:$28 sps:$4 sm:$0xff]   ;;  %v8077_v28 = vld [vmem:[%s10969_s10 + $0x238] ss:$28 sps:$4 sm:$0xff]  }
 0x500   :  { %4821 = vmatprep.mubr.bf16.mxu0 %v10045_v63  ;;  %4791 = vmatprep.subr.bf16.mxu0 %v8007_v29  ;;  %v8080_v29 = vld [vmem:[%s10969_s10 + $0x48] ss:$28 sps:$4 sm:$0xff]  }
 0x501   :  { %4836 = vmatprep.subr.bf16.mxu1 %v8010_v21  ;;  %v8085_v21 = vld [vmem:[%s10969_s10 + $0x204] ss:$28 sps:$4 sm:$0xff]  }
 0x503   :  { %4792 = vmatpush1.bf16.msra.mxu0 %v8005_v30  ;;  %4837 = vmatpush1.bf16.msra.mxu1 %v8008_v32  ;;  %v8088_v30 = vld [vmem:[%s10969_s10 + $0x14] ss:$28 sps:$4 sm:$0xff]   ;;  %v8083_v32 = vld [vmem:[%s10969_s10 + $0x200] ss:$28 sps:$4 sm:$0xff]  }
 0x504   :  { %4793 = vmatprep.subr.bf16.mxu0 %v8013_v54  ;;  %4838 = vmatprep.subr.bf16.mxu1 %v8016_v34  ;;  %v8086_v54 = vld [vmem:[%s10969_s10 + $0x10] ss:$28 sps:$4 sm:$0xff]  }
 0x505   :  { %v8091_v34 = vld [vmem:[%s10969_s10 + $0x1cc] ss:$28 sps:$4 sm:$0xff]  }
 0x507   :  { %4794 = vmatpush1.bf16.msra.mxu0 %v8011_v37  ;;  %4839 = vmatpush1.bf16.msra.mxu1 %v8014_v38  ;;  %v8094_v37 = vld [vmem:[%s10969_s10 + $0x35c] ss:$28 sps:$4 sm:$0xff]   ;;  %v8089_v38 = vld [vmem:[%s10969_s10 + $0x1c8] ss:$28 sps:$4 sm:$0xff]  }
 0x508   :  { %4795 = vmatprep.subr.bf16.mxu0 %v8019_v23  ;;  %4840 = vmatprep.subr.bf16.mxu1 %v8022_v39  ;;  %v8092_v23 = vld [vmem:[%s10969_s10 + $0x358] ss:$28 sps:$4 sm:$0xff]   ;;  %v8097_v39 = vld [vmem:[%s10969_s10 + $0x324] ss:$28 sps:$4 sm:$0xff]  }
 0x50b   :  { %4796 = vmatpush1.bf16.msra.mxu0 %v8017_v47  ;;  %4841 = vmatpush1.bf16.msra.mxu1 %v8020_v40  ;;  %v8100_v47 = vld [vmem:[%s10969_s10 + $0x51c] ss:$28 sps:$4 sm:$0xff]  }
 0x50c   :  { %4797 = vmatprep.subr.bf16.mxu0 %v8025_v41  ;;  %4842 = vmatprep.subr.bf16.mxu1 %v8028_v43  ;;  %v8095_v40 = vld [vmem:[%s10969_s10 + $0x320] ss:$28 sps:$4 sm:$0xff]   ;;  %v8098_v41 = vld [vmem:[%s10969_s10 + $0x518] ss:$28 sps:$4 sm:$0xff]   ;;  %v8103_v43 = vld [vmem:[%s10969_s10 + $0x2ec] ss:$28 sps:$4 sm:$0xff]  }
 0x50f   :  { %4798 = vmatpush1.bf16.msra.mxu0 %v8023_v44  ;;  %4843 = vmatpush1.bf16.msra.mxu1 %v8026_v45  ;;  %v8106_v44 = vld [vmem:[%s10969_s10 + $0x4e4] ss:$28 sps:$4 sm:$0xff]  }
 0x510   :  { %4799 = vmatprep.subr.bf16.mxu0 %v8031_v46  ;;  %4844 = vmatprep.subr.bf16.mxu1 %v8034_v49  ;;  %v8101_v45 = vld [vmem:[%s10969_s10 + $0x2e8] ss:$28 sps:$4 sm:$0xff]   ;;  %v8104_v46 = vld [vmem:[%s10969_s10 + $0x4e0] ss:$28 sps:$4 sm:$0xff]   ;;  %v8109_v49 = vld [vmem:[%s10969_s10 + $0x2b4] ss:$28 sps:$4 sm:$0xff]  }
 0x513   :  { %4800 = vmatpush1.bf16.msra.mxu0 %v8029_v50  ;;  %4845 = vmatpush1.bf16.msra.mxu1 %v8032_v51  ;;  %v8112_v50 = vld [vmem:[%s10969_s10 + $0x4ac] ss:$28 sps:$4 sm:$0xff]  }
 0x514   :  { %4801 = vmatprep.subr.bf16.mxu0 %v8037_v53  ;;  %4860 = vmatprep.subr.bf16.mxu1 %v8040_v55  ;;  %v8107_v51 = vld [vmem:[%s10969_s10 + $0x2b0] ss:$28 sps:$4 sm:$0xff]   ;;  %v8110_v53 = vld [vmem:[%s10969_s10 + $0x4a8] ss:$28 sps:$4 sm:$0xff]   ;;  %v8115_v55 = vld [vmem:[%s10969_s10 + $0x27c] ss:$28 sps:$4 sm:$0xff]  }
 0x517   :  { %4802 = vmatpush1.bf16.msra.mxu0 %v8035_v57  ;;  %4861 = vmatpush2.bf16.msra.mxu1 %v8038_v58  ;;  %v8118_v57 = vld [vmem:[%s10969_s10 + $0x474] ss:$28 sps:$4 sm:$0xff]  }
 0x518   :  { %4803 = vmatprep.subr.bf16.mxu0 %v8043_v59  ;;  %4871 = vmatprep.subr.bf16.mxu1 %v8046_v60  ;;  %v8113_v58 = vld [vmem:[%s10969_s10 + $0x278] ss:$28 sps:$4 sm:$0xff]   ;;  %v8116_v59 = vld [vmem:[%s10969_s10 + $0x470] ss:$28 sps:$4 sm:$0xff]   ;;  %v8121_v60 = vld [vmem:[%s10969_s10 + $0x244] ss:$28 sps:$4 sm:$0xff]  }
 0x51a   :  { %4863 = vmatmul.mubr.bf16.vlgmr.msra.gmra.mxu1 %v10072_v48 }
 0x51b   :  { %4804 = vmatpush1.bf16.msra.mxu0 %v8041_v9  ;;  %4872 = vmatpush1.bf16.msra.mxu1 %v8044_v62  ;;  %v8124_v9 = vld [vmem:[%s10969_s10 + $0x43c] ss:$28 sps:$4 sm:$0xff]  }
 0x51c   :  { %4903 = vmatprep.mubr.bf16.mxu1 %v10045_v63  ;;  %4805 = vmatprep.subr.bf16.mxu0 %v8049_v1  ;;  %v8119_v62 = vld [vmem:[%s10969_s10 + $0x240] ss:$28 sps:$4 sm:$0xff]   ;;  %v8122_v1 = vld [vmem:[%s10969_s10 + $0x438] ss:$28 sps:$4 sm:$0xff]  }
 0x51d   :  { %4873 = vmatprep.subr.bf16.mxu1 %v8052_v2  ;;  %v8127_v2 = vld [vmem:[%s10969_s10 + $0x20c] ss:$28 sps:$4 sm:$0xff]  }
 0x51f   :  { %4806 = vmatpush2.bf16.msra.mxu0 %v8047_v4  ;;  %4874 = vmatpush1.bf16.msra.mxu1 %v8050_v5  ;;  %v8130_v4 = vld [vmem:[%s10969_s10 + $0x404] ss:$28 sps:$4 sm:$0xff]  }
 0x520   :  { %4807 = vmatprep.subr.bf16.mxu0 %v8055_v6  ;;  %4875 = vmatprep.subr.bf16.mxu1 %v8058_v7  ;;  %v8125_v5 = vld [vmem:[%s10969_s10 + $0x208] ss:$28 sps:$4 sm:$0xff]   ;;  %v8128_v6 = vld [vmem:[%s10969_s10 + $0x400] ss:$28 sps:$4 sm:$0xff]   ;;  %v8133_v7 = vld [vmem:[%s10969_s10 + $0x1d4] ss:$28 sps:$4 sm:$0xff]  }
 0x523   :  { %4808 = vmatpush2.bf16.msra.mxu0 %v8053_v8  ;;  %4876 = vmatpush1.bf16.msra.mxu1 %v8056_v36  ;;  %v8136_v8 = vld [vmem:[%s10969_s10 + $0x3cc] ss:$28 sps:$4 sm:$0xff]  }
 0x524   :  { %4809 = vmatprep.subr.bf16.mxu0 %v8061_v10  ;;  %4877 = vmatprep.subr.bf16.mxu1 %v8064_v11  ;;  %v8131_v36 = vld [vmem:[%s10969_s10 + $0x1d0] ss:$28 sps:$4 sm:$0xff]   ;;  %v8134_v10 = vld [vmem:[%s10969_s10 + $0x3c8] ss:$28 sps:$4 sm:$0xff]  }
 0x525   :  { %v8139_v11 = vld [vmem:[%s10969_s10 + $0x394] ss:$28 sps:$4 sm:$0xff]  }
 0x527   :  { %4810 = vmatpush2.bf16.msra.mxu0 %v8059_v13  ;;  %4878 = vmatpush1.bf16.msra.mxu1 %v8062_v14  ;;  %v8137_v13 = vld [vmem:[%s10969_s10 + $0x390] ss:$28 sps:$4 sm:$0xff]   ;;  %v8140_v14 = vld [vmem:[%s10969_s10 + $0x520] ss:$28 sps:$4 sm:$0xff]  }
 0x528   :  { %4811 = vmatprep.subr.bf16.mxu0 %v8067_v15  ;;  %4879 = vmatprep.subr.bf16.mxu1 %v8070_v16  ;;  %v8143_v15 = vld [vmem:[%s10969_s10 + $0x554] ss:$28 sps:$4 sm:$0xff]  }
 0x529   :  { %v8141_v16 = vld [vmem:[%s10969_s10 + $0x550] ss:$28 sps:$4 sm:$0xff]  }
 0x52b   :  { %4812 = vmatpush2.bf16.msra.mxu0 %v8065_v17  ;;  %4880 = vmatpush1.bf16.msra.mxu1 %v8068_v18  ;;  %v8144_v17 = vld [vmem:[%s10969_s10 + $0x4e8] ss:$28 sps:$4 sm:$0xff]   ;;  %v8145_v18 = vld [vmem:[%s10969_s10 + $0x360] ss:$28 sps:$4 sm:$0xff]  }
 0x52c   :  { %4813 = vmatprep.subr.bf16.mxu0 %v8073_v19  ;;  %4881 = vmatprep.subr.bf16.mxu1 %v8076_v20  ;;  %v8146_v19 = vld [vmem:[%s10969_s10 + $0x1a0] ss:$28 sps:$4 sm:$0xff]   ;;  %v8148_v20 = vld [vmem:[%s10969_s10 + $0x328] ss:$28 sps:$4 sm:$0xff]  }
 0x52f   :  { %4814 = vmatpush2.bf16.msra.mxu0 %v8071_v22  ;;  %4882 = vmatpush1.bf16.msra.mxu1 %v8074_v42  ;;  %v8149_v22 = vld [vmem:[%s10969_s10 + $0x168] ss:$28 sps:$4 sm:$0xff]   ;;  %v8150_v42 = vld [vmem:[%s10969_s10 + $0x478] ss:$28 sps:$4 sm:$0xff]  }
 0x530   :  { %4815 = vmatprep.subr.bf16.mxu0 %v8079_v24  ;;  %4883 = vmatprep.subr.bf16.mxu1 %v8082_v27  ;;  %v8151_v24 = vld [vmem:[%s10969_s10 + $0x2f0] ss:$28 sps:$4 sm:$0xff]   ;;  %v8153_v27 = vld [vmem:[%s10969_s10 + $0x440] ss:$28 sps:$4 sm:$0xff]  }
 0x533   :  { %4816 = vmatpush2.bf16.msra.mxu0 %v8077_v28  ;;  %4884 = vmatpush1.bf16.msra.mxu1 %v8080_v29  ;;  %v8154_v28 = vld [vmem:[%s10969_s10 + $0x2b8] ss:$28 sps:$4 sm:$0xff]  }
 0x534   :  { %4817 = vmatprep.subr.bf16.mxu0 %v8085_v21  ;;  %4885 = vmatprep.subr.bf16.mxu1 %v8088_v30  ;;  %v8155_v29 = vld [vmem:[%s10969_s10 + $0xf8] ss:$28 sps:$4 sm:$0xff]   ;;  %v8156_v21 = vld [vmem:[%s10969_s10 + $0x408] ss:$28 sps:$4 sm:$0xff]   ;;  %v8157_v30 = vld [vmem:[%s10969_s10 + $0x280] ss:$28 sps:$4 sm:$0xff]  }
 0x537   :  { %4818 = vmatpush2.bf16.msra.mxu0 %v8083_v32  ;;  %4886 = vmatpush1.bf16.msra.mxu1 %v8086_v54  ;;  %v8158_v32 = vld [vmem:[%s10969_s10 + $0xc0] ss:$28 sps:$4 sm:$0xff]   ;;  %v8159_v54 = vld [vmem:[%s10969_s10 + $0x3d0] ss:$28 sps:$4 sm:$0xff]  }
 0x538   :  { %4819 = vmatprep.subr.bf16.mxu0 %v8091_v34  ;;  %4887 = vmatprep.subr.bf16.mxu1 %v8094_v37  ;;  %v8160_v34 = vld [vmem:[%s10969_s10 + $0x248] ss:$28 sps:$4 sm:$0xff]  }
 0x539   :  { %v8161_v37 = vld [vmem:[%s10969_s10 + $0x88] ss:$28 sps:$4 sm:$0xff]  }
 0x53b   :  { %4820 = vmatpush2.bf16.msra.mxu0 %v8089_v38  ;;  %4888 = vmatpush2.bf16.msra.mxu1 %v8092_v23  ;;  %v8162_v38 = vld [vmem:[%s10969_s10 + $0x398] ss:$28 sps:$4 sm:$0xff]   ;;  %v8163_v23 = vld [vmem:[%s10969_s10 + $0x210] ss:$28 sps:$4 sm:$0xff]  }
 0x53c   :  { %4889 = vmatprep.subr.bf16.mxu1 %v8097_v39  ;;  %4912 = vmatprep.subr.bf16.mxu0 %v8100_v47  ;;  %v8164_v39 = vld [vmem:[%s10969_s10 + $0x50] ss:$28 sps:$4 sm:$0xff]   ;;  %v8165_v47 = vld [vmem:[%s10969_s10 + $0x558] ss:$28 sps:$4 sm:$0xff]  }
 0x53e   :  { %4822 = vmatmul.mubr.bf16.vlgmr.msra.gmra.mxu0 %v10051_v12 }
 0x53f   :  { %4890 = vmatpush2.bf16.msra.mxu1 %v8095_v40  ;;  %4913 = vmatpush1.bf16.msra.mxu0 %v8098_v41  ;;  %v8166_v40 = vld [vmem:[%s10969_s10 + $0x1d8] ss:$28 sps:$4 sm:$0xff]  }
 0x540   :  { %7027 = vmatprep.mubr.msk.bf16.mxu0 %vm1197_vm0, %v10064_v56  ;;  %4891 = vmatprep.subr.bf16.mxu1 %v8103_v43  ;;  %v8218_v41 = vld [vmem:[%s10971_s12 + $0x22c] ss:$12 sps:$4 sm:$0xff]  }
 0x541   :  { %4914 = vmatprep.subr.bf16.mxu0 %v8106_v44  ;;  %v8167_v43 = vld [vmem:[%s10969_s10 + $0x18] ss:$28 sps:$4 sm:$0xff]  }
 0x542   :  { %v8170_v44 = vld [vmem:[%s10971_s12 + $0xac] ss:$12 sps:$4 sm:$0xff]  }
 0x543   :  { %4892 = vmatpush2.bf16.msra.mxu1 %v8101_v45  ;;  %4915 = vmatpush1.bf16.msra.mxu0 %v8104_v46  ;;  %v8216_v45 = vld [vmem:[%s10971_s12 + $0x228] ss:$12 sps:$4 sm:$0xff]  }
 0x544   :  { %4893 = vmatprep.subr.bf16.mxu1 %v8109_v49  ;;  %4916 = vmatprep.subr.bf16.mxu0 %v8112_v50  ;;  %v8221_v46 = vld [vmem:[%s10971_s12 + $0x214] ss:$12 sps:$4 sm:$0xff]  }
 0x545   :  { %v8168_v49 = vld [vmem:[%s10971_s12 + $0xa8] ss:$12 sps:$4 sm:$0xff]  }
 0x546   :  { %v8173_v50 = vld [vmem:[%s10971_s12 + $0x94] ss:$12 sps:$4 sm:$0xff]  }
 0x547   :  { %4894 = vmatpush2.bf16.msra.mxu1 %v8107_v51  ;;  %4917 = vmatpush1.bf16.msra.mxu0 %v8110_v53  ;;  %v8219_v51 = vld [vmem:[%s10971_s12 + $0x210] ss:$12 sps:$4 sm:$0xff]  }
 0x548   :  { %4895 = vmatprep.subr.bf16.mxu1 %v8115_v55  ;;  %4918 = vmatprep.subr.bf16.mxu0 %v8118_v57  ;;  %v8171_v53 = vld [vmem:[%s10971_s12 + $0x90] ss:$12 sps:$4 sm:$0xff]   ;;  %v8222_v57 = vld [vmem:[%s10971_s12 + $0x1f8] ss:$12 sps:$4 sm:$0xff]  }
 0x549   :  { %v8176_v55 = vld [vmem:[%s10971_s12 + $0x7c] ss:$12 sps:$4 sm:$0xff]  }
 0x54b   :  { %4896 = vmatpush2.bf16.msra.mxu1 %v8113_v58  ;;  %4919 = vmatpush1.bf16.msra.mxu0 %v8116_v59  ;;  %v8174_v58 = vld [vmem:[%s10971_s12 + $0x78] ss:$12 sps:$4 sm:$0xff]  }
 0x54c   :  { %4897 = vmatprep.subr.bf16.mxu1 %v8121_v60  ;;  %4920 = vmatprep.subr.bf16.mxu0 %v8124_v9  ;;  %v8179_v59 = vld [vmem:[%s10971_s12 + $0x64] ss:$12 sps:$4 sm:$0xff]   ;;  %v8225_v60 = vld [vmem:[%s10971_s12 + $0x1e0] ss:$12 sps:$4 sm:$0xff]  }
 0x54d   :  { %v8230_v9 = vld [vmem:[%s10971_s12 + $0x1cc] ss:$12 sps:$4 sm:$0xff]  }
 0x54f   :  { %4898 = vmatpush2.bf16.msra.mxu1 %v8119_v62  ;;  %4921 = vmatpush1.bf16.msra.mxu0 %v8122_v1  ;;  %v8177_v62 = vld [vmem:[%s10971_s12 + $0x60] ss:$12 sps:$4 sm:$0xff]  }
 0x550   :  { %4899 = vmatprep.subr.bf16.mxu1 %v8127_v2  ;;  %4922 = vmatprep.subr.bf16.mxu0 %v8130_v4  ;;  %v8182_v1 = vld [vmem:[%s10971_s12 + $0x4c] ss:$12 sps:$4 sm:$0xff]   ;;  %v8228_v2 = vld [vmem:[%s10971_s12 + $0x1c8] ss:$12 sps:$4 sm:$0xff]  }
 0x551   :  { %v8233_v4 = vld [vmem:[%s10971_s12 + $0x1b4] ss:$12 sps:$4 sm:$0xff]  }
 0x553   :  { %4900 = vmatpush2.bf16.msra.mxu1 %v8125_v5  ;;  %4923 = vmatpush1.bf16.msra.mxu0 %v8128_v6  ;;  %v8180_v5 = vld [vmem:[%s10971_s12 + $0x48] ss:$12 sps:$4 sm:$0xff]  }
 0x554   :  { %4901 = vmatprep.subr.bf16.mxu1 %v8133_v7  ;;  %4924 = vmatprep.subr.bf16.mxu0 %v8136_v8  ;;  %v8185_v6 = vld [vmem:[%s10971_s12 + $0x34] ss:$12 sps:$4 sm:$0xff]   ;;  %v8231_v7 = vld [vmem:[%s10971_s12 + $0x1b0] ss:$12 sps:$4 sm:$0xff]  }
 0x555   :  { %v8236_v8 = vld [vmem:[%s10971_s12 + $0x19c] ss:$12 sps:$4 sm:$0xff]  }
 0x557   :  { %4902 = vmatpush2.bf16.msra.mxu1 %v8131_v36  ;;  %4925 = vmatpush1.bf16.msra.mxu0 %v8134_v10  ;;  %v8183_v36 = vld [vmem:[%s10971_s12 + $0x30] ss:$12 sps:$4 sm:$0xff]  }
 0x558   :  { %4926 = vmatprep.subr.bf16.mxu0 %v8139_v11  ;;  %4993 = vmatprep.subr.bf16.mxu1 %v8414_v52  ;;  %v8188_v10 = vld [vmem:[%s10971_s12 + $0x1c] ss:$12 sps:$4 sm:$0xff]   ;;  %v8234_v11 = vld [vmem:[%s10971_s12 + $0x198] ss:$12 sps:$4 sm:$0xff]  }
 0x55a   :  { %4904 = vmatmul.mubr.bf16.vlgmr.msra.gmra.mxu1 %v10051_v12 }
 0x55b   :  { %4927 = vmatpush1.bf16.msra.mxu0 %v8137_v13  ;;  %4994 = vmatpush1.bf16.msra.mxu1 %v8140_v14  ;;  %v8239_v13 = vld [vmem:[%s10971_s12 + $0x184] ss:$12 sps:$4 sm:$0xff]  }
 0x55c   :  { %7028 = vmatprep.mubr.msk.bf16.mxu1 %vm1197_vm0, %v10064_v56  ;;  %4942 = vmatprep.subr.bf16.mxu0 %v8143_v15  ;;  %v8147_v56 = vld [vmem:[%s10969_s10 + $0x4b0] ss:$28 sps:$4 sm:$0xff]   ;;  %v8186_v14 = vld [vmem:[%s10971_s12 + $0x18] ss:$12 sps:$4 sm:$0xff]  }
 0x55d   :  { %4995 = vmatprep.subr.bf16.mxu1 %v8414_v52  ;;  %v8191_v15 = vld [vmem:[%s10971_s12 + $0x4] ss:$12 sps:$4 sm:$0xff]  }
 0x55f   :  { %4943 = vmatpush2.bf16.msra.mxu0 %v8141_v16  ;;  %4996 = vmatpush1.bf16.msra.mxu1 %v8144_v17  ;;  %v8237_v16 = vld [vmem:[%s10971_s12 + $0x180] ss:$12 sps:$4 sm:$0xff]  }
 0x560   :  { %7225 = vmatprep.subr.bf16.mxu0 %v8145_v18  ;;  %4997 = vmatprep.subr.bf16.mxu1 %v8414_v52  ;;  %v8242_v17 = vld [vmem:[%s10971_s12 + $0x2ec] ss:$12 sps:$4 sm:$0xff]  }
 0x561   :  { %v8189_v18 = vld [vmem:[%s10971_s12] ss:$12 sps:$4 sm:$0xff]  }
 0x562   :  { %4945 = vmatmul.mubr.bf16.vlgmr.msra.gmra.mxu0 %v10072_v48 }
 0x563   :  { %7226 = vmatpush3.bf16.msra.mxu0 %v8146_v19  ;;  %4985 = vmatprep.mubr.bf16.mxu0 %v10045_v63  ;;  %v8152_v63 = vld [vmem:[%s10969_s10 + $0x130] ss:$28 sps:$4 sm:$0xff]  }
 0x564   :  { %4998 = vmatpush1.bf16.msra.mxu1 %v8147_v56  ;;  %7227 = vmatprep.subr.bf16.mxu0 %v8148_v20  ;;  %v8194_v19 = vld [vmem:[%s10971_s12 + $0x16c] ss:$12 sps:$4 sm:$0xff]   ;;  %v8240_v56 = vld [vmem:[%s10971_s12 + $0x2e8] ss:$12 sps:$4 sm:$0xff]  }
 0x565   :  { %4999 = vmatprep.subr.bf16.mxu1 %v8414_v52  ;;  %v8248_v20 = vld [vmem:[%s10971_s12 + $0x2d4] ss:$12 sps:$4 sm:$0xff]  }
 0x567   :  { %7228 = vmatpush3.bf16.msra.mxu0 %v8149_v22  ;;  %v8192_v22 = vld [vmem:[%s10971_s12 + $0x168] ss:$12 sps:$4 sm:$0xff]  }
 0x568   :  { %5000 = vmatpush1.bf16.msra.mxu1 %v8150_v42  ;;  %7229 = vmatprep.subr.bf16.mxu0 %v8151_v24  ;;  %v8197_v42 = vld [vmem:[%s10971_s12 + $0x154] ss:$12 sps:$4 sm:$0xff]   ;;  %v8246_v24 = vld [vmem:[%s10971_s12 + $0x2d0] ss:$12 sps:$4 sm:$0xff]  }
 0x569   :  { %5001 = vmatprep.subr.bf16.mxu1 %v8414_v52 }
 0x56b   :  { %7230 = vmatpush3.bf16.msra.mxu0 %v8152_v63  ;;  %v8254_v63 = vld [vmem:[%s10971_s12 + $0x2bc] ss:$12 sps:$4 sm:$0xff]  }
 0x56c   :  { %5002 = vmatpush1.bf16.msra.mxu1 %v8153_v27  ;;  %7231 = vmatprep.subr.bf16.mxu0 %v8154_v28  ;;  %v8195_v27 = vld [vmem:[%s10971_s12 + $0x150] ss:$12 sps:$4 sm:$0xff]  }
 0x56d   :  { %5003 = vmatprep.subr.bf16.mxu1 %v8414_v52  ;;  %v8200_v28 = vld [vmem:[%s10971_s12 + $0x13c] ss:$12 sps:$4 sm:$0xff]  }
 0x56f   :  { %7232 = vmatpush3.bf16.msra.mxu0 %v8155_v29  ;;  %v8252_v29 = vld [vmem:[%s10971_s12 + $0x2b8] ss:$12 sps:$4 sm:$0xff]  }
 0x570   :  { %5004 = vmatpush1.bf16.msra.mxu1 %v8156_v21  ;;  %7233 = vmatprep.subr.bf16.mxu0 %v8157_v30  ;;  %v8260_v21 = vld [vmem:[%s10971_s12 + $0x2a4] ss:$12 sps:$4 sm:$0xff]  }
 0x571   :  { %5005 = vmatprep.subr.bf16.mxu1 %v8414_v52  ;;  %v8198_v30 = vld [vmem:[%s10971_s12 + $0x138] ss:$12 sps:$4 sm:$0xff]  }
 0x573   :  { %7234 = vmatpush3.bf16.msra.mxu0 %v8158_v32  ;;  %v8203_v32 = vld [vmem:[%s10971_s12 + $0x124] ss:$12 sps:$4 sm:$0xff]  }
 0x574   :  { %5006 = vmatpush1.bf16.msra.mxu1 %v8159_v54  ;;  %7235 = vmatprep.subr.bf16.mxu0 %v8160_v34  ;;  %v8258_v54 = vld [vmem:[%s10971_s12 + $0x2a0] ss:$12 sps:$4 sm:$0xff]  }
 0x575   :  { %5007 = vmatprep.subr.bf16.mxu1 %v8414_v52  ;;  %v8266_v34 = vld [vmem:[%s10971_s12 + $0x28c] ss:$12 sps:$4 sm:$0xff]  }
 0x577   :  { %7236 = vmatpush3.bf16.msra.mxu0 %v8161_v37  ;;  %v8201_v37 = vld [vmem:[%s10971_s12 + $0x120] ss:$12 sps:$4 sm:$0xff]  }
 0x578   :  { %5008 = vmatpush1.bf16.msra.mxu1 %v8162_v38  ;;  %7237 = vmatprep.subr.bf16.mxu0 %v8163_v23  ;;  %v8206_v38 = vld [vmem:[%s10971_s12 + $0x10c] ss:$12 sps:$4 sm:$0xff]   ;;  %v8264_v23 = vld [vmem:[%s10971_s12 + $0x288] ss:$12 sps:$4 sm:$0xff]  }
 0x579   :  { %5023 = vmatprep.subr.bf16.mxu1 %v8414_v52 }
 0x57b   :  { %7238 = vmatpush3.bf16.msra.mxu0 %v8164_v39  ;;  %v8272_v39 = vld [vmem:[%s10971_s12 + $0x274] ss:$12 sps:$4 sm:$0xff]  }
 0x57c   :  { %5024 = vmatpush2.bf16.msra.mxu1 %v8165_v47  ;;  %7239 = vmatprep.subr.bf16.mxu0 %v8166_v40  ;;  %v8204_v47 = vld [vmem:[%s10971_s12 + $0x108] ss:$12 sps:$4 sm:$0xff]  }
 0x57d   :  { %6108 = vmatprep.subr.bf16.mxu1 %v8218_v41  ;;  %v8209_v40 = vld [vmem:[%s10971_s12 + $0xf4] ss:$12 sps:$4 sm:$0xff]   ;;  %v8270_v41 = vld [vmem:[%s10971_s12 + $0x270] ss:$12 sps:$4 sm:$0xff]  }
 0x57f   :  { %5026 = vmatmul.mubr.bf16.vlgmr.msra.gmra.mxu1 %v10072_v48  ;;  %7240 = vmatpush3.bf16.msra.mxu0 %v8167_v43  ;;  %v8224_v48 = vld [vmem:[%s10971_s12 + $0x1fc] ss:$12 sps:$4 sm:$0xff]  }
 0x580   :  { %6067 = vmatprep.subr.bf16.mxu0 %v8170_v44  ;;  %6109 = vmatpush1.bf16.msra.mxu1 %v8216_v45  ;;  %v8278_v43 = vld [vmem:[%s10971_s12 + $0x25c] ss:$12 sps:$4 sm:$0xff]  }
 0x581   :  { %6110 = vmatprep.subr.bf16.mxu1 %v8221_v46  ;;  %v8207_v44 = vld [vmem:[%s10971_s12 + $0xf0] ss:$12 sps:$4 sm:$0xff]   ;;  %v8276_v46 = vld [vmem:[%s10971_s12 + $0x258] ss:$12 sps:$4 sm:$0xff]  }
 0x582   :  { %4986 = vmatmul.mubr.bf16.vlgmr.msra.gmra.mxu0 %v10051_v12  ;;  %v8227_v12 = vld [vmem:[%s10971_s12 + $0x1e4] ss:$12 sps:$4 sm:$0xff]   ;;  %v8212_v45 = vld [vmem:[%s10971_s12 + $0xdc] ss:$12 sps:$4 sm:$0xff]  }
 0x583   :  { %6068 = vmatpush1.bf16.msra.mxu0 %v8168_v49  ;;  %v8284_v49 = vld [vmem:[%s10971_s12 + $0x244] ss:$12 sps:$4 sm:$0xff]  }
 0x584   :  { %6069 = vmatprep.subr.bf16.mxu0 %v8173_v50  ;;  %6111 = vmatpush1.bf16.msra.mxu1 %v8219_v51  ;;  %v10635_v50 = vld [vmem:[%s10970_s11] sm:$0x7f] }
 0x585   :  { %6112 = vmatprep.subr.bf16.mxu1 %v8224_v48  ;;  %v8210_v48 = vld [vmem:[%s10971_s12 + $0xd8] ss:$12 sps:$4 sm:$0xff]  }
 0x587   :  { %6070 = vmatpush1.bf16.msra.mxu0 %v8171_v53 }
 0x588   :  { %6071 = vmatprep.subr.bf16.mxu0 %v8176_v55  ;;  %6113 = vmatpush1.bf16.msra.mxu1 %v8222_v57  ;;  %v8215_v55 = vld [vmem:[%s10971_s12 + $0xc4] ss:$12 sps:$4 sm:$0xff]   ;;  %v8282_v57 = vld [vmem:[%s10971_s12 + $0x240] ss:$12 sps:$4 sm:$0xff]  }
 0x589   :  { %6114 = vmatprep.subr.bf16.mxu1 %v8227_v12  ;;  %v3772_v12 = vrot.slane %v10635_v50, %v9263_v0 }
 0x58b   :  { %6072 = vmatpush1.bf16.msra.mxu0 %v8174_v58 }
 0x58c   :  { %6073 = vmatprep.subr.bf16.mxu0 %v8179_v59  ;;  %6115 = vmatpush1.bf16.msra.mxu1 %v8225_v60  ;;  %v3776_v59 = vrot.slane %v10635_v50, %v9272_v3  ;;  %v8213_v60 = vld [vmem:[%s10971_s12 + $0xc0] ss:$12 sps:$4 sm:$0xff]  }
 0x58d   :  { %6116 = vmatprep.subr.bf16.mxu1 %v8230_v9 }
 0x58f   :  { %6074 = vmatpush1.bf16.msra.mxu0 %v8177_v62  ;;  %v8245_v62 = vld [vmem:[%s10971_s12 + $0x3ac] ss:$12 sps:$4 sm:$0xff]  }
 0x590   :  { %6075 = vmatprep.subr.bf16.mxu0 %v8182_v1  ;;  %6117 = vmatpush1.bf16.msra.mxu1 %v8228_v2 }
 0x591   :  { %6118 = vmatprep.subr.bf16.mxu1 %v8233_v4 }
 0x593   :  { %6076 = vmatpush1.bf16.msra.mxu0 %v8180_v5 }
 0x594   :  { %6077 = vmatprep.subr.bf16.mxu0 %v8185_v6  ;;  %6119 = vmatpush1.bf16.msra.mxu1 %v8231_v7 }
 0x595   :  { %6120 = vmatprep.subr.bf16.mxu1 %v8236_v8 }
 0x597   :  { %6078 = vmatpush1.bf16.msra.mxu0 %v8183_v36 }
 0x598   :  { %6079 = vmatprep.subr.bf16.mxu0 %v8188_v10  ;;  %6121 = vmatpush1.bf16.msra.mxu1 %v8234_v11 }
 0x599   :  { %6122 = vmatprep.subr.bf16.mxu1 %v8239_v13 }
 0x59b   :  { %6080 = vmatpush1.bf16.msra.mxu0 %v8186_v14  ;;  %v8243_v14 = vld [vmem:[%s10971_s12 + $0x3a8] ss:$12 sps:$4 sm:$0xff]  }
 0x59c   :  { %6081 = vmatprep.subr.bf16.mxu0 %v8191_v15  ;;  %6123 = vmatpush1.bf16.msra.mxu1 %v8237_v16  ;;  %v8328_v15 = vld [vmem:[%s10971_s12 + $0x49c] ss:$12 sps:$4 sm:$0xff]  }
 0x59d   :  { %6124 = vmatprep.subr.bf16.mxu1 %v8242_v17  ;;  %v8251_v17 = vld [vmem:[%s10971_s12 + $0x394] ss:$12 sps:$4 sm:$0xff]  }
 0x59f   :  { %6082 = vmatpush1.bf16.msra.mxu0 %v8189_v18  ;;  %v8249_v18 = vld [vmem:[%s10971_s12 + $0x390] ss:$12 sps:$4 sm:$0xff]  }
 0x5a0   :  { %6083 = vmatprep.subr.bf16.mxu0 %v8194_v19  ;;  %6125 = vmatpush2.bf16.msra.mxu1 %v8240_v56  ;;  %v8257_v19 = vld [vmem:[%s10971_s12 + $0x37c] ss:$12 sps:$4 sm:$0xff]   ;;  %v8255_v56 = vld [vmem:[%s10971_s12 + $0x378] ss:$12 sps:$4 sm:$0xff]  }
 0x5a1   :  { %6126 = vmatprep.subr.bf16.mxu1 %v8248_v20  ;;  %v8263_v20 = vld [vmem:[%s10971_s12 + $0x364] ss:$12 sps:$4 sm:$0xff]  }
 0x5a3   :  { %6084 = vmatpush2.bf16.msra.mxu0 %v8192_v22  ;;  %v8261_v22 = vld [vmem:[%s10971_s12 + $0x360] ss:$12 sps:$4 sm:$0xff]  }
 0x5a4   :  { %6085 = vmatprep.subr.bf16.mxu0 %v8197_v42  ;;  %6127 = vmatpush2.bf16.msra.mxu1 %v8246_v24  ;;  %v8269_v42 = vld [vmem:[%s10971_s12 + $0x34c] ss:$12 sps:$4 sm:$0xff]   ;;  %v8267_v24 = vld [vmem:[%s10971_s12 + $0x348] ss:$12 sps:$4 sm:$0xff]  }
 0x5a5   :  { %6128 = vmatprep.subr.bf16.mxu1 %v8254_v63  ;;  %v8275_v63 = vld [vmem:[%s10971_s12 + $0x334] ss:$12 sps:$4 sm:$0xff]  }
 0x5a7   :  { %6086 = vmatpush2.bf16.msra.mxu0 %v8195_v27  ;;  %v8273_v27 = vld [vmem:[%s10971_s12 + $0x330] ss:$12 sps:$4 sm:$0xff]  }
 0x5a8   :  { %6087 = vmatprep.subr.bf16.mxu0 %v8200_v28  ;;  %6129 = vmatpush2.bf16.msra.mxu1 %v8252_v29  ;;  %v8281_v29 = vld [vmem:[%s10971_s12 + $0x31c] ss:$12 sps:$4 sm:$0xff]  }
 0x5a9   :  { %6130 = vmatprep.subr.bf16.mxu1 %v8260_v21 }
 0x5ab   :  { %6088 = vmatpush2.bf16.msra.mxu0 %v8198_v30  ;;  %v8279_v30 = vld [vmem:[%s10971_s12 + $0x318] ss:$12 sps:$4 sm:$0xff]  }
 0x5ac   :  { %6089 = vmatprep.subr.bf16.mxu0 %v8203_v32  ;;  %6131 = vmatpush2.bf16.msra.mxu1 %v8258_v54  ;;  %v8287_v54 = vld [vmem:[%s10971_s12 + $0x304] ss:$12 sps:$4 sm:$0xff]  }
 0x5ad   :  { %6132 = vmatprep.subr.bf16.mxu1 %v8266_v34 }
 0x5af   :  { %6090 = vmatpush2.bf16.msra.mxu0 %v8201_v37  ;;  %v8285_v37 = vld [vmem:[%s10971_s12 + $0x300] ss:$12 sps:$4 sm:$0xff]  }
 0x5b0   :  { %6091 = vmatprep.subr.bf16.mxu0 %v8206_v38  ;;  %6133 = vmatpush2.bf16.msra.mxu1 %v8264_v23  ;;  %v8290_v38 = vld [vmem:[%s10971_s12 + $0x46c] ss:$12 sps:$4 sm:$0xff]   ;;  %v8288_v23 = vld [vmem:[%s10971_s12 + $0x468] ss:$12 sps:$4 sm:$0xff]  }
 0x5b1   :  { %6134 = vmatprep.subr.bf16.mxu1 %v8272_v39  ;;  %v8293_v39 = vld [vmem:[%s10971_s12 + $0x454] ss:$12 sps:$4 sm:$0xff]  }
 0x5b3   :  { %6092 = vmatpush2.bf16.msra.mxu0 %v8204_v47  ;;  %v8291_v47 = vld [vmem:[%s10971_s12 + $0x450] ss:$12 sps:$4 sm:$0xff]  }
 0x5b4   :  { %6093 = vmatprep.subr.bf16.mxu0 %v8209_v40  ;;  %6135 = vmatpush2.bf16.msra.mxu1 %v8270_v41  ;;  %v8296_v40 = vld [vmem:[%s10971_s12 + $0x43c] ss:$12 sps:$4 sm:$0xff]   ;;  %v8294_v41 = vld [vmem:[%s10971_s12 + $0x438] ss:$12 sps:$4 sm:$0xff]  }
 0x5b5   :  { %6136 = vmatprep.subr.bf16.mxu1 %v8278_v43  ;;  %v8299_v43 = vld [vmem:[%s10971_s12 + $0x424] ss:$12 sps:$4 sm:$0xff]  }
 0x5b6   :  { %v4741_v51 = vpop.f32.mrf.mxu1 }
 0x5b7   :  { %6094 = vmatpush2.bf16.msra.mxu0 %v8207_v44  ;;  %v4742_v1 = vadd.f32 %v4741_v51, %v3772_v12  ;;  %v8297_v44 = vld [vmem:[%s10971_s12 + $0x420] ss:$12 sps:$4 sm:$0xff]   ;;  %v8303_v51 = vld [vmem:[%s10971_s12 + $0x3f0] ss:$12 sps:$4 sm:$0xff]  }
 0x5b8   :  { %v4743_v53 = vpop.f32.mrf.mxu1  ;;  %6095 = vmatprep.subr.bf16.mxu0 %v8212_v45  ;;  %6137 = vmatpush2.bf16.msra.mxu1 %v8276_v46  ;;  %v8302_v45 = vld [vmem:[%s10971_s12 + $0x40c] ss:$12 sps:$4 sm:$0xff]   ;;  %v8300_v46 = vld [vmem:[%s10971_s12 + $0x408] ss:$12 sps:$4 sm:$0xff]  }
 0x5b9   :  { %6138 = vmatprep.subr.bf16.mxu1 %v8284_v49  ;;  %v4744_v4 = vadd.f32 %v4743_v53, %v3776_v59  ;;  %v8305_v49 = vld [vmem:[%s10971_s12 + $0x3f4] ss:$12 sps:$4 sm:$0xff]   ;;  %v3780_v53 = vrot.slane %v10635_v50, %v9327_v33 }
 0x5ba   :  { %v4745_v58 = vpop.f32.mrf.mxu1 }
 0x5bb   :  { %6096 = vmatpush2.bf16.msra.mxu0 %v8210_v48  ;;  %v8308_v48 = vld [vmem:[%s10971_s12 + $0x3dc] ss:$12 sps:$4 sm:$0xff]   ;;  %v8311_v58 = vld [vmem:[%s10971_s12 + $0x3c4] ss:$12 sps:$4 sm:$0xff]  }
 0x5bc   :  { %v4746_v9 = vpop.f32.mrf.mxu1  ;;  %6097 = vmatprep.subr.bf16.mxu0 %v8215_v55  ;;  %6139 = vmatpush2.bf16.msra.mxu1 %v8282_v57  ;;  %v3784_v55 = vrot.slane %v10635_v50, %v9336_v35  ;;  %v8306_v57 = vld [vmem:[%s10971_s12 + $0x3d8] ss:$12 sps:$4 sm:$0xff]   ;;  %v8309_v35 = vld [vmem:[%s10971_s12 + $0x3c0] ss:$12 sps:$4 sm:$0xff]  }
 0x5bd   :  { %6202 = vmatprep.subr.bf16.mxu1 %v8328_v15  ;;  %v8334_v15 = vld [vmem:[%s10971_s12 + $0x170] ss:$12 sps:$4 sm:$0xff]  }
 0x5be   :  { %v4782_v2 = vpop.f32.mrf.mxu0 }
 0x5bf   :  { %v4783_v5 = vadd.f32 %v4782_v2, %v4742_v1  ;;  %6098 = vmatpush2.bf16.msra.mxu0 %v8213_v60  ;;  %v8312_v2 = vld [vmem:[%s10971_s12 + $0x470] ss:$12 sps:$4 sm:$0xff]  }
 0x5c0   :  { %v4784_v6 = vpop.f32.mrf.mxu0  ;;  %6149 = vmatprep.subr.bf16.mxu0 %v8245_v62 }
 0x5c1   :  { %v4785_v7 = vadd.f32 %v4784_v6, %v4744_v4  ;;  %v5033_v8 = vmax.f32 %v4783_v5, 0.0 }
 0x5c2   :  { %v4786_v36 = vpop.f32.mrf.mxu0 }
 0x5c3   :  { %v5034_v10 = vmax.f32 %v4785_v7, 0.0  ;;  %v10664_v16 = vpack.c.bf16 %v5033_v8, %v5033_v8  ;;  %v8326_v36 = vld [vmem:[%s10971_s12 + $0x498] ss:$12 sps:$4 sm:$0xff]  }
 0x5c4   :  { %v4787_v11 = vpop.f32.mrf.mxu0 }
 0x5c5   :  { %v10656_v13 = vpack.c.bf16 %v5034_v10, %v5034_v10  ;;  %v8333_v11 = vld [vmem:[%s10971_s12 + $0x484] ss:$12 sps:$4 sm:$0xff]  }
 0x5c7   :  { %6099 = vmatprep.mubr.bf16.mxu0 %v10656_v13 }
 0x5c8   :  { %6100 = vmatmul.mubr.bf16.vlgmr.msra.gmra.mxu0 %v10664_v16 }
 0x5c9   :  { %6150 = vmatpush1.bf16.msra.mxu0 %v8243_v14  ;;  %v8331_v14 = vld [vmem:[%s10971_s12 + $0x480] ss:$12 sps:$4 sm:$0xff]  }
 0x5ca   :  { %6151 = vmatprep.subr.bf16.mxu0 %v8251_v17 }
 0x5cd   :  { %6152 = vmatpush1.bf16.msra.mxu0 %v8249_v18 }
 0x5ce   :  { %6153 = vmatprep.subr.bf16.mxu0 %v8257_v19  ;;  %v3788_v19 = vrot.slane %v10635_v50, %v280_v25  ;;  %v8313_v25 = vld [vmem:[%s10971_s12 + $0x3b0] ss:$12 sps:$4 sm:$0xff]  }
 0x5d1   :  { %6154 = vmatpush1.bf16.msra.mxu0 %v8255_v56 }
 0x5d2   :  { %6155 = vmatprep.subr.bf16.mxu0 %v8263_v20  ;;  %v3792_v20 = vrot.slane %v10635_v50, %v284_v26  ;;  %v8314_v26 = vld [vmem:[%s10971_s12 + $0x458] ss:$12 sps:$4 sm:$0xff]  }
 0x5d5   :  { %6156 = vmatpush1.bf16.msra.mxu0 %v8261_v22 }
 0x5d6   :  { %6157 = vmatprep.subr.bf16.mxu0 %v8269_v42 }
 0x5d9   :  { %6158 = vmatpush1.bf16.msra.mxu0 %v8267_v24 }
 0x5da   :  { %v4864_v28 = vpop.f32.mrf.mxu1  ;;  %6159 = vmatprep.subr.bf16.mxu0 %v8275_v63 }
 0x5dc   :  { %v4866_v21 = vpop.f32.mrf.mxu1 }
 0x5dd   :  { %6160 = vmatpush1.bf16.msra.mxu0 %v8273_v27 }
 0x5de   :  { %v4868_v32 = vpop.f32.mrf.mxu1  ;;  %6161 = vmatprep.subr.bf16.mxu0 %v8281_v29 }
 0x5e0   :  { %v4869_v34 = vpop.f32.mrf.mxu1 }
 0x5e1   :  { %6162 = vmatpush1.bf16.msra.mxu0 %v8279_v30 }
 0x5e2   :  { %6163 = vmatprep.subr.bf16.mxu0 %v8287_v54 }
 0x5e5   :  { %6164 = vmatpush1.bf16.msra.mxu0 %v8285_v37  ;;  %v8315_v37 = vld [vmem:[%s10971_s12 + $0x398] ss:$12 sps:$4 sm:$0xff]  }
 0x5e6   :  { %6165 = vmatprep.subr.bf16.mxu0 %v8290_v38  ;;  %v8316_v38 = vld [vmem:[%s10971_s12 + $0x440] ss:$12 sps:$4 sm:$0xff]  }
 0x5e9   :  { %6166 = vmatpush2.bf16.msra.mxu0 %v8288_v23  ;;  %v8317_v23 = vld [vmem:[%s10971_s12 + $0x380] ss:$12 sps:$4 sm:$0xff]  }
 0x5ea   :  { %6167 = vmatprep.subr.bf16.mxu0 %v8293_v39  ;;  %v8318_v39 = vld [vmem:[%s10971_s12 + $0x428] ss:$12 sps:$4 sm:$0xff]  }
 0x5ed   :  { %6168 = vmatpush2.bf16.msra.mxu0 %v8291_v47  ;;  %v8319_v47 = vld [vmem:[%s10971_s12 + $0x368] ss:$12 sps:$4 sm:$0xff]  }
 0x5ee   :  { %6169 = vmatprep.subr.bf16.mxu0 %v8296_v40  ;;  %v8320_v40 = vld [vmem:[%s10971_s12 + $0x410] ss:$12 sps:$4 sm:$0xff]  }
 0x5f1   :  { %6170 = vmatpush2.bf16.msra.mxu0 %v8294_v41  ;;  %v8321_v41 = vld [vmem:[%s10971_s12 + $0x350] ss:$12 sps:$4 sm:$0xff]  }
 0x5f2   :  { %6171 = vmatprep.subr.bf16.mxu0 %v8299_v43  ;;  %v8322_v43 = vld [vmem:[%s10971_s12 + $0x3f8] ss:$12 sps:$4 sm:$0xff]  }
 0x5f5   :  { %6172 = vmatpush2.bf16.msra.mxu0 %v8297_v44  ;;  %v8323_v44 = vld [vmem:[%s10971_s12 + $0x338] ss:$12 sps:$4 sm:$0xff]  }
 0x5f6   :  { %6173 = vmatprep.subr.bf16.mxu0 %v8302_v45  ;;  %v8324_v45 = vld [vmem:[%s10971_s12 + $0x3e0] ss:$12 sps:$4 sm:$0xff]  }
 0x5f9   :  { %6174 = vmatpush2.bf16.msra.mxu0 %v8300_v46 }
 0x5fa   :  { %6175 = vmatprep.subr.bf16.mxu0 %v8305_v49 }
 0x5fd   :  { %6176 = vmatpush2.bf16.msra.mxu0 %v8303_v51  ;;  %v8325_v51 = vld [vmem:[%s10971_s12 + $0x320] ss:$12 sps:$4 sm:$0xff]  }
 0x5fe   :  { %v4823_v12 = vpop.f32.mrf.mxu0  ;;  %6177 = vmatprep.subr.bf16.mxu0 %v8308_v48 }
 0x5ff   :  { %v4824_v59 = vadd.f32 %v4823_v12, %v3780_v53  ;;  %v8329_v53 = vld [vmem:[%s10971_s12 + $0x3c8] ss:$12 sps:$4 sm:$0xff]  }
 0x600   :  { %v4825_v60 = vpop.f32.mrf.mxu0 }
 0x601   :  { %v4865_v9 = vadd.f32 %v4864_v28, %v4824_v59  ;;  %v4826_v62 = vadd.f32 %v4825_v60, %v3784_v55  ;;  %6178 = vmatpush2.bf16.msra.mxu0 %v8306_v57  ;;  %v3796_v57 = vrot.slane %v10635_v50, %v288_v31  ;;  %v8330_v60 = vld [vmem:[%s10971_s12 + $0x308] ss:$12 sps:$4 sm:$0xff]   ;;  %v8336_v50 = vld [vmem:[%s10971_s12 + $0x158] ss:$12 sps:$4 sm:$0xff]  }
 0x602   :  { %v4827_v1 = vpop.f32.mrf.mxu0  ;;  %6179 = vmatprep.subr.bf16.mxu0 %v8311_v58 }
 0x603   :  { %v4867_v4 = vadd.f32 %v4866_v21, %v4826_v62  ;;  %v5035_v5 = vmax.f32 %v4865_v9, 0.0 }
 0x604   :  { %v4828_v6 = vpop.f32.mrf.mxu0 }
 0x605   :  { %v5036_v7 = vmax.f32 %v4867_v4, 0.0  ;;  %6180 = vmatpush2.bf16.msra.mxu0 %v8309_v35  ;;  %v10770_v10 = vpack.c.bf16 %v5035_v5, %v5035_v5  ;;  %v8337_v4 = vld [vmem:[%s10971_s12 + $0x98] ss:$12 sps:$4 sm:$0xff]   ;;  %v8338_v5 = vld [vmem:[%s10971_s12 + $0x140] ss:$12 sps:$4 sm:$0xff]  }
 0x606   :  { %7291 = vmatprep.subr.bf16.mxu0 %v8312_v2  ;;  %v8339_v6 = vld [vmem:[%s10971_s12 + $0x80] ss:$12 sps:$4 sm:$0xff]  }
 0x607   :  { %v10765_v8 = vpack.c.bf16 %v5036_v7, %v5036_v7  ;;  %v8340_v7 = vld [vmem:[%s10971_s12 + $0x128] ss:$12 sps:$4 sm:$0xff]  }
 0x609   :  { %6140 = vmatprep.mubr.bf16.mxu1 %v10765_v8 }
 0x60a   :  { %6141 = vmatmul.mubr.bf16.vlgmr.msra.gmra.mxu1 %v10770_v10 }
 0x60b   :  { %6203 = vmatpush1.bf16.msra.mxu1 %v8326_v36  ;;  %6222 = vmatprep.mubr.bf16.mxu1 %v8414_v52  ;;  %v8342_v36 = vld [vmem:[%s10971_s12 + $0x110] ss:$12 sps:$4 sm:$0xff]  }
 0x60c   :  { %6204 = vmatprep.subr.bf16.mxu1 %v8333_v11  ;;  %v8343_v11 = vld [vmem:[%s10971_s12 + $0x50] ss:$12 sps:$4 sm:$0xff]  }
 0x60f   :  { %6205 = vmatpush1.bf16.msra.mxu1 %v8331_v14  ;;  %v8344_v14 = vld [vmem:[%s10971_s12 + $0xf8] ss:$12 sps:$4 sm:$0xff]  }
 0x610   :  { %7247 = vmatprep.subr.bf16.mxu1 %v8334_v15  ;;  %v8345_v15 = vld [vmem:[%s10971_s12 + $0x38] ss:$12 sps:$4 sm:$0xff]  }
 0x61a   :  { %v4905_v17 = vpop.f32.mrf.mxu1 }
 0x61b   :  { %v4906_v52 = vadd.f32 %v4905_v17, %v3788_v19  ;;  %v8346_v17 = vld [vmem:[%s10971_s12 + $0xe0] ss:$12 sps:$4 sm:$0xff]   ;;  %v8348_v19 = vld [vmem:[%s10971_s12 + $0xc8] ss:$12 sps:$4 sm:$0xff]  }
 0x61c   :  { %v4907_v18 = vpop.f32.mrf.mxu1 }
 0x61d   :  { %v4908_v24 = vadd.f32 %v4907_v18, %v3792_v20  ;;  %v8347_v18 = vld [vmem:[%s10971_s12 + $0x20] ss:$12 sps:$4 sm:$0xff]   ;;  %v8350_v20 = vld [vmem:[%s10971_s12 + $0x2f0] ss:$12 sps:$4 sm:$0xff]  }
 0x61e   :  { %v4909_v56 = vpop.f32.mrf.mxu1 }
 0x61f   :  { %v8349_v56 = vld [vmem:[%s10971_s12 + $0x8] ss:$12 sps:$4 sm:$0xff]  }
 0x620   :  { %v4910_v22 = vpop.f32.mrf.mxu1 }
 0x621   :  { %v8351_v22 = vld [vmem:[%s10971_s12 + $0x230] ss:$12 sps:$4 sm:$0xff]  }
 0x622   :  { %v4946_v42 = vpop.f32.mrf.mxu0 }
 0x623   :  { %v4947_v63 = vadd.f32 %v4946_v42, %v4906_v52  ;;  %v8352_v52 = vld [vmem:[%s10971_s12 + $0x2d8] ss:$12 sps:$4 sm:$0xff]  }
 0x624   :  { %v4948_v27 = vpop.f32.mrf.mxu0  ;;  %v8353_v42 = vld [vmem:[%s10971_s12 + $0x218] ss:$12 sps:$4 sm:$0xff]  }
 0x625   :  { %v4949_v28 = vadd.f32 %v4948_v27, %v4908_v24  ;;  %v5037_v29 = vmax.f32 %v4947_v63, 0.0  ;;  %v8354_v24 = vld [vmem:[%s10971_s12 + $0x2c0] ss:$12 sps:$4 sm:$0xff]   ;;  %v8358_v27 = vld [vmem:[%s10971_s12 + $0x290] ss:$12 sps:$4 sm:$0xff]  }
 0x626   :  { %v4950_v21 = vpop.f32.mrf.mxu0  ;;  %v8355_v63 = vld [vmem:[%s10971_s12 + $0x200] ss:$12 sps:$4 sm:$0xff]  }
 0x627   :  { %v5038_v30 = vmax.f32 %v4949_v28, 0.0  ;;  %v5044_v34 = vpack.c.bf16 %v5037_v29, %v5037_v29  ;;  %v8359_v28 = vld [vmem:[%s10971_s12 + $0x1d0] ss:$12 sps:$4 sm:$0xff]   ;;  %v8360_v29 = vld [vmem:[%s10971_s12 + $0x278] ss:$12 sps:$4 sm:$0xff]  }
 0x628   :  { %v4951_v32 = vpop.f32.mrf.mxu0  ;;  %v8361_v21 = vld [vmem:[%s10971_s12 + $0x1b8] ss:$12 sps:$4 sm:$0xff]  }
 0x629   :  { %v5045_v54 = vpack.c.bf16 %v5038_v30, %v5038_v30  ;;  %v8362_v30 = vld [vmem:[%s10971_s12 + $0x260] ss:$12 sps:$4 sm:$0xff]  }
 0x62a   :  { %v8363_v32 = vld [vmem:[%s10971_s12 + $0x1a0] ss:$12 sps:$4 sm:$0xff]  }
 0x62b   :  { %6181 = vmatprep.mubr.bf16.mxu0 %v5045_v54 }
 0x62c   :  { %6182 = vmatmul.mubr.bf16.vlgmr.msra.gmra.mxu0 %v5044_v34 }
 0x62d   :  { %7292 = vmatpush3.bf16.msra.mxu0 %v8313_v25  ;;  %6343 = vmatprep.mubr.bf16.mxu0 %v5045_v54  ;;  %v8364_v54 = vld [vmem:[%s10971_s12 + $0x248] ss:$12 sps:$4 sm:$0xff]  }
 0x62e   :  { %7293 = vmatprep.subr.bf16.mxu0 %v8314_v26 }
 0x631   :  { %7294 = vmatpush3.bf16.msra.mxu0 %v8315_v37 }
 0x632   :  { %7295 = vmatprep.subr.bf16.mxu0 %v8316_v38  ;;  %v8366_v38 = vld [vmem:[%s10971_s12 + $0x4a0] ss:$12 sps:$4 sm:$0xff]  }
 0x635   :  { %7296 = vmatpush3.bf16.msra.mxu0 %v8317_v23  ;;  %v8417_v23 = vmov 0.0  }
 0x636   :  { %7297 = vmatprep.subr.bf16.mxu0 %v8318_v39 }
 0x639   :  { %7298 = vmatpush3.bf16.msra.mxu0 %v8319_v47  ;;  %v8367_v47 = vld [vmem:[%s10971_s12 + $0x488] ss:$12 sps:$4 sm:$0xff]  }
 0x63a   :  { %7299 = vmatprep.subr.bf16.mxu0 %v8320_v40  ;;  %v5247_v40 = vld [vmem:[%s10972_s13] sm:$0x7] }
 0x63d   :  { %7300 = vmatpush3.bf16.msra.mxu0 %v8321_v41  ;;  %v5252_v41 = vrot.slane %v5247_v40, %v9263_v0 }
 0x63e   :  { %7301 = vmatprep.subr.bf16.mxu0 %v8322_v43 }
 0x63f   :  { %v5027_v46 = vpop.f32.mrf.mxu1 }
 0x641   :  { %v5029_v49 = vpop.f32.mrf.mxu1  ;;  %7302 = vmatpush3.bf16.msra.mxu0 %v8323_v44 }
 0x642   :  { %v7241_v48 = vpop.f32.mrf.mxu0  ;;  %7303 = vmatprep.subr.bf16.mxu0 %v8324_v45 }
 0x643   :  { %v5030_v55 = vpop.f32.mrf.mxu1 }
 0x644   :  { %v7242_v12 = vpop.f32.mrf.mxu0 }
 0x645   :  { %v7243_v58 = vadd.f32 %v7242_v12, %v7241_v48  ;;  %v5031_v59 = vpop.f32.mrf.mxu1  ;;  %7304 = vmatpush3.bf16.msra.mxu0 %v8325_v51 }
 0x646   :  { %v7244_v9 = vpop.f32.mrf.mxu0  ;;  %7305 = vmatprep.subr.bf16.mxu0 %v8329_v53 }
 0x647   :  { %v4988_v62 = vadd.f32 %v7243_v58, %v3796_v57 }
 0x648   :  { %v7245_v35 = vpop.f32.mrf.mxu0 }
 0x649   :  { %v5028_v1 = vadd.f32 %v5027_v46, %v4988_v62  ;;  %7306 = vmatpush3.bf16.msra.mxu0 %v8330_v60 }
 0x64b   :  { %v5039_v2 = vmax.f32 %v5028_v1, 0.0 }
 0x64c   :  { %6344 = vmatmul.mubr.bf16.vlgmr.msra.gmra.mxu0 %v5044_v34  ;;  %v8365_v34 = vld [vmem:[%s10971_s12 + $0x188] ss:$12 sps:$4 sm:$0xff]  }
 0x64d   :  { %v10841_v31 = vpack.c.bf16 %v5039_v2, %v5039_v2 }
 0x64f   :  { %7179 = vmatmul.mubr.msk.bf16.vlgmr.msra.gmra.mxu1 %vm2763_vm1, %v10841_v31 }
 0x650   :  { %7248 = vmatpush3.bf16.msra.mxu1 %v8335_v61  ;;  %6263 = vmatprep.mubr.bf16.mxu1 %v10656_v13  ;;  %v8341_v13 = vld [vmem:[%s10971_s12 + $0x68] ss:$12 sps:$4 sm:$0xff]  }
 0x651   :  { %7249 = vmatprep.subr.bf16.mxu1 %v8336_v50 }
 0x654   :  { %7250 = vmatpush3.bf16.msra.mxu1 %v8337_v4 }
 0x655   :  { %7251 = vmatprep.subr.bf16.mxu1 %v8338_v5 }
 0x658   :  { %7252 = vmatpush3.bf16.msra.mxu1 %v8339_v6 }
 0x659   :  { %7253 = vmatprep.subr.bf16.mxu1 %v8340_v7 }
 0x65c   :  { %7254 = vmatpush3.bf16.msra.mxu1 %v8341_v13 }
 0x65d   :  { %7255 = vmatprep.subr.bf16.mxu1 %v8342_v36 }
 0x660   :  { %7256 = vmatpush3.bf16.msra.mxu1 %v8343_v11 }
 0x661   :  { %7257 = vmatprep.subr.bf16.mxu1 %v8344_v14 }
 0x664   :  { %7258 = vmatpush3.bf16.msra.mxu1 %v8345_v15 }
 0x665   :  { %7259 = vmatprep.subr.bf16.mxu1 %v8346_v17 }
 0x668   :  { %7260 = vmatpush3.bf16.msra.mxu1 %v8347_v18 }
 0x669   :  { %7261 = vmatprep.subr.bf16.mxu1 %v8348_v19 }
 0x66c   :  { %7262 = vmatpush3.bf16.msra.mxu1 %v8349_v56 }
 0x66d   :  { %7269 = vmatprep.subr.bf16.mxu1 %v8350_v20 }
 0x66f   :  { %6264 = vmatmul.mubr.bf16.vlgmr.msra.gmra.mxu1 %v10664_v16  ;;  %v8356_v16 = vld [vmem:[%s10971_s12 + $0x2a8] ss:$12 sps:$4 sm:$0xff]  }
 0x670   :  { %7270 = vmatpush3.bf16.msra.mxu1 %v8351_v22  ;;  %6303 = vmatprep.mubr.bf16.mxu1 %v10765_v8  ;;  %v8357_v8 = vld [vmem:[%s10971_s12 + $0x1e8] ss:$12 sps:$4 sm:$0xff]   ;;  %s8419_s12 = smov [#allocation4]  }
 0x671   :  { %7271 = vmatprep.subr.bf16.mxu1 %v8352_v52  ;;  %s6420_s19 = sshll.u32 %s8419_s12, 4  ;;  %s6421_s19 = int_to_ptr.vmem [resolvable:$true] %s6420_s19 }
 0x672   :  { %s8370_s5 = scalar_lea.vmem %s6421_s19, 128  ;;  %p8375_p1 = scmp.lt.s32.totalorder %s6421_s19, %s6421_s19 }
 0x673   :  { %p8371_p0 = scmp.ne.s32.totalorder %s6421_s19, %s8370_s5  ;;  %p8376_p2 = scmp.lt.s32.totalorder %s8370_s5, %s8370_s5 }
 0x674   :  { %7272 = vmatpush3.bf16.msra.mxu1 %v8353_v42 }
 0x675   :  { %7273 = vmatprep.subr.bf16.mxu1 %v8354_v24  ;;  %p8377_p3 = por %p8376_p2, %p8375_p1 }
 0x677   :  { %p8378_p4 = pnand %p8377_p3, %p8371_p0 }
 0x678   :  { %7274 = vmatpush3.bf16.msra.mxu1 %v8355_v63 }
 0x679   :  { %7275 = vmatprep.subr.bf16.mxu1 %v8356_v16 }
 0x67c   :  { %7276 = vmatpush3.bf16.msra.mxu1 %v8357_v8 }
 0x67d   :  { %7277 = vmatprep.subr.bf16.mxu1 %v8358_v27 }
 0x680   :  { %7278 = vmatpush3.bf16.msra.mxu1 %v8359_v28 }
 0x681   :  { %7279 = vmatprep.subr.bf16.mxu1 %v8360_v29 }
 0x684   :  { %7280 = vmatpush3.bf16.msra.mxu1 %v8361_v21 }
 0x685   :  { %7281 = vmatprep.subr.bf16.mxu1 %v8362_v30 }
 0x688   :  { %7282 = vmatpush3.bf16.msra.mxu1 %v8363_v32  ;;  %v6101_v25 = vpop.f32.mrf.mxu0 }
 0x689   :  { %7283 = vmatprep.subr.bf16.mxu1 %v8364_v54  ;;  %v6102_v43 = vadd.f32 %v6101_v25, %v5252_v41 }
 0x68a   :  { %v6103_v26 = vpop.f32.mrf.mxu0 }
 0x68c   :  { %7284 = vmatpush3.bf16.msra.mxu1 %v8365_v34  ;;  %v6105_v37 = vpop.f32.mrf.mxu0 }
 0x68d   :  { %7316 = vmatprep.subr.bf16.mxu1 %v8417_v23 }
 0x68e   :  { %v6106_v39 = vpop.f32.mrf.mxu0 }
 0x68f   :  { %6304 = vmatmul.mubr.bf16.vlgmr.msra.gmra.mxu1 %v10770_v10  ;;  %v5256_v10 = vrot.slane %v5247_v40, %v9272_v3 }
 0x690   :  { %7317 = vmatpush3.bf16.msra.mxu1 %v8366_v38  ;;  %7320 = vmatprep.mubr.msk.bf16.mxu1 %vm8418_vm4, %v8417_v23 }
 0x691   :  { %7318 = vmatprep.subr.bf16.mxu1 %v8417_v23  ;;  %v6104_v45 = vadd.f32 %v6103_v26, %v5256_v10 }
 0x694   :  { %7319 = vmatpush3.bf16.msra.mxu1 %v8367_v47 }
 0x697   :  { %7321 = vmatmul.mubr.msk.bf16.vlgmr.msra.gmra.mxu1 %vm2763_vm1, %v10841_v31 }
 0x6ca   :  { %v6142_v44 = vpop.f32.mrf.mxu1 }
 0x6cb   :  { %v6143_v46 = vadd.f32 %v6142_v44, %v6102_v43 }
 0x6cc   :  { %v6144_v49 = vpop.f32.mrf.mxu1 }
 0x6cd   :  { %v6145_v51 = vadd.f32 %v6144_v49, %v6104_v45 }
 0x6ce   :  { %v6146_v48 = vpop.f32.mrf.mxu1 }
 0x6d0   :  { %v6147_v53 = vpop.f32.mrf.mxu1 }
 0x6d1   :  { %8381 = shalt.err (!%p8378_p4)
}
 0x6d2   :  { %6423 = dma.vmem_to_hbm [thread:$0]  %s6421_s19, 128, %s10974_s15, [#allocation5]   ;;  %v5260_v36 = vrot.slane %v5247_v40, %v9327_v33  ;;  %vm6393_vm5 = vcmask 359424  }
 0x6d3   :  { %s8420_s15 = smov [#allocation2]  }
 0x6d4   :  { %s6410_s21 = sshll.u32 %s8420_s15, 4  ;;  %s6411_s21 = int_to_ptr.vmem [resolvable:$true] %s6410_s21 }
 0x6d5   :  { %s8390_s22 = scalar_lea.vmem %s6411_s21, 384  ;;  %p8395_p6 = scmp.lt.s32.totalorder %s6411_s21, %s6411_s21 }
 0x6d6   :  { %p8391_p5 = scmp.ne.s32.totalorder %s6411_s21, %s8390_s22  ;;  %p8396_p7 = scmp.lt.s32.totalorder %s8390_s22, %s8390_s22 }
 0x6d8   :  { %p8397_p8 = por %p8396_p7, %p8395_p6 }
 0x6da   :  { %p8398_p9 = pnand %p8397_p8, %p8391_p5 }
 0x6ec   :  { %v6183_v0 = vpop.f32.mrf.mxu0 }
 0x6ed   :  { %v6184_v58 = vadd.f32 %v6183_v0, %v6143_v46 }
 0x6ee   :  { %v6185_v3 = vpop.f32.mrf.mxu0 }
 0x6ef   :  { %v6186_v62 = vadd.f32 %v6185_v3, %v6145_v51 }
 0x6f0   :  { %v6187_v55 = vpop.f32.mrf.mxu0 }
 0x6f2   :  { %v6188_v57 = vpop.f32.mrf.mxu0 }
 0x70c   :  { %v7307_v12 = vpop.f32.mrf.mxu0 }
 0x70e   :  { %v7308_v59 = vpop.f32.mrf.mxu0 }
 0x70f   :  { %v7309_v60 = vadd.f32 %v7308_v59, %v7307_v12  ;;  %v6224_v9 = vpop.f32.mrf.mxu1 }
 0x710   :  { %v6225_v35 = vadd.f32 %v6224_v9, %v6184_v58  ;;  %v7310_v1 = vpop.f32.mrf.mxu0 }
 0x711   :  { %v6226_v2 = vpop.f32.mrf.mxu1 }
 0x712   :  { %6391 = vst [vmem:[#allocation2] sm:$0xff] %v6225_v35  ;;  %v6227_v61 = vadd.f32 %v6226_v2, %v6186_v62  ;;  %v7311_v31 = vpop.f32.mrf.mxu0 }
 0x713   :  { %v6228_v50 = vpop.f32.mrf.mxu1 }
 0x714   :  { %6392 = vst [vmem:[#allocation2 + $0x8] sm:$0xff] %v6227_v61 }
 0x715   :  { %v6229_v4 = vpop.f32.mrf.mxu1 }
 0x72f   :  { %v7263_v5 = vpop.f32.mrf.mxu1 }
 0x731   :  { %v7264_v6 = vpop.f32.mrf.mxu1 }
 0x732   :  { %v7265_v11 = vadd.f32 %v7264_v6, %v7263_v5 }
 0x733   :  { %v7266_v7 = vpop.f32.mrf.mxu1 }
 0x734   :  { %v6266_v17 = vadd.f32 %v7265_v11, %v5260_v36 }
 0x735   :  { %v7267_v13 = vpop.f32.mrf.mxu1 }
 0x74f   :  { %v7285_v14 = vpop.f32.mrf.mxu1 }
 0x751   :  { %v7286_v15 = vpop.f32.mrf.mxu1 }
 0x752   :  { %v7287_v18 = vadd.f32 %v7286_v15, %v7285_v14 }
 0x753   :  { %v7288_v19 = vpop.f32.mrf.mxu1 }
 0x754   :  { %v6306_v56 = vadd.f32 %v7287_v18, %v6266_v17 }
 0x755   :  { %v7289_v20 = vpop.f32.mrf.mxu1 }
 0x756   :  { %v6346_v22 = vadd.f32 %v7309_v60, %v6306_v56 }
 0x757   :  { %v6385_v52 = vpop.f32.mrf.mxu1 }
 0x758   :  { %v6386_v42 = vadd.f32 %v6385_v52, %v6346_v22 }
 0x759   :  { %v7322_v24 = vpop.f32.mrf.mxu1 }
 0x75a   :  { %6394 = vst.msk [vmem:[#allocation2 + $0x10] sm:$0xff] %vm6393_vm5, %v6386_v42 }
 0x75b   :  { %v6388_v63 = vpop.f32.mrf.mxu1 }
 0x75c   :  { %8401 = shalt.err (!%p8398_p9)
}
 0x75d   :  { %6413 = dma.vmem_to_hbm [thread:$0]  %s6411_s21, 384, %s10973_s14, [#allocation3]   ;;  %v7323_v33 = vpop.f32.mrf.mxu1 }
 0x75e   :  { %8410 = dma.done.wait [#allocation3], 384  }
 0x75f   :  { %8411 = vsyncadd [#allocation3], 4294966912 }
 0x760   :  { %8412 = dma.done.wait [#allocation5], 128  }
 0x761   :  { %8413 = vsyncadd [#allocation5], 4294967168 }
 0x762   :  { %6430 = vsyncpa [#allocation3], 1 }
 0x763   :  { %6431 = vsyncpa [#allocation5], 1 }

</bundles_post_ra>
